<compile_context>
chip_gen: v6e
topology: v6e:2x2x1
jax: 0.10.0
libtpu: 0.0.40
codegen_flags: <defaults>
</compile_context>

<pallas_src>
import math

import jax
import jax.numpy as jnp
from jax.experimental import pallas as pl
from jax.experimental.pallas import tpu as pltpu

jax.config.update("jax_default_matmul_precision", "highest")

_HI = jax.lax.Precision.HIGHEST
_BN_EPS = 1e-5  # PyTorch BatchNorm1d default


# ----------------------------------------------------------------------------
# Pallas kernel: one full GatedQueryAttLayer + BN + residual, for one batch.
# ----------------------------------------------------------------------------
def _make_agsa_layer_kernel(h, d_k, inv_sqrt_dk):
    def kernel(x_ref, res_ref,
               wq_ref, bq_ref, wk_ref, bk_ref, wv_ref, bv_ref,
               fcqw_ref, fcqb_ref, fckw_ref, fckb_ref, fcgw_ref, fcgb_ref,
               bns_ref, bnb_ref, o_ref):
        # x_ref/res_ref : (1, N, E)   current batch's attention input / residual base
        # w*_ref        : projection weights, pre-transposed to (in, out)
        # bns/bnb       : folded BatchNorm scale/shift, (1, E)
        x = x_ref[0]                                              # (N, E)

        def mm(a, w):
            return jnp.dot(a, w, precision=_HI,
                           preferred_element_type=jnp.float32)

        # QKV projections: lane-dense E-wide MXU matmuls.
        q = mm(x, wq_ref[...]) + bq_ref[...]                      # (N, E)
        k = mm(x, wk_ref[...]) + bk_ref[...]
        v = mm(x, wv_ref[...]) + bv_ref[...]

        head_outs = []
        for hd in range(h):                                       # static unroll over heads
            sl = slice(hd * d_k, (hd + 1) * d_k)
            qh, kh, vh = q[:, sl], k[:, sl], v[:, sl]             # (N, d_k)

            # Adaptive gating: M = sigmoid(fc_g(fc_q(q) * fc_k(k)))
            g = ((mm(qh, fcqw_ref[...]) + fcqb_ref[...]) *
                 (mm(kh, fckw_ref[...]) + fckb_ref[...]))         # (N, d_k)
            m = jax.nn.sigmoid(mm(g, fcgw_ref[...]) + fcgb_ref[...])   # (N, 2*d_k)
            qg = qh * m[:, :d_k]
            kg = kh * m[:, d_k:]

            # scores = qg @ kg^T / sqrt(d_k)
            scores = jax.lax.dot_general(
                qg, kg, (((1,), (1,)), ((), ())),
                precision=_HI, preferred_element_type=jnp.float32) * inv_sqrt_dk
            # TODO(synk): attention mask path (masked_fill(mask == 0, -1e9)) is not wired in;
            #             this kernel implements the mask=None forward only.

            # Numerically stable softmax over keys.
            s_max = jnp.max(scores, axis=-1, keepdims=True)
            e = jnp.exp(scores - s_max)
            p = e / jnp.sum(e, axis=-1, keepdims=True)

            head_outs.append(mm(p, vh))                           # (N, d_k)

        att = jnp.concatenate(head_outs, axis=-1) if h > 1 else head_outs[0]   # (N, E)

        # Residual + folded inference BatchNorm (Dropout == identity); one lane-dense store.
        o_ref[0] = res_ref[0] + att * bns_ref[...] + bnb_ref[...]

    return kernel


def _agsa_layer(x, res, p, h):
    """One AGSA layer: res + BN(GatedQueryAtt(x)).  x/res: (bs, N, E)."""
    bs, N, E = x.shape
    d_k = E // h

    # Fold eval-mode BatchNorm into a single scale/shift.
    inv_std = 1.0 / jnp.sqrt(p["bn_var"].astype(jnp.float32) + _BN_EPS)
    bn_scale = (p["bn_gamma"] * inv_std).reshape(1, E).astype(jnp.float32)
    bn_shift = (p["bn_beta"] - p["bn_mean"] * p["bn_gamma"] * inv_std
                ).reshape(1, E).astype(jnp.float32)

    f32 = lambda a: a.astype(jnp.float32)
    args = (
        f32(x), f32(res),
        f32(p["wq"]).T, f32(p["bq"]).reshape(1, E),
        f32(p["wk"]).T, f32(p["bk"]).reshape(1, E),
        f32(p["wv"]).T, f32(p["bv"]).reshape(1, E),
        f32(p["fcq_w"]).T, f32(p["fcq_b"]).reshape(1, d_k),
        f32(p["fck_w"]).T, f32(p["fck_b"]).reshape(1, d_k),
        f32(p["fcg_w"]).T, f32(p["fcg_b"]).reshape(1, 2 * d_k),
        bn_scale, bn_shift,
    )

    batch_map = lambda b: (b, 0, 0)
    const_map = lambda b: (0, 0)
    in_specs = [
        pl.BlockSpec((1, N, E), batch_map),                  # x
        pl.BlockSpec((1, N, E), batch_map),                  # residual base
        pl.BlockSpec((E, E), const_map), pl.BlockSpec((1, E), const_map),          # Wq, bq
        pl.BlockSpec((E, E), const_map), pl.BlockSpec((1, E), const_map),          # Wk, bk
        pl.BlockSpec((E, E), const_map), pl.BlockSpec((1, E), const_map),          # Wv, bv
        pl.BlockSpec((d_k, d_k), const_map), pl.BlockSpec((1, d_k), const_map),    # fc_q
        pl.BlockSpec((d_k, d_k), const_map), pl.BlockSpec((1, d_k), const_map),    # fc_k
        pl.BlockSpec((d_k, 2 * d_k), const_map), pl.BlockSpec((1, 2 * d_k), const_map),  # fc_g
        pl.BlockSpec((1, E), const_map), pl.BlockSpec((1, E), const_map),          # BN scale/shift
    ]

    # Advisory cost so XLA does not over-serialize around this small custom call.
    flops = bs * (6 * N * E * E + h * (8 * N * d_k * d_k + 4 * N * N * d_k))
    transcendentals = bs * h * (2 * N * d_k + N * N)
    bytes_accessed = 4 * (3 * bs * N * E + 3 * E * E + 4 * d_k * d_k + 8 * E + 6 * d_k)
    cost = pl.CostEstimate(flops=flops, transcendentals=transcendentals,
                           bytes_accessed=bytes_accessed)

    kernel = _make_agsa_layer_kernel(h, d_k, 1.0 / math.sqrt(d_k))
    return pl.pallas_call(
        kernel,
        out_shape=jax.ShapeDtypeStruct((bs, N, E), jnp.float32),
        grid_spec=pltpu.PrefetchScalarGridSpec(
            num_scalar_prefetch=0,
            grid=(bs,),                       # >=2 parallel steps -> both v7x TCs busy
            in_specs=in_specs,
            out_specs=pl.BlockSpec((1, N, E), batch_map),
        ),
        compiler_params=pltpu.CompilerParams(dimension_semantics=("parallel",)),
        cost_estimate=cost,
    )(*args)


def agsa_forward(rgn_emb, layer_params, h, pos_emb=None):
    """AGSA inference forward. rgn_emb: (bs, N, E); layer_params: list of per-layer dicts."""
    agsa = rgn_emb.astype(jnp.float32)
    x0 = agsa if pos_emb is None else agsa * pos_emb.astype(jnp.float32)
    for li, p in enumerate(layer_params):
        inp = x0 if li == 0 else agsa
        agsa = _agsa_layer(inp, agsa, p, h)
    return agsa


# ----------------------------------------------------------------------------
# Pure-JAX reference mirroring the PyTorch forward (eval mode).
# ----------------------------------------------------------------------------
def _reference_layer_att(inp, p, h):
    bs, N, E = inp.shape
    d_k = E // h
    lin = lambda x, w, b: jnp.matmul(x, w.T, precision=_HI) + b
    q = lin(inp, p["wq"], p["bq"]).reshape(bs, N, h, d_k).transpose(0, 2, 1, 3)
    k = lin(inp, p["wk"], p["bk"]).reshape(bs, N, h, d_k).transpose(0, 2, 1, 3)
    v = lin(inp, p["wv"], p["bv"]).reshape(bs, N, h, d_k).transpose(0, 2, 1, 3)
    G = lin(q, p["fcq_w"], p["fcq_b"]) * lin(k, p["fck_w"], p["fck_b"])
    M = jax.nn.sigmoid(lin(G, p["fcg_w"], p["fcg_b"]))
    q = q * M[..., :d_k]
    k = k * M[..., d_k:]
    scores = jnp.einsum("bhnd,bhmd->bhnm", q, k, precision=_HI) / math.sqrt(d_k)
    p_attn = jax.nn.softmax(scores, axis=-1)
    x = jnp.einsum("bhnm,bhmd->bhnd", p_attn, v, precision=_HI)
    return x.transpose(0, 2, 1, 3).reshape(bs, N, E)


def reference_agsa(rgn_emb, layer_params, h, pos_emb=None):
    rgn_emb = rgn_emb.astype(jnp.float32)
    x0 = rgn_emb if pos_emb is None else rgn_emb * pos_emb.astype(jnp.float32)
    agsa = rgn_emb
    for li, p in enumerate(layer_params):
        inp = x0 if li == 0 else agsa
        att = _reference_layer_att(inp, p, h)
        bn = (p["bn_gamma"] * (att - p["bn_mean"])
              / jnp.sqrt(p["bn_var"] + _BN_EPS) + p["bn_beta"])
        agsa = agsa + bn            # eval-mode Dropout == identity
    return agsa


# ----------------------------------------------------------------------------
if __name__ == "__main__":
    root = jax.random.PRNGKey(0)

    def make_layer_params(key, num_layers, E, h):
        d_k = E // h

        def unif(k, shape, fan_in):
            b = 1.0 / math.sqrt(fan_in)
            return jax.random.uniform(k, shape, jnp.float32, -b, b)

        params = []
        for li in range(num_layers):
            ks = jax.random.split(jax.random.fold_in(key, li), 16)
            params.append(dict(
                wq=unif(ks[0], (E, E), E), bq=unif(ks[1], (E,), E),
                wk=unif(ks[2], (E, E), E), bk=unif(ks[3], (E,), E),
                wv=unif(ks[4], (E, E), E), bv=unif(ks[5], (E,), E),
                fcq_w=unif(ks[6], (d_k, d_k), d_k), fcq_b=unif(ks[7], (d_k,), d_k),
                fck_w=unif(ks[8], (d_k, d_k), d_k), fck_b=unif(ks[9], (d_k,), d_k),
                fcg_w=unif(ks[10], (2 * d_k, d_k), d_k), fcg_b=unif(ks[11], (2 * d_k,), d_k),
                # "pretrained-like" BatchNorm params / running stats (eval-mode forward).
                bn_gamma=1.0 + 0.1 * jax.random.normal(ks[12], (E,), jnp.float32),
                bn_beta=0.1 * jax.random.normal(ks[13], (E,), jnp.float32),
                bn_mean=0.1 * jax.random.normal(ks[14], (E,), jnp.float32),
                bn_var=jax.random.uniform(ks[15], (E,), jnp.float32, 0.5, 1.5),
            ))
        return params

    # Config A: module defaults (h=1), 2 layers, lane-dense E=128, no pos_emb.
    bs, N, E, h, L = 2, 16, 128, 1, 2
    kA, kB = jax.random.split(jax.random.fold_in(root, 1))
    rgn_emb = jax.random.normal(kA, (bs, N, E), jnp.float32)
    paramsA = make_layer_params(kB, L, E, h)
    outA = jax.block_until_ready(agsa_forward(rgn_emb, paramsA, h))
    refA = reference_agsa(rgn_emb, paramsA, h)
    assert outA.shape == (bs, N, E)
    assert jnp.allclose(outA, refA, atol=1e-4, rtol=1e-4), "config A mismatch vs reference"

    # Config B: multi-head (h=4), single layer, with positional embedding multiply.
    bs, N, E, h, L = 2, 8, 64, 4, 1
    kC, kD, kE = jax.random.split(jax.random.fold_in(root, 2), 3)
    rgn_emb = jax.random.normal(kC, (bs, N, E), jnp.float32)
    pos_emb = 1.0 + 0.1 * jax.random.normal(kD, (bs, N, E), jnp.float32)
    paramsB = make_layer_params(kE, L, E, h)
    outB = jax.block_until_ready(agsa_forward(rgn_emb, paramsB, h, pos_emb=pos_emb))
    refB = reference_agsa(rgn_emb, paramsB, h, pos_emb=pos_emb)
    assert outB.shape == (bs, N, E)
    assert jnp.allclose(outB, refB, atol=1e-4, rtol=1e-4), "config B mismatch vs reference"

    print("KERNEL_OK")
</pallas_src>

<mosaic_0001>
module attributes {stable_mosaic.version = 11 : i64} {
  func.func @kernel(%arg0: i32, %arg1: memref<1x16x128xf32, #tpu.memory_space<vmem>>, %arg2: memref<1x16x128xf32, #tpu.memory_space<vmem>>, %arg3: memref<128x128xf32, #tpu.memory_space<vmem>>, %arg4: memref<1x128xf32, #tpu.memory_space<vmem>>, %arg5: memref<128x128xf32, #tpu.memory_space<vmem>>, %arg6: memref<1x128xf32, #tpu.memory_space<vmem>>, %arg7: memref<128x128xf32, #tpu.memory_space<vmem>>, %arg8: memref<1x128xf32, #tpu.memory_space<vmem>>, %arg9: memref<128x128xf32, #tpu.memory_space<vmem>>, %arg10: memref<1x128xf32, #tpu.memory_space<vmem>>, %arg11: memref<128x128xf32, #tpu.memory_space<vmem>>, %arg12: memref<1x128xf32, #tpu.memory_space<vmem>>, %arg13: memref<128x256xf32, #tpu.memory_space<vmem>>, %arg14: memref<1x256xf32, #tpu.memory_space<vmem>>, %arg15: memref<1x128xf32, #tpu.memory_space<vmem>>, %arg16: memref<1x128xf32, #tpu.memory_space<vmem>>, %arg17: memref<1x16x128xf32, #tpu.memory_space<vmem>>) attributes {dimension_semantics = [#tpu.dimension_semantics<parallel>], iteration_bounds = array<i64: 2>, scalar_prefetch = 0 : i64, scratch_operands = 0 : i64, tpu.core_type = #tpu.core_type<tc>, window_params = [{transform_indices = @transform_0, window_bounds = array<i64: 1, 16, 128>}, {transform_indices = @transform_1, window_bounds = array<i64: 1, 16, 128>}, {pipeline_mode = #tpu.pipeline_mode<synchronous>, transform_indices = @transform_2, window_bounds = array<i64: 128, 128>}, {pipeline_mode = #tpu.pipeline_mode<synchronous>, transform_indices = @transform_3, window_bounds = array<i64: 1, 128>}, {pipeline_mode = #tpu.pipeline_mode<synchronous>, transform_indices = @transform_4, window_bounds = array<i64: 128, 128>}, {pipeline_mode = #tpu.pipeline_mode<synchronous>, transform_indices = @transform_5, window_bounds = array<i64: 1, 128>}, {pipeline_mode = #tpu.pipeline_mode<synchronous>, transform_indices = @transform_6, window_bounds = array<i64: 128, 128>}, {pipeline_mode = #tpu.pipeline_mode<synchronous>, transform_indices = @transform_7, window_bounds = array<i64: 1, 128>}, {pipeline_mode = #tpu.pipeline_mode<synchronous>, transform_indices = @transform_8, window_bounds = array<i64: 128, 128>}, {pipeline_mode = #tpu.pipeline_mode<synchronous>, transform_indices = @transform_9, window_bounds = array<i64: 1, 128>}, {pipeline_mode = #tpu.pipeline_mode<synchronous>, transform_indices = @transform_10, window_bounds = array<i64: 128, 128>}, {pipeline_mode = #tpu.pipeline_mode<synchronous>, transform_indices = @transform_11, window_bounds = array<i64: 1, 128>}, {pipeline_mode = #tpu.pipeline_mode<synchronous>, transform_indices = @transform_12, window_bounds = array<i64: 128, 256>}, {pipeline_mode = #tpu.pipeline_mode<synchronous>, transform_indices = @transform_13, window_bounds = array<i64: 1, 256>}, {pipeline_mode = #tpu.pipeline_mode<synchronous>, transform_indices = @transform_14, window_bounds = array<i64: 1, 128>}, {pipeline_mode = #tpu.pipeline_mode<synchronous>, transform_indices = @transform_15, window_bounds = array<i64: 1, 128>}, {transform_indices = @transform_16, window_bounds = array<i64: 1, 16, 128>}]} {
    %c0 = arith.constant 0 : index
    %c0_0 = arith.constant 0 : index
    %c0_1 = arith.constant 0 : index
    %0 = vector.load %arg1[%c0, %c0_0, %c0_1] : memref<1x16x128xf32, #tpu.memory_space<vmem>>, vector<1x16x128xf32>
    %1 = vector.shape_cast %0 : vector<1x16x128xf32> to vector<16x128xf32>
    %c0_2 = arith.constant 0 : index
    %c0_3 = arith.constant 0 : index
    %2 = vector.load %arg3[%c0_2, %c0_3] : memref<128x128xf32, #tpu.memory_space<vmem>>, vector<128x128xf32>
    %cst = arith.constant dense<0.000000e+00> : vector<16x128xf32>
    %3 = tpu.matmul %1, %2, %cst {dimension_numbers = #tpu.dot_dimension_numbers<[1], [0], [0], [1], [0, 0, 1, 1], [], []>, precision = #tpu.contract_precision<fp32>} : vector<16x128xf32>, vector<128x128xf32>, vector<16x128xf32> -> vector<16x128xf32>
    %c0_4 = arith.constant 0 : index
    %c0_5 = arith.constant 0 : index
    %4 = vector.load %arg4[%c0_4, %c0_5] : memref<1x128xf32, #tpu.memory_space<vmem>>, vector<1x128xf32>
    %5 = vector.broadcast %4 : vector<1x128xf32> to vector<16x128xf32>
    %6 = arith.addf %3, %5 : vector<16x128xf32>
    %c0_6 = arith.constant 0 : index
    %c0_7 = arith.constant 0 : index
    %7 = vector.load %arg5[%c0_6, %c0_7] : memref<128x128xf32, #tpu.memory_space<vmem>>, vector<128x128xf32>
    %cst_8 = arith.constant dense<0.000000e+00> : vector<16x128xf32>
    %8 = tpu.matmul %1, %7, %cst_8 {dimension_numbers = #tpu.dot_dimension_numbers<[1], [0], [0], [1], [0, 0, 1, 1], [], []>, precision = #tpu.contract_precision<fp32>} : vector<16x128xf32>, vector<128x128xf32>, vector<16x128xf32> -> vector<16x128xf32>
    %c0_9 = arith.constant 0 : index
    %c0_10 = arith.constant 0 : index
    %9 = vector.load %arg6[%c0_9, %c0_10] : memref<1x128xf32, #tpu.memory_space<vmem>>, vector<1x128xf32>
    %10 = vector.broadcast %9 : vector<1x128xf32> to vector<16x128xf32>
    %11 = arith.addf %8, %10 : vector<16x128xf32>
    %c0_11 = arith.constant 0 : index
    %c0_12 = arith.constant 0 : index
    %12 = vector.load %arg7[%c0_11, %c0_12] : memref<128x128xf32, #tpu.memory_space<vmem>>, vector<128x128xf32>
    %cst_13 = arith.constant dense<0.000000e+00> : vector<16x128xf32>
    %13 = tpu.matmul %1, %12, %cst_13 {dimension_numbers = #tpu.dot_dimension_numbers<[1], [0], [0], [1], [0, 0, 1, 1], [], []>, precision = #tpu.contract_precision<fp32>} : vector<16x128xf32>, vector<128x128xf32>, vector<16x128xf32> -> vector<16x128xf32>
    %c0_14 = arith.constant 0 : index
    %c0_15 = arith.constant 0 : index
    %14 = vector.load %arg8[%c0_14, %c0_15] : memref<1x128xf32, #tpu.memory_space<vmem>>, vector<1x128xf32>
    %15 = vector.broadcast %14 : vector<1x128xf32> to vector<16x128xf32>
    %16 = arith.addf %13, %15 : vector<16x128xf32>
    %c0_16 = arith.constant 0 : index
    %c0_17 = arith.constant 0 : index
    %17 = vector.load %arg9[%c0_16, %c0_17] : memref<128x128xf32, #tpu.memory_space<vmem>>, vector<128x128xf32>
    %cst_18 = arith.constant dense<0.000000e+00> : vector<16x128xf32>
    %18 = tpu.matmul %6, %17, %cst_18 {dimension_numbers = #tpu.dot_dimension_numbers<[1], [0], [0], [1], [0, 0, 1, 1], [], []>, precision = #tpu.contract_precision<fp32>} : vector<16x128xf32>, vector<128x128xf32>, vector<16x128xf32> -> vector<16x128xf32>
    %c0_19 = arith.constant 0 : index
    %c0_20 = arith.constant 0 : index
    %19 = vector.load %arg10[%c0_19, %c0_20] : memref<1x128xf32, #tpu.memory_space<vmem>>, vector<1x128xf32>
    %20 = vector.broadcast %19 : vector<1x128xf32> to vector<16x128xf32>
    %21 = arith.addf %18, %20 : vector<16x128xf32>
    %c0_21 = arith.constant 0 : index
    %c0_22 = arith.constant 0 : index
    %22 = vector.load %arg11[%c0_21, %c0_22] : memref<128x128xf32, #tpu.memory_space<vmem>>, vector<128x128xf32>
    %cst_23 = arith.constant dense<0.000000e+00> : vector<16x128xf32>
    %23 = tpu.matmul %11, %22, %cst_23 {dimension_numbers = #tpu.dot_dimension_numbers<[1], [0], [0], [1], [0, 0, 1, 1], [], []>, precision = #tpu.contract_precision<fp32>} : vector<16x128xf32>, vector<128x128xf32>, vector<16x128xf32> -> vector<16x128xf32>
    %c0_24 = arith.constant 0 : index
    %c0_25 = arith.constant 0 : index
    %24 = vector.load %arg12[%c0_24, %c0_25] : memref<1x128xf32, #tpu.memory_space<vmem>>, vector<1x128xf32>
    %25 = vector.broadcast %24 : vector<1x128xf32> to vector<16x128xf32>
    %26 = arith.addf %23, %25 : vector<16x128xf32>
    %27 = arith.mulf %21, %26 : vector<16x128xf32>
    %c0_26 = arith.constant 0 : index
    %c0_27 = arith.constant 0 : index
    %28 = vector.load %arg13[%c0_26, %c0_27] : memref<128x256xf32, #tpu.memory_space<vmem>>, vector<128x256xf32>
    %cst_28 = arith.constant dense<0.000000e+00> : vector<16x256xf32>
    %29 = tpu.matmul %27, %28, %cst_28 {dimension_numbers = #tpu.dot_dimension_numbers<[1], [0], [0], [1], [0, 0, 1, 1], [], []>, precision = #tpu.contract_precision<fp32>} : vector<16x128xf32>, vector<128x256xf32>, vector<16x256xf32> -> vector<16x256xf32>
    %c0_29 = arith.constant 0 : index
    %c0_30 = arith.constant 0 : index
    %30 = vector.load %arg14[%c0_29, %c0_30] : memref<1x256xf32, #tpu.memory_space<vmem>>, vector<1x256xf32>
    %31 = vector.broadcast %30 : vector<1x256xf32> to vector<16x256xf32>
    %32 = arith.addf %29, %31 : vector<16x256xf32>
    %33 = arith.negf %32 : vector<16x256xf32>
    %34 = math.exp %33 : vector<16x256xf32>
    %cst_31 = arith.constant 1.000000e+00 : f32
    %35 = vector.broadcast %cst_31 : f32 to vector<16x256xf32>
    %36 = arith.addf %35, %34 : vector<16x256xf32>
    %37 = arith.divf %35, %36 : vector<16x256xf32>
    %38 = vector.extract_strided_slice %37 {offsets = [0, 0], sizes = [16, 128], strides = [1, 1]} : vector<16x256xf32> to vector<16x128xf32>
    %39 = arith.mulf %6, %38 : vector<16x128xf32>
    %40 = vector.extract_strided_slice %37 {offsets = [0, 128], sizes = [16, 128], strides = [1, 1]} : vector<16x256xf32> to vector<16x128xf32>
    %41 = arith.mulf %11, %40 : vector<16x128xf32>
    %cst_32 = arith.constant dense<0.000000e+00> : vector<16x16xf32>
    %42 = tpu.matmul %39, %41, %cst_32 {dimension_numbers = #tpu.dot_dimension_numbers<[1], [1], [0], [0], [0, 0, 1, 0], [], []>, precision = #tpu.contract_precision<fp32>} : vector<16x128xf32>, vector<16x128xf32>, vector<16x16xf32> -> vector<16x16xf32>
    %cst_33 = arith.constant 0.0883883461 : f32
    %43 = vector.broadcast %cst_33 : f32 to vector<16x16xf32>
    %44 = arith.mulf %42, %43 : vector<16x16xf32>
    %cst_34 = arith.constant dense<0xFF800000> : vector<16xf32>
    %45 = vector.multi_reduction <maximumf>, %44, %cst_34 [1] : vector<16x16xf32> to vector<16xf32>
    %46 = vector.shape_cast %45 : vector<16xf32> to vector<16x1xf32>
    %47 = vector.broadcast %46 : vector<16x1xf32> to vector<16x16xf32>
    %48 = arith.subf %44, %47 : vector<16x16xf32>
    %49 = math.exp %48 : vector<16x16xf32>
    %cst_35 = arith.constant dense<0.000000e+00> : vector<16xf32>
    %50 = vector.multi_reduction <add>, %49, %cst_35 [1] : vector<16x16xf32> to vector<16xf32>
    %51 = vector.shape_cast %50 : vector<16xf32> to vector<16x1xf32>
    %52 = vector.broadcast %51 : vector<16x1xf32> to vector<16x16xf32>
    %53 = arith.divf %49, %52 : vector<16x16xf32>
    %cst_36 = arith.constant dense<0.000000e+00> : vector<16x128xf32>
    %54 = tpu.matmul %53, %16, %cst_36 {dimension_numbers = #tpu.dot_dimension_numbers<[1], [0], [0], [1], [0, 0, 1, 1], [], []>, precision = #tpu.contract_precision<fp32>} : vector<16x16xf32>, vector<16x128xf32>, vector<16x128xf32> -> vector<16x128xf32>
    %c0_37 = arith.constant 0 : index
    %c0_38 = arith.constant 0 : index
    %c0_39 = arith.constant 0 : index
    %55 = vector.load %arg2[%c0_37, %c0_38, %c0_39] : memref<1x16x128xf32, #tpu.memory_space<vmem>>, vector<1x16x128xf32>
    %56 = vector.shape_cast %55 : vector<1x16x128xf32> to vector<16x128xf32>
    %c0_40 = arith.constant 0 : index
    %c0_41 = arith.constant 0 : index
    %57 = vector.load %arg15[%c0_40, %c0_41] : memref<1x128xf32, #tpu.memory_space<vmem>>, vector<1x128xf32>
    %58 = vector.broadcast %57 : vector<1x128xf32> to vector<16x128xf32>
    %59 = arith.mulf %54, %58 : vector<16x128xf32>
    %60 = arith.addf %56, %59 : vector<16x128xf32>
    %c0_42 = arith.constant 0 : index
    %c0_43 = arith.constant 0 : index
    %61 = vector.load %arg16[%c0_42, %c0_43] : memref<1x128xf32, #tpu.memory_space<vmem>>, vector<1x128xf32>
    %62 = vector.broadcast %61 : vector<1x128xf32> to vector<16x128xf32>
    %63 = arith.addf %60, %62 : vector<16x128xf32>
    %c0_44 = arith.constant 0 : index
    %c0_45 = arith.constant 0 : index
    %c0_46 = arith.constant 0 : index
    %64 = vector.load %arg17[%c0_44, %c0_45, %c0_46] : memref<1x16x128xf32, #tpu.memory_space<vmem>>, vector<1x16x128xf32>
    %65 = vector.shape_cast %64 : vector<1x16x128xf32> to vector<16x128xf32>
    %66 = vector.shape_cast %63 : vector<16x128xf32> to vector<1x16x128xf32>
    tpu.vector_store %arg17[%c0_44, %c0_45, %c0_46], %66 {strides = array<i32>} : memref<1x16x128xf32, #tpu.memory_space<vmem>>, vector<1x16x128xf32>,
    return
  }
  func.func @transform_0(%arg0: i32) -> (i32, i32, i32) {
    %c0_i32 = arith.constant 0 : i32
    %c0_i32_0 = arith.constant 0 : i32
    %c0_i32_1 = arith.constant 0 : i32
    return %arg0, %c0_i32, %c0_i32_0 : i32, i32, i32
  }
  func.func @transform_1(%arg0: i32) -> (i32, i32, i32) {
    %c0_i32 = arith.constant 0 : i32
    %c0_i32_0 = arith.constant 0 : i32
    %c0_i32_1 = arith.constant 0 : i32
    return %arg0, %c0_i32, %c0_i32_0 : i32, i32, i32
  }
  func.func @transform_2(%arg0: i32) -> (i32, i32) {
    %c0_i32 = arith.constant 0 : i32
    %c0_i32_0 = arith.constant 0 : i32
    %c0_i32_1 = arith.constant 0 : i32
    return %c0_i32, %c0_i32_0 : i32, i32
  }
  func.func @transform_3(%arg0: i32) -> (i32, i32) {
    %c0_i32 = arith.constant 0 : i32
    %c0_i32_0 = arith.constant 0 : i32
    %c0_i32_1 = arith.constant 0 : i32
    return %c0_i32, %c0_i32_0 : i32, i32
  }
  func.func @transform_4(%arg0: i32) -> (i32, i32) {
    %c0_i32 = arith.constant 0 : i32
    %c0_i32_0 = arith.constant 0 : i32
    %c0_i32_1 = arith.constant 0 : i32
    return %c0_i32, %c0_i32_0 : i32, i32
  }
  func.func @transform_5(%arg0: i32) -> (i32, i32) {
    %c0_i32 = arith.constant 0 : i32
    %c0_i32_0 = arith.constant 0 : i32
    %c0_i32_1 = arith.constant 0 : i32
    return %c0_i32, %c0_i32_0 : i32, i32
  }
  func.func @transform_6(%arg0: i32) -> (i32, i32) {
    %c0_i32 = arith.constant 0 : i32
    %c0_i32_0 = arith.constant 0 : i32
    %c0_i32_1 = arith.constant 0 : i32
    return %c0_i32, %c0_i32_0 : i32, i32
  }
  func.func @transform_7(%arg0: i32) -> (i32, i32) {
    %c0_i32 = arith.constant 0 : i32
    %c0_i32_0 = arith.constant 0 : i32
    %c0_i32_1 = arith.constant 0 : i32
    return %c0_i32, %c0_i32_0 : i32, i32
  }
  func.func @transform_8(%arg0: i32) -> (i32, i32) {
    %c0_i32 = arith.constant 0 : i32
    %c0_i32_0 = arith.constant 0 : i32
    %c0_i32_1 = arith.constant 0 : i32
    return %c0_i32, %c0_i32_0 : i32, i32
  }
  func.func @transform_9(%arg0: i32) -> (i32, i32) {
    %c0_i32 = arith.constant 0 : i32
    %c0_i32_0 = arith.constant 0 : i32
    %c0_i32_1 = arith.constant 0 : i32
    return %c0_i32, %c0_i32_0 : i32, i32
  }
  func.func @transform_10(%arg0: i32) -> (i32, i32) {
    %c0_i32 = arith.constant 0 : i32
    %c0_i32_0 = arith.constant 0 : i32
    %c0_i32_1 = arith.constant 0 : i32
    return %c0_i32, %c0_i32_0 : i32, i32
  }
  func.func @transform_11(%arg0: i32) -> (i32, i32) {
    %c0_i32 = arith.constant 0 : i32
    %c0_i32_0 = arith.constant 0 : i32
    %c0_i32_1 = arith.constant 0 : i32
    return %c0_i32, %c0_i32_0 : i32, i32
  }
  func.func @transform_12(%arg0: i32) -> (i32, i32) {
    %c0_i32 = arith.constant 0 : i32
    %c0_i32_0 = arith.constant 0 : i32
    %c0_i32_1 = arith.constant 0 : i32
    return %c0_i32, %c0_i32_0 : i32, i32
  }
  func.func @transform_13(%arg0: i32) -> (i32, i32) {
    %c0_i32 = arith.constant 0 : i32
    %c0_i32_0 = arith.constant 0 : i32
    %c0_i32_1 = arith.constant 0 : i32
    return %c0_i32, %c0_i32_0 : i32, i32
  }
  func.func @transform_14(%arg0: i32) -> (i32, i32) {
    %c0_i32 = arith.constant 0 : i32
    %c0_i32_0 = arith.constant 0 : i32
    %c0_i32_1 = arith.constant 0 : i32
    return %c0_i32, %c0_i32_0 : i32, i32
  }
  func.func @transform_15(%arg0: i32) -> (i32, i32) {
    %c0_i32 = arith.constant 0 : i32
    %c0_i32_0 = arith.constant 0 : i32
    %c0_i32_1 = arith.constant 0 : i32
    return %c0_i32, %c0_i32_0 : i32, i32
  }
  func.func @transform_16(%arg0: i32) -> (i32, i32, i32) {
    %c0_i32 = arith.constant 0 : i32
    %c0_i32_0 = arith.constant 0 : i32
    %c0_i32_1 = arith.constant 0 : i32
    return %arg0, %c0_i32, %c0_i32_0 : i32, i32, i32
  }
}

</mosaic_0001>

<bundles_post_ra>
// kernel: tpu_custom_call.1
= control target key start
LH: loop header
LB: loop body
LE: loop exit
PB: predicated region body
PF: predicated region fallthrough
CT: control target
= control target key end

     0   :  { %s11439_s0 = inlined_call_operand.hbm [shape: f32[2,16,128], index: 0, kind: input, shape index: {}]   ;;  %s11440_s1 = inlined_call_operand.hbm [shape: f32[2,16,128], index: 1, kind: input, shape index: {}]   ;;  %s11441_s2 = inlined_call_operand.hbm [shape: f32[128,128], index: 2, kind: input, shape index: {}]   ;;  %s11442_s3 = inlined_call_operand.vmem [shape: f32[1,128], index: 3, kind: input, shape index: {}]   ;;  %s11443_s4 = inlined_call_operand.hbm [shape: f32[128,128], index: 4, kind: input, shape index: {}]   ;;  %s11444_s5 = inlined_call_operand.vmem [shape: f32[1,128], index: 5, kind: input, shape index: {}]   ;;  %s11445_s6 = inlined_call_operand.hbm [shape: f32[128,128], index: 6, kind: input, shape index: {}]   ;;  %s11446_s7 = inlined_call_operand.vmem [shape: f32[1,128], index: 7, kind: input, shape index: {}]   ;;  %s11447_s8 = inlined_call_operand.hbm [shape: f32[128,128], index: 8, kind: input, shape index: {}]   ;;  %s11448_s9 = inlined_call_operand.vmem [shape: f32[1,128], index: 9, kind: input, shape index: {}]   ;;  %s11449_s10 = inlined_call_operand.hbm [shape: f32[128,128], index: 10, kind: input, shape index: {}]   ;;  %s11450_s11 = inlined_call_operand.vmem [shape: f32[1,128], index: 11, kind: input, shape index: {}]   ;;  %s11451_s12 = inlined_call_operand.hbm [shape: f32[128,256], index: 12, kind: input, shape index: {}]   ;;  %s11452_s13 = inlined_call_operand.vmem [shape: f32[1,256], index: 13, kind: input, shape index: {}]   ;;  %s11453_s14 = inlined_call_operand.vmem [shape: f32[1,128], index: 14, kind: input, shape index: {}]   ;;  %s11454_s15 = inlined_call_operand.vmem [shape: f32[1,128], index: 15, kind: input, shape index: {}]   ;;  %s11455_s16 = inlined_call_operand.hbm [shape: f32[2,16,128], index: 16, kind: output, shape index: {}]  }
   0x1   :  { %11606 = sst [smem:[#allocation77_spill]] %s11439_s0 }
   0x2   :  { %11607 = sst [smem:[#allocation78_spill]] %s11441_s2 }
   0x3   :  { %11608 = sst [smem:[#allocation79_spill]] %s11443_s4 }
   0x4   :  { %11609 = sst [smem:[#allocation80_spill]] %s11445_s6 }
   0x5   :  { %11610 = sst [smem:[#allocation81_spill]] %s11447_s8 }
   0x6   :  { %11611 = sst [smem:[#allocation82_spill]] %s11449_s10 }
   0x7   :  { %11612 = sst [smem:[#allocation83_spill]] %s11451_s12 }
   0x8   :  { %11613 = sst [smem:[#allocation84_spill]] %s11454_s15 }
   0x9   :  { %11614 = sst [smem:[#allocation85_spill]] %s11455_s16 }
   0xa   :  { %21 = vsyncpa [#allocation3], 0 }
   0xb   :  { %23 = vsyncpa [#allocation3 + $0x1], 0 }
   0xc   :  { %24 = vsyncpa [#allocation6], 0 }
   0xd   :  { %26 = vsyncpa [#allocation6 + $0x1], 0 }
   0xe   :  { %27 = vsyncpa [#allocation9], 0 }
   0xf   :  { %28 = vsyncpa [#allocation12], 0 }
  0x10   :  { %29 = vsyncpa [#allocation15], 0 }
  0x11   :  { %30 = vsyncpa [#allocation4], 0 }
  0x12   :  { %32 = vsyncpa [#allocation4 + $0x1], 0  ;;  %s8716_s21 = smov 0   ;;  %s8718_s22 = smov 0  }
  0x13   :  { %s8720_s23 = smov 0   ;;  %s8722_s24 = smov 0  }
  0x14 LB: > { %11615 = sst [smem:[#allocation24_spill]] %s8609_s23  ;;  %s8615_s25 = smov [#allocation7]   ;;  %s8613_s24 = sphi %s8722_s24, %s11796_s24   ;;  %s8609_s23 = sphi %s8720_s23, %s11798_s23   ;;  %s8605_s22 = sphi %s8718_s22, %s11800_s22   ;;  %s8601_s21 = sphi %s8716_s21, %s11799_s21  }
  0x15   : > { %s427_s26 = sshll.u32 %s8615_s25, 4  ;;  %s8737_s27 = sadd.s32 4294967295, %s8613_s24   ;;  %s428_s26 = int_to_ptr.vmem [resolvable:$true] %s427_s26 }
  0x16   : > { %p6409_p0 = scmp.ge.s32.totalorder %s8613_s24, 1  ;;  %p11466_p1 = scmp.eq.s32.totalorder %s8737_s27, 0 }
  0x17   : > { %p415_p2 = scmp.lt.s32.totalorder %s8613_s24, 3  ;;  %s8616_s29 = smov [#allocation8]  }
  0x18   : > { %s443_s30 = sshll.u32 %s8616_s29, 4  ;;  %s8617_s17 = smov [#allocation11]   ;;  %s8755_s30 = int_to_ptr.vmem [resolvable:$true] %s443_s30 }
  0x19   : > { %p8742_p3 = pnand %p6409_p0, %p415_p2  ;;  %s475_s18 = sshll.u32 %s8617_s17, 4  ;;  %s8757_s18 = int_to_ptr.vmem [resolvable:$true] %s475_s18 }
  0x1a   : > { %s8328_s20 = scalar_lea.vmem %s428_s26, 2048  ;;  %p8336_p11 = scmp.lt.s32.totalorder %s428_s26, %s428_s26 }
  0x1b   : > { %p8204_p5 = pneg %p8742_p3  ;;  %p8329_p8 = scmp.ne.s32.totalorder %s428_s26, %s8328_s20 }
  0x1c   : > { %p8337_p12 = scmp.lt.s32.totalorder %s8328_s20, %s8328_s20 }
  0x1d   : > { %p8751_p6 = pnand %p8204_p5, %p11466_p1 }
  0x1e   : > { %p8338_p13 = por %p8337_p12, %p8336_p11 }
  0x1f   : > { %p8761_p7 = pneg %p8751_p6 }
  0x21   : > { %p8331_p9 = pnand %p8329_p8, %p8761_p7 }
  0x23   : > { %p8332_p10 = pneg %p8331_p9 }
  0x25   : > { %p8339_p0 = pnand %p8338_p13, %p8332_p10 }
  0x27   : > { %8342 = shalt.err (!%p8339_p0)
}
  0x28   : > { %s11458_s25 = smov 128   ;;  %s11460_s29 = smov 8  }
  0x29   : > { %s11619_s2 = sld [smem:[#allocation78_spill]]  ;;  %s8354_s15 = scalar_lea.vmem %s8755_s30, 2048 }
  0x2a   : > { %p8355_p2 = scmp.ne.s32.totalorder %s8755_s30, %s8354_s15  ;;  %p8362_p9 = scmp.lt.s32.totalorder %s8755_s30, %s8755_s30 }
  0x2b   : > { %p8363_p10 = scmp.lt.s32.totalorder %s8354_s15, %s8354_s15 }
  0x2c   : > { %p8357_p5 = pnand %p8355_p2, %p8761_p7 }
  0x2d   : > { %p8364_p11 = por %p8363_p10, %p8362_p9 }
  0x2e   : > { %p8358_p8 = pneg %p8357_p5 }
  0x2f   : > { %8207 = dma.hbm_to_vmem [thread:$0]  (!%p8751_p6), %s11619_s2, 2048, %s428_s26, [#allocation6], %s11458_s25, %s11458_s25, %s11460_s29  }
  0x30   : > { %p8365_p12 = pnand %p8364_p11, %p8358_p8 }
  0x32   : > { %8368 = shalt.err (!%p8365_p12)
}
  0x33   : > { %s11620_s4 = sld [smem:[#allocation79_spill]]  ;;  %s8380_s26 = scalar_lea.vmem %s8757_s18, 2048 }
  0x34   : > { %p8381_p13 = scmp.ne.s32.totalorder %s8757_s18, %s8380_s26  ;;  %p8388_p5 = scmp.lt.s32.totalorder %s8757_s18, %s8757_s18 }
  0x35   : > { %p8389_p8 = scmp.lt.s32.totalorder %s8380_s26, %s8380_s26 }
  0x36   : > { %p8383_p0 = pnand %p8381_p13, %p8761_p7 }
  0x37   : > { %p8390_p9 = por %p8389_p8, %p8388_p5 }
  0x38   : > { %p8384_p2 = pneg %p8383_p0 }
  0x39   : > { %8210 = dma.hbm_to_vmem [thread:$0]  (!%p8751_p6), %s11620_s4, 2048, %s8755_s30, [#allocation9], %s11458_s25, %s11458_s25, %s11460_s29  }
  0x3a   : > { %p8391_p10 = pnand %p8390_p9, %p8384_p2 }
  0x3c   : > { %8394 = shalt.err (!%p8391_p10)
}
  0x3d   : > { %s11621_s8 = sld [smem:[#allocation81_spill]]  ;;  %s8620_s30 = smov [#allocation10]  }
  0x3e   : > { %s459_s20 = sshll.u32 %s8620_s30, 4  ;;  %s8621_s16 = smov [#allocation13]   ;;  %s460_s20 = int_to_ptr.vmem [resolvable:$true] %s459_s20 }
  0x3f   : > { %s491_s2 = sshll.u32 %s8621_s16, 4  ;;  %s8406_s26 = scalar_lea.vmem %s460_s20, 2048  ;;  %s492_s2 = int_to_ptr.vmem [resolvable:$true] %s491_s2 }
  0x40   : > { %p8407_p11 = scmp.ne.s32.totalorder %s460_s20, %s8406_s26  ;;  %p8414_p0 = scmp.lt.s32.totalorder %s460_s20, %s460_s20 }
  0x41   : > { %p8415_p2 = scmp.lt.s32.totalorder %s8406_s26, %s8406_s26 }
  0x42   : > { %p8409_p12 = pnand %p8407_p11, %p8761_p7 }
  0x43   : > { %8216 = dma.hbm_to_vmem [thread:$0]  (!%p8751_p6), %s11621_s8, 2048, %s8757_s18, [#allocation12], %s11458_s25, %s11458_s25, %s11460_s29  }
  0x44   : > { %p8410_p13 = pneg %p8409_p12  ;;  %p8416_p5 = por %p8415_p2, %p8414_p0 }
  0x46   : > { %p8417_p8 = pnand %p8416_p5, %p8410_p13 }
  0x48   : > { %8420 = shalt.err (!%p8417_p8)
}
  0x49   : > { %s11622_s6 = sld [smem:[#allocation80_spill]]  ;;  %s8432_s17 = scalar_lea.vmem %s492_s2, 2048 }
  0x4a   : > { %p8433_p9 = scmp.ne.s32.totalorder %s492_s2, %s8432_s17  ;;  %p8440_p12 = scmp.lt.s32.totalorder %s492_s2, %s492_s2 }
  0x4b   : > { %p8441_p0 = scmp.lt.s32.totalorder %s8432_s17, %s8432_s17 }
  0x4c   : > { %p8435_p10 = pnand %p8433_p9, %p8761_p7 }
  0x4d   : > { %p8442_p13 = por %p8441_p0, %p8440_p12 }
  0x4e   : > { %p8436_p11 = pneg %p8435_p10 }
  0x4f   : > { %8213 = dma.hbm_to_vmem [thread:$0]  (!%p8751_p6), %s11622_s6, 2048, %s460_s20, [#allocation9], %s11458_s25, %s11458_s25, %s11460_s29  }
  0x50   : > { %p8443_p2 = pnand %p8442_p13, %p8436_p11 }
  0x52   : > { %8446 = shalt.err (!%p8443_p2)
}
  0x53   : > { %s11623_s10 = sld [smem:[#allocation82_spill]]  ;;  %s8622_s20 = smov [#allocation14]  }
  0x54   : > { %s507_s26 = sshll.u32 %s8622_s20, 4  ;;  %s508_s26 = int_to_ptr.vmem [resolvable:$true] %s507_s26 }
  0x55   : > { %s8458_s18 = scalar_lea.vmem %s508_s26, 4096  ;;  %p8466_p10 = scmp.lt.s32.totalorder %s508_s26, %s508_s26 }
  0x56   : > { %p8459_p5 = scmp.ne.s32.totalorder %s508_s26, %s8458_s18  ;;  %p8467_p11 = scmp.lt.s32.totalorder %s8458_s18, %s8458_s18 }
  0x58   : > { %p8461_p8 = pnand %p8459_p5, %p8761_p7  ;;  %p8468_p12 = por %p8467_p11, %p8466_p10 }
  0x59   : > { %8219 = dma.hbm_to_vmem [thread:$0]  (!%p8751_p6), %s11623_s10, 2048, %s492_s2, [#allocation12], %s11458_s25, %s11458_s25, %s11460_s29  }
  0x5a   : > { %p8462_p9 = pneg %p8461_p8 }
  0x5c   : > { %p8469_p0 = pnand %p8468_p12, %p8462_p9 }
  0x5e   : > { %8472 = shalt.err (!%p8469_p0)
}
  0x5f   : > { %s8623_s15 = smov 256   ;;  %s8624_s2 = smov 16  }
  0x60   : > { %s11624_s12 = sld [smem:[#allocation83_spill]]  ;;  %s6408_s30 = sadd.s32 4294967294, %s8613_s24  }
  0x61   : > { %s8834_s16 = sadd.s32 1, %s8613_s24   ;;  %s45_s18 = sadd.s32 1, %s8609_s23 }
  0x62   : > { %11625 = sst [smem:[#allocation25_spill]] %s8834_s16  ;;  %s42_s20 = ssub.s32 %s8613_s24, %s8834_s16 }
  0x63   : > { %p43_p7 = scmp.eq.s32.totalorder %s42_s20, 0  ;;  %p52_p13 = scmp.ne.s32.totalorder %s8609_s23, %s8605_s22 }
  0x64   : > { %p53_p2 = scmp.eq.s32.totalorder %s8613_s24, 0  ;;  %p58_p5 = scmp.ne.s32.totalorder %s8605_s22, %s8601_s21 }
  0x65   : > { %s8845_s25 = scalar_select %p43_p7, %s8609_s23, %s45_s18  }
  0x66   : > { %8222 = dma.hbm_to_vmem [thread:$0]  (!%p8751_p6), %s11624_s12, 4096, %s508_s26, [#allocation15], %s8623_s15, %s8623_s15, %s8624_s2  }
  0x67   : > { %11626 = sst [smem:[#allocation26_spill]] %s8845_s25  ;;  %p8847_p8 = por %p53_p2, %p52_p13 }
  0x68   : > { %p8853_p6 = por %p11466_p1, %p58_p5  ;;  %p402_p9 = scmp.eq.s32.totalorder %s8737_s27, 1 }
  0x69   : > { %p408_p10 = scmp.eq.s32.totalorder %s6408_s30, 1  ;;  %p8240_p11 = scmp.lt.s32.totalorder %s8613_s24, 2 }
  0x6a   : > { %s11628_s26 = scalar_select %p8853_p6, 1, 0 }
  0x6b   : > { %s530_s15 = sand.u32 1, %s8609_s23   ;;  %p8860_p12 = por %p402_p9, %p52_p13 }
  0x6c   : > { %p8864_p0 = por %p408_p10, %p58_p5  ;;  %s6417_s17 = sshll.u32 %s530_s15, 4 }
  0x6d   : > { %s11629_s2 = scalar_select %p8860_p12, 1, 0 }
  0x6e   : > { %s11630_s19 = scalar_select %p8864_p0, 1, 0 }
  0x6f   : > { %s6449_s20 = sshll.u32 %s8613_s24, 8  ;;  %s11632_s4 = sld [smem:[#allocation77_spill]] }
  0x70   : > { %11631 = sst [smem:[#allocation27_spill]] %s11630_s19  ;;  %s534_s30 = scalar_lea.vmem [#allocation2], %s6417_s17 }
  0x71   : > { %s541_s8 = sshll.u32 %s534_s30, 4  ;;  %p8878_p7 = pnand %p8240_p11, %p8847_p8  ;;  %s8874_s8 = int_to_ptr.vmem [resolvable:$true] %s541_s8 }
  0x72   : > { %s8885_s29 = scalar_lea.hbm %s11440_s1, %s6449_s20  ;;  %s555_s18 = scalar_lea.vmem [#allocation5], %s6417_s17 }
  0x73   : > { %s8887_s23 = sshll.u32 %s555_s18, 4  ;;  %s8889_s16 = scalar_lea.sflag [#allocation3], %s530_s15  ;;  %s8920_s23 = int_to_ptr.vmem [resolvable:$true] %s8887_s23 }
  0x74   : > { %p8475_p2 = pneg %p8878_p7 }
  0x75   : > { %s8872_s6 = scalar_lea.hbm %s11632_s4, %s6449_s20  ;;  %s8478_s12 = scalar_lea.hbm %s11632_s4, 512 }
  0x76   : > { %s8473_s30 = scalar_lea.hbm %s8872_s6, 256  ;;  %p8479_p9 = scmp.lt.s32.totalorder %s8872_s6, %s11632_s4 }
  0x77   : > { %p8474_p13 = scmp.ne.s32.totalorder %s8872_s6, %s8473_s30  ;;  %p8480_p10 = scmp.lt.s32.totalorder %s8478_s12, %s8473_s30 }
  0x79   : > { %p8476_p5 = pnand %p8475_p2, %p8474_p13  ;;  %p8481_p11 = por %p8480_p10, %p8479_p9 }
  0x7b   : > { %p8477_p8 = pneg %p8476_p5 }
  0x7d   : > { %p8482_p4 = pnand %p8481_p11, %p8477_p8 }
  0x7f   : > { %8485 = shalt.err (!%p8482_p4)
}
  0x80   : > { %s8486_s15 = scalar_lea.vmem %s8874_s8, 256  ;;  %s8625_s19 = smov [#allocation2]  }
  0x81   : > { %p8487_p1 = scmp.ne.s32.totalorder %s8874_s8, %s8486_s15  ;;  %s8491_s17 = sshll.u32 %s8625_s19, 4  ;;  %s8492_s17 = int_to_ptr.vmem [resolvable:$false] %s8491_s17 }
  0x82   : > { %s8493_s18 = scalar_lea.vmem %s8492_s17, 512  ;;  %p8494_p0 = scmp.lt.s32.totalorder %s8874_s8, %s8492_s17 }
  0x83   : > { %p8489_p13 = pnand %p8487_p1, %p8475_p2  ;;  %p8495_p12 = scmp.lt.s32.totalorder %s8493_s18, %s8486_s15 }
  0x85   : > { %p8490_p5 = pneg %p8489_p13  ;;  %p8496_p6 = por %p8495_p12, %p8494_p0 }
  0x87   : > { %p8497_p9 = pnand %p8496_p6, %p8490_p5 }
  0x89   : > { %8500 = shalt.err (!%p8497_p9)
}
  0x8a   : > { %s11634_s30 = smov 8   ;;  %s11635_s0 = smov 128  }
  0x8b   : > { %8226 = dma.hbm_to_vmem [thread:$0]  (!%p8878_p7), %s8872_s6, 256, %s8874_s8, %s8889_s16, %s11635_s0, %s11635_s0, %s11634_s30  }
  0x8c   : > { %s551_s12 = sand.u32 1, %s8613_s24   ;;  %s8501_s20 = scalar_lea.hbm %s8885_s29, 256 }
  0x8d   : > { %s552_s25 = scalar_lea.sflag [#allocation6], %s551_s12  ;;  %p8502_p1 = scmp.ne.s32.totalorder %s8885_s29, %s8501_s20 }
  0x8e   : > { %s8506_s17 = scalar_lea.hbm %s11440_s1, 512  ;;  %p8507_p12 = scmp.lt.s32.totalorder %s8885_s29, %s11440_s1 }
  0x8f   : > { %p8504_p4 = pnand %p8502_p1, %p8475_p2  ;;  %p8508_p0 = scmp.lt.s32.totalorder %s8506_s17, %s8501_s20 }
  0x91   : > { %p8505_p6 = pneg %p8504_p4  ;;  %p8509_p8 = por %p8508_p0, %p8507_p12 }
  0x93   : > { %p8510_p10 = pnand %p8509_p8, %p8505_p6 }
  0x95   : > { %8513 = shalt.err (!%p8510_p10)
}
  0x96   : > { %s8514_s6 = scalar_lea.vmem %s8920_s23, 256  ;;  %s8626_s8 = smov [#allocation5]  }
  0x97   : > { %p8515_p11 = scmp.ne.s32.totalorder %s8920_s23, %s8514_s6  ;;  %s8519_s16 = sshll.u32 %s8626_s8, 4  ;;  %s8520_s16 = int_to_ptr.vmem [resolvable:$false] %s8519_s16 }
  0x98   : > { %s8521_s12 = scalar_lea.vmem %s8520_s16, 512  ;;  %p8522_p9 = scmp.lt.s32.totalorder %s8920_s23, %s8520_s16 }
  0x99   : > { %p8517_p13 = pnand %p8515_p11, %p8475_p2  ;;  %p8523_p1 = scmp.lt.s32.totalorder %s8521_s12, %s8514_s6 }
  0x9b   : > { %p8518_p5 = pneg %p8517_p13  ;;  %p8524_p4 = por %p8523_p1, %p8522_p9 }
  0x9d   : > { %p8525_p12 = pnand %p8524_p4, %p8518_p5 }
  0x9f   : > { %8528 = shalt.err (!%p8525_p12)
}
  0xa0   : > { %8229 = dma.hbm_to_vmem [thread:$0]  (!%p8878_p7), %s8885_s29, 256, %s8920_s23, %s552_s25, %s11635_s0, %s11635_s0, %s11634_s30  }
  0xa1   : > { %574 = sbr.rel (%p8742_p3) target bundleno = 2008 (0x7d8), region = 84 }
  0xa6   : > { %s8951_s4 = sand.u32 1, %s8605_s22   ;;  %p11636_p2 = scmp.ne.s32.totalorder %s11628_s26, 0 }
  0xa7   : > { %s8954_s20 = sshll.u32 %s8951_s4, 4  ;;  %s577_s15 = scalar_lea.sflag [#allocation3], %s8951_s4 }
  0xa8   : > { %s580_s10 = scalar_lea.vmem [#allocation2], %s8954_s20 }
  0xa9   : > { %8572 = dma.done.wait (%p11636_p2), %s577_s15, 256  }
  0xaa   : > { %8574 = vsyncadd (%p11636_p2), %s577_s15, 4294967040  ;;  %s585_s23 = sand.u32 1, %s8737_s27   ;;  %s589_s29 = scalar_lea.vmem [#allocation5], %s8954_s20 }
  0xab   : > { %s586_s28 = scalar_lea.sflag [#allocation6], %s585_s23 }
  0xac   : > { %8576 = dma.done.wait (%p11636_p2), %s586_s28, 256  }
  0xad   : > { %8578 = vsyncadd (%p11636_p2), %s586_s28, 4294967040  ;;  %p11637_p3 = scmp.eq.s32.totalorder %s8737_s27, 0 }
  0xaf   : > { %8580 = dma.done.wait (%p11637_p3), [#allocation6], 2048   ;;  %p11638_p7 = pmov %p11637_p3 }
  0xb0   : > { %p11639_p6 = pmov %p11637_p3 }
  0xb1   : > { %8582 = vsyncadd (%p11638_p7), [#allocation6], 4294965248 }
  0xb2   : > { %8584 = dma.done.wait (%p11639_p6), [#allocation9], 4096   ;;  %p11640_p0 = pmov %p11637_p3 }
  0xb4   : > { %8586 = vsyncadd (%p11640_p0), [#allocation9], 4294963200  ;;  %p11641_p8 = pmov %p11640_p0 }
  0xb5   : > { %p11642_p10 = pmov %p11640_p0 }
  0xb6   : > { %8588 = dma.done.wait (%p11641_p8), [#allocation12], 4096  }
  0xb7   : > { %8590 = vsyncadd (%p11642_p10), [#allocation12], 4294963200  ;;  %p11643_p11 = pmov %p11640_p0 }
  0xb8   : > { %p11644_p13 = pmov %p11640_p0 }
  0xb9   : > { %8592 = dma.done.wait (%p11643_p11), [#allocation15], 4096  }
  0xba   : > { %8594 = vsyncadd (%p11644_p13), [#allocation15], 4294963200  ;;  %v684_v0 = vld [vmem:[#allocation7 + $0x78] sm:$0xff]  ;;  %v683_v1 = vld [vmem:[#allocation7 + $0x70] sm:$0xff]  ;;  %vm5686_vm0 = vcmask 130048   ;;  %s11790_s30 = sld [smem:[#allocation84_spill]] }
  0xbb   : > { %v682_v2 = vld [vmem:[#allocation7 + $0x68] sm:$0xff]  ;;  %v8984_v3 = vand.u32 4294901760, %v684_v0  ;;  %v8986_v4 = vand.u32 4294901760, %v683_v1  ;;  %v681_v6 = vld [vmem:[#allocation7 + $0x60] sm:$0xff]  ;;  %v680_v7 = vld [vmem:[#allocation7 + $0x58] sm:$0xff]  ;;  %s6451_s0 = sshll.u32 %s8737_s27, 8 }
  0xbc   : > { %v8988_v5 = vand.u32 4294901760, %v682_v2  ;;  %v679_v8 = vld [vmem:[#allocation7 + $0x50] sm:$0xff]  ;;  %v8990_v9 = vand.u32 4294901760, %v681_v6  ;;  %v8992_v10 = vand.u32 4294901760, %v680_v7  ;;  %v678_v12 = vld [vmem:[#allocation7 + $0x48] sm:$0xff]  ;;  %v677_v13 = vld [vmem:[#allocation7 + $0x40] sm:$0xff] }
  0xbd   : > { %v8994_v11 = vand.u32 4294901760, %v679_v8  ;;  %7040 = vmatprep.subr.mxu0 %v8984_v3  ;;  %v8998_v14 = vsub.f32 %v684_v0, %v8984_v3  ;;  %v9001_v15 = vsub.f32 %v683_v1, %v8986_v4  ;;  %v9003_v16 = vand.u32 4294901760, %v678_v12  ;;  %v676_v18 = vld [vmem:[#allocation7 + $0x38] sm:$0xff]  ;;  %v675_v25 = vld [vmem:[#allocation7 + $0x30] sm:$0xff]  ;;  %v674_v35 = vld [vmem:[#allocation7 + $0x28] sm:$0xff]  ;;  %s666_s25 = scalar_lea.vmem [#allocation16], %s8954_s20 }
  0xbe   : > { %v9006_v17 = vsub.f32 %v682_v2, %v8988_v5  ;;  %7041 = vmatpush3.msra.mxu0 %v8984_v3  ;;  %v9010_v19 = vsub.f32 %v681_v6, %v8990_v9  ;;  %v9013_v20 = vsub.f32 %v680_v7, %v8992_v10  ;;  %v9025_v24 = vand.u32 4294901760, %v677_v13  ;;  %v673_v40 = vld [vmem:[#allocation7 + $0x20] sm:$0xff]  ;;  %v672_v48 = vld [vmem:[#allocation7 + $0x18] sm:$0xff]  ;;  %v671_v59 = vld [vmem:[#allocation7 + $0x10] sm:$0xff]  ;;  %s6255_s19 = sshll.u32 %s666_s25, 4  ;;  %s11791_s6 = sld [smem:[#allocation85_spill]]  ;;  %s11396_s19 = int_to_ptr.vmem [resolvable:$true] %s6255_s19 }
  0xbf   : > { %7042 = vmatprep.subr.mxu0 %v8986_v4  ;;  %v9017_v21 = vand.u32 4294901760, %v8998_v14  ;;  %v9020_v22 = vand.u32 4294901760, %v9001_v15  ;;  %v9031_v27 = vand.u32 4294901760, %v676_v18  ;;  %v9037_v29 = vsub.f32 %v679_v8, %v8994_v11  ;;  %v667_v49 = vld [vmem:[%s580_s10] sm:$0xff]  ;;  %v668_v54 = vld [vmem:[%s580_s10 + $0x8] sm:$0xff]  ;;  %s8529_s16 = scalar_lea.vmem %s11396_s19, 256 }
  0xc0   : > { %v9023_v23 = vand.u32 4294901760, %v9006_v17  ;;  %7043 = vmatpush3.msra.mxu0 %v8986_v4  ;;  %v9029_v26 = vand.u32 4294901760, %v9010_v19  ;;  %v9034_v28 = vand.u32 4294901760, %v9013_v20  ;;  %v9047_v33 = vsub.f32 %v678_v12, %v9003_v16  ;;  %v670_v2 = vld [vmem:[#allocation7 + $0x8] sm:$0xff]  ;;  %p8530_p5 = scmp.ne.s32.totalorder %s11396_s19, %s8529_s16  ;;  %p11792_p9 = scmp.ne.s32.totalorder %s11629_s2, 0 }
  0xc1   : > { %7044 = vmatprep.subr.mxu0 %v8988_v5  ;;  %v797_v30 = vsub.f32 %v8998_v14, %v9017_v21  ;;  %v804_v31 = vsub.f32 %v9001_v15, %v9020_v22  ;;  %v9050_v34 = vand.u32 4294901760, %v675_v25  ;;  %v9056_v39 = vand.u32 4294901760, %v9037_v29  ;;  %s8628_s27 = smov [#allocation16]  }
  0xc2   : > { %v811_v32 = vsub.f32 %v9006_v17, %v9023_v23  ;;  %7045 = vmatpush3.msra.mxu0 %v8988_v5  ;;  %v818_v38 = vsub.f32 %v9010_v19, %v9029_v26  ;;  %v825_v41 = vsub.f32 %v9013_v20, %v9034_v28  ;;  %v9062_v42 = vand.u32 4294901760, %v9047_v33  ;;  %p8531_p1 = pnand %p8530_p5, %p11792_p9  ;;  %s8533_s20 = sshll.u32 %s8628_s27, 4  ;;  %s8534_s20 = int_to_ptr.vmem [resolvable:$false] %s8533_s20 }
  0xc3   : > { %7046 = vmatprep.subr.mxu0 %v8990_v9  ;;  %v798_v36 = vand.u32 4294901760, %v797_v30  ;;  %v805_v37 = vand.u32 4294901760, %v804_v31  ;;  %v9065_v43 = vsub.f32 %v677_v13, %v9025_v24  ;;  %v9068_v45 = vand.u32 4294901760, %v674_v35  ;;  %s8535_s12 = scalar_lea.vmem %s8534_s20, 512  ;;  %p8536_p12 = scmp.lt.s32.totalorder %s11396_s19, %s8534_s20 }
  0xc4   : > { %7047 = vmatpush3.msra.mxu0 %v8990_v9  ;;  %v812_v44 = vand.u32 4294901760, %v811_v32  ;;  %v9071_v46 = vsub.f32 %v676_v18, %v9031_v27  ;;  %v9074_v47 = vand.u32 4294901760, %v673_v40  ;;  %v819_v50 = vand.u32 4294901760, %v818_v38  ;;  %v669_v18 = vld [vmem:[#allocation7] sm:$0xff]  ;;  %s11394_s8 = scalar_lea.hbm %s11791_s6, %s6451_s0  ;;  %p8532_p4 = pneg %p8531_p1 }
  0xc5   : > { %7048 = vmatprep.subr.mxu0 %v8992_v10  ;;  %7075 = vmatprep.subr.mxu1 %v798_v36  ;;  %v832_v51 = vsub.f32 %v9037_v29, %v9056_v39  ;;  %v9082_v52 = vand.u32 4294901760, %v9065_v43  ;;  %v9085_v53 = vsub.f32 %v675_v25, %v9050_v34  ;;  %v826_v55 = vand.u32 4294901760, %v825_v41  ;;  %p8537_p2 = scmp.lt.s32.totalorder %s8535_s12, %s8529_s16 }
  0xc6   : > { %7049 = vmatpush3.msra.mxu0 %v8992_v10  ;;  %7076 = vmatpush3.msra.mxu1 %v798_v36  ;;  %v839_v56 = vsub.f32 %v9047_v33, %v9062_v42  ;;  %v9093_v57 = vand.u32 4294901760, %v672_v48  ;;  %v9096_v58 = vand.u32 4294901760, %v9071_v46  ;;  %v9099_v60 = vsub.f32 %v674_v35, %v9068_v45 }
  0xc7   : > { %7050 = vmatprep.subr.mxu0 %v8994_v11  ;;  %7077 = vmatprep.subr.mxu1 %v805_v37  ;;  %v9101_v61 = vand.u32 4294901760, %v667_v49  ;;  %v9104_v62 = vand.u32 4294901760, %v668_v54  ;;  %v833_v63 = vand.u32 4294901760, %v832_v51  ;;  %v846_v0 = vsub.f32 %v9065_v43, %v9082_v52  ;;  %p8538_p3 = por %p8537_p2, %p8536_p12 }
  0xc8   : > { %7051 = vmatpush3.msra.mxu0 %v8994_v11  ;;  %7078 = vmatpush3.msra.mxu1 %v805_v37  ;;  %v9110_v1 = vand.u32 4294901760, %v9085_v53  ;;  %v9113_v6 = vsub.f32 %v673_v40, %v9074_v47  ;;  %v840_v7 = vand.u32 4294901760, %v839_v56  ;;  %v9116_v8 = vand.u32 4294901760, %v671_v59 }
  0xc9   : > { %7052 = vmatprep.subr.mxu0 %v9003_v16  ;;  %7079 = vmatprep.subr.mxu1 %v812_v44  ;;  %v853_v12 = vsub.f32 %v9071_v46, %v9096_v58  ;;  %v9122_v13 = vand.u32 4294901760, %v9099_v60  ;;  %v9125_v25 = vsub.f32 %v667_v49, %v9101_v61  ;;  %v9128_v30 = vsub.f32 %v672_v48, %v9093_v57  ;;  %p8539_p7 = pnand %p8538_p3, %p8532_p4 }
  0xca   : > { %7053 = vmatpush3.msra.mxu0 %v9003_v16  ;;  %7080 = vmatpush3.msra.mxu1 %v812_v44  ;;  %v9131_v31 = vand.u32 4294901760, %v670_v2  ;;  %v9134_v32 = vsub.f32 %v668_v54, %v9104_v62  ;;  %v847_v35 = vand.u32 4294901760, %v846_v0  ;;  %v860_v36 = vsub.f32 %v9085_v53, %v9110_v1 }
  0xcb   : > { %7054 = vmatprep.subr.mxu0 %v9025_v24  ;;  %7081 = vmatprep.subr.mxu1 %v819_v50  ;;  %v9140_v37 = vand.u32 4294901760, %v9113_v6  ;;  %v9143_v38 = vand.u32 4294901760, %v669_v18  ;;  %v9146_v40 = vsub.f32 %v671_v59, %v9116_v8  ;;  %v854_v41 = vand.u32 4294901760, %v853_v12 }
  0xcc   : > { %7055 = vmatpush3.msra.mxu0 %v9025_v24  ;;  %7082 = vmatpush3.msra.mxu1 %v819_v50  ;;  %v867_v44 = vsub.f32 %v9099_v60, %v9122_v13  ;;  %v9152_v48 = vand.u32 4294901760, %v9125_v25  ;;  %v9155_v49 = vand.u32 4294901760, %v9128_v30  ;;  %v9159_v50 = vand.u32 4294901760, %v9134_v32 }
  0xcd   : > { %7056 = vmatprep.subr.mxu0 %v9031_v27  ;;  %7083 = vmatprep.subr.mxu1 %v826_v55  ;;  %v9162_v51 = vsub.f32 %v670_v2, %v9131_v31  ;;  %v861_v54 = vand.u32 4294901760, %v860_v36  ;;  %v9169_v56 = vand.u32 4294901760, %v9146_v40  ;;  %v9172_v59 = vsub.f32 %v669_v18, %v9143_v38 }
  0xce   : > { %7057 = vmatpush3.msra.mxu0 %v9031_v27  ;;  %7084 = vmatpush3.msra.mxu1 %v826_v55  ;;  %11645 = vst [vmem:[#allocation28_spill] sm:$0xff] %v9155_v49  ;;  %v874_v55 = vsub.f32 %v9113_v6, %v9140_v37  ;;  %v776_v0 = vsub.f32 %v9125_v25, %v9152_v48 }
  0xcf   : > { %7058 = vmatprep.subr.mxu0 %v9050_v34  ;;  %7085 = vmatprep.subr.mxu1 %v833_v63  ;;  %v881_v2 = vsub.f32 %v9128_v30, %v9155_v49  ;;  %v9183_v12 = vand.u32 4294901760, %v9162_v51  ;;  %v9190_v36 = vand.u32 4294901760, %v9172_v59 }
  0xd0   : > { %7059 = vmatpush3.msra.mxu0 %v9050_v34  ;;  %7086 = vmatpush3.msra.mxu1 %v833_v63  ;;  %v868_v63 = vand.u32 4294901760, %v867_v44  ;;  %v875_v18 = vand.u32 4294901760, %v874_v55 }
  0xd1   : > { %7060 = vmatprep.subr.mxu0 %v9068_v45  ;;  %7087 = vmatprep.subr.mxu1 %v840_v7  ;;  %v882_v44 = vand.u32 4294901760, %v881_v2 }
  0xd2   : > { %7061 = vmatpush3.msra.mxu0 %v9068_v45  ;;  %7088 = vmatpush3.msra.mxu1 %v840_v7  ;;  %v786_v7 = vsub.f32 %v9134_v32, %v9159_v50 }
  0xd3   : > { %7062 = vmatprep.subr.mxu0 %v9074_v47  ;;  %7089 = vmatprep.subr.mxu1 %v847_v35 }
  0xd4   : > { %7063 = vmatpush3.msra.mxu0 %v9074_v47  ;;  %7090 = vmatpush3.msra.mxu1 %v847_v35  ;;  %v888_v35 = vsub.f32 %v9146_v40, %v9169_v56  ;;  %v9196_v49 = vand.u32 4294901760, %v786_v7 }
  0xd5   : > { %7064 = vmatprep.subr.mxu0 %v9093_v57  ;;  %7091 = vmatprep.subr.mxu1 %v854_v41 }
  0xd6   : > { %7065 = vmatpush3.msra.mxu0 %v9093_v57  ;;  %7092 = vmatpush3.msra.mxu1 %v854_v41  ;;  %v9193_v41 = vand.u32 4294901760, %v776_v0  ;;  %v889_v55 = vand.u32 4294901760, %v888_v35  ;;  %v902_v0 = vsub.f32 %v9172_v59, %v9190_v36 }
  0xd7   : > { %7066 = vmatprep.subr.mxu0 %v9116_v8  ;;  %7093 = vmatprep.subr.mxu1 %v861_v54 }
  0xd8   : > { %7067 = vmatpush3.msra.mxu0 %v9116_v8  ;;  %7094 = vmatpush3.msra.mxu1 %v861_v54  ;;  %v895_v54 = vsub.f32 %v9162_v51, %v9183_v12  ;;  %v903_v2 = vand.u32 4294901760, %v902_v0 }
  0xd9   : > { %7068 = vmatprep.subr.mxu0 %v9131_v31  ;;  %7095 = vmatprep.subr.mxu1 %v868_v63 }
  0xda   : > { %7069 = vmatpush3.msra.mxu0 %v9131_v31  ;;  %7096 = vmatpush3.msra.mxu1 %v868_v63  ;;  %v896_v63 = vand.u32 4294901760, %v895_v54 }
  0xdb   : > { %7070 = vmatprep.subr.mxu0 %v9143_v38  ;;  %7097 = vmatprep.subr.mxu1 %v875_v18 }
  0xdc   : > { %7071 = vmatpush3.msra.mxu0 %v9143_v38  ;;  %7098 = vmatpush3.msra.mxu1 %v875_v18 }
  0xdd   : > { %7072 = vmatprep.mubr.f32.mxu0 %v9193_v41  ;;  %7099 = vmatprep.subr.mxu1 %v882_v44 }
  0xde   : > { %7110 = vmatprep.subr.mxu0 %v8998_v14  ;;  %7073 = vmatmul.mubr.f32.vlgmr.msra.gmra.mxu0 %v9196_v49 }
  0xdf   : > { %7100 = vmatpush3.msra.mxu1 %v882_v44  ;;  %7111 = vmatpush3.msra.mxu0 %v8998_v14  ;;  %v1388_v14 = vld [vmem:[#allocation8 + $0x60] sm:$0xff] }
  0xe0   : > { %7101 = vmatprep.subr.mxu1 %v889_v55  ;;  %7112 = vmatprep.subr.mxu0 %v9001_v15 }
  0xe1   : > { %7102 = vmatpush3.msra.mxu1 %v889_v55  ;;  %7113 = vmatpush3.msra.mxu0 %v9001_v15 }
  0xe2   : > { %7103 = vmatprep.subr.mxu1 %v896_v63  ;;  %7114 = vmatprep.subr.mxu0 %v9006_v17 }
  0xe3   : > { %7104 = vmatpush3.msra.mxu1 %v896_v63  ;;  %7115 = vmatpush3.msra.mxu0 %v9006_v17 }
  0xe4   : > { %7105 = vmatprep.subr.mxu1 %v903_v2  ;;  %7116 = vmatprep.subr.mxu0 %v9010_v19 }
  0xe5   : > { %7106 = vmatpush3.msra.mxu1 %v903_v2  ;;  %7107 = vmatprep.mubr.f32.mxu1 %v9101_v61 }
  0xe6   : > { %7117 = vmatpush3.msra.mxu0 %v9010_v19  ;;  %7108 = vmatmul.mubr.f32.vlgmr.msra.gmra.mxu1 %v9104_v62  ;;  %v9335_v19 = vand.u32 4294901760, %v1388_v14 }
  0xe7   : > { %7118 = vmatprep.subr.mxu0 %v9013_v20  ;;  %7145 = vmatprep.subr.mxu1 %v8984_v3 }
  0xe8   : > { %7119 = vmatpush3.msra.mxu0 %v9013_v20  ;;  %7146 = vmatpush3.msra.mxu1 %v8984_v3 }
  0xe9   : > { %7120 = vmatprep.subr.mxu0 %v9037_v29  ;;  %7147 = vmatprep.subr.mxu1 %v8986_v4 }
  0xea   : > { %7121 = vmatpush3.msra.mxu0 %v9037_v29  ;;  %7148 = vmatpush3.msra.mxu1 %v8986_v4  ;;  %v9362_v29 = vsub.f32 %v1388_v14, %v9335_v19 }
  0xeb   : > { %7122 = vmatprep.subr.mxu0 %v9047_v33  ;;  %7149 = vmatprep.subr.mxu1 %v8988_v5 }
  0xec   : > { %7123 = vmatpush3.msra.mxu0 %v9047_v33  ;;  %7150 = vmatpush3.msra.mxu1 %v8988_v5  ;;  %v1384_v33 = vld [vmem:[#allocation8 + $0x40] sm:$0xff] }
  0xed   : > { %7124 = vmatprep.subr.mxu0 %v9065_v43  ;;  %7151 = vmatprep.subr.mxu1 %v8990_v9 }
  0xee   : > { %7125 = vmatpush3.msra.mxu0 %v9065_v43  ;;  %7152 = vmatpush3.msra.mxu1 %v8990_v9 }
  0xef   : > { %7126 = vmatprep.subr.mxu0 %v9071_v46  ;;  %7153 = vmatprep.subr.mxu1 %v8992_v10 }
  0xf0   : > { %7127 = vmatpush3.msra.mxu0 %v9071_v46  ;;  %7154 = vmatpush3.msra.mxu1 %v8992_v10 }
  0xf1   : > { %7128 = vmatprep.subr.mxu0 %v9085_v53  ;;  %7155 = vmatprep.subr.mxu1 %v8994_v11 }
  0xf2   : > { %7129 = vmatpush3.msra.mxu0 %v9085_v53  ;;  %7156 = vmatpush3.msra.mxu1 %v8994_v11  ;;  %v1382_v53 = vld [vmem:[#allocation8 + $0x30] sm:$0xff] }
  0xf3   : > { %7130 = vmatprep.subr.mxu0 %v9099_v60  ;;  %7157 = vmatprep.subr.mxu1 %v9003_v16 }
  0xf4   : > { %7131 = vmatpush3.msra.mxu0 %v9099_v60  ;;  %7158 = vmatpush3.msra.mxu1 %v9003_v16 }
  0xf5   : > { %7132 = vmatprep.subr.mxu0 %v9113_v6  ;;  %7159 = vmatprep.subr.mxu1 %v9025_v24 }
  0xf6   : > { %7133 = vmatpush3.msra.mxu0 %v9113_v6  ;;  %7160 = vmatpush3.msra.mxu1 %v9025_v24 }
  0xf7   : > { %7134 = vmatprep.subr.mxu0 %v9128_v30  ;;  %7161 = vmatprep.subr.mxu1 %v9031_v27 }
  0xf8   : > { %7135 = vmatpush3.msra.mxu0 %v9128_v30  ;;  %7162 = vmatpush3.msra.mxu1 %v9031_v27  ;;  %v1381_v30 = vld [vmem:[#allocation8 + $0x28] sm:$0xff] }
  0xf9   : > { %7136 = vmatprep.subr.mxu0 %v9146_v40  ;;  %7163 = vmatprep.subr.mxu1 %v9050_v34  ;;  %v9425_v7 = vand.u32 4294901760, %v1381_v30 }
  0xfa   : > { %7137 = vmatpush3.msra.mxu0 %v9146_v40  ;;  %7164 = vmatpush3.msra.mxu1 %v9050_v34 }
  0xfb   : > { %7138 = vmatprep.subr.mxu0 %v9162_v51  ;;  %7165 = vmatprep.subr.mxu1 %v9068_v45 }
  0xfc   : > { %7139 = vmatpush3.msra.mxu0 %v9162_v51  ;;  %7166 = vmatpush3.msra.mxu1 %v9068_v45  ;;  %v1380_v51 = vld [vmem:[#allocation8 + $0x20] sm:$0xff] }
  0xfd   : > { %7140 = vmatprep.subr.mxu0 %v9172_v59  ;;  %7167 = vmatprep.subr.mxu1 %v9074_v47  ;;  %v9434_v35 = vand.u32 4294901760, %v1380_v51 }
  0xfe   : > { %7141 = vmatpush3.msra.mxu0 %v9172_v59  ;;  %7142 = vmatprep.mubr.f32.mxu0 %v9125_v25 }
  0xff   : > { %7168 = vmatpush3.msra.mxu1 %v9074_v47  ;;  %7143 = vmatmul.mubr.f32.vlgmr.msra.gmra.mxu0 %v9134_v32 }
 0x100   : > { %7169 = vmatprep.subr.mxu1 %v9093_v57  ;;  %7180 = vmatprep.subr.mxu0 %v9017_v21 }
 0x101   : > { %7170 = vmatpush3.msra.mxu1 %v9093_v57  ;;  %7181 = vmatpush3.msra.mxu0 %v9017_v21 }
 0x102   : > { %7171 = vmatprep.subr.mxu1 %v9116_v8  ;;  %7182 = vmatprep.subr.mxu0 %v9020_v22 }
 0x103   : > { %7172 = vmatpush3.msra.mxu1 %v9116_v8  ;;  %7183 = vmatpush3.msra.mxu0 %v9020_v22  ;;  %v1386_v22 = vld [vmem:[#allocation8 + $0x50] sm:$0xff] }
 0x104   : > { %7173 = vmatprep.subr.mxu1 %v9131_v31  ;;  %7184 = vmatprep.subr.mxu0 %v9023_v23 }
 0x105   : > { %7174 = vmatpush3.msra.mxu1 %v9131_v31  ;;  %7185 = vmatpush3.msra.mxu0 %v9023_v23 }
 0x106   : > { %7175 = vmatprep.subr.mxu1 %v9143_v38  ;;  %7186 = vmatprep.subr.mxu0 %v9029_v26 }
 0x107   : > { %7176 = vmatpush3.msra.mxu1 %v9143_v38  ;;  %7177 = vmatprep.mubr.f32.mxu1 %v9152_v48 }
 0x108   : > { %7187 = vmatpush3.msra.mxu0 %v9029_v26  ;;  %7178 = vmatmul.mubr.f32.vlgmr.msra.gmra.mxu1 %v9159_v50  ;;  %v1385_v26 = vld [vmem:[#allocation8 + $0x48] sm:$0xff] }
 0x109   : > { %7188 = vmatprep.subr.mxu0 %v9034_v28  ;;  %7215 = vmatprep.subr.mxu1 %v8984_v3 }
 0x10a   : > { %7189 = vmatpush3.msra.mxu0 %v9034_v28  ;;  %7216 = vmatpush3.msra.mxu1 %v8984_v3  ;;  %v1391_v3 = vld [vmem:[#allocation8 + $0x78] sm:$0xff] }
 0x10b   : > { %7190 = vmatprep.subr.mxu0 %v9056_v39  ;;  %7217 = vmatprep.subr.mxu1 %v8986_v4 }
 0x10c   : > { %7191 = vmatpush3.msra.mxu0 %v9056_v39  ;;  %7218 = vmatpush3.msra.mxu1 %v8986_v4  ;;  %v1390_v4 = vld [vmem:[#allocation8 + $0x70] sm:$0xff] }
 0x10d   : > { %7192 = vmatprep.subr.mxu0 %v9062_v42  ;;  %7219 = vmatprep.subr.mxu1 %v8988_v5 }
 0x10e   : > { %7193 = vmatpush3.msra.mxu0 %v9062_v42  ;;  %7220 = vmatpush3.msra.mxu1 %v8988_v5  ;;  %v9314_v5 = vand.u32 4294901760, %v1391_v3  ;;  %v9373_v42 = vand.u32 4294901760, %v1385_v26 }
 0x10f   : > { %7194 = vmatprep.subr.mxu0 %v9082_v52  ;;  %7221 = vmatprep.subr.mxu1 %v8990_v9 }
 0x110   : > { %7195 = vmatpush3.msra.mxu0 %v9082_v52  ;;  %7222 = vmatpush3.msra.mxu1 %v8990_v9  ;;  %v1389_v9 = vld [vmem:[#allocation8 + $0x68] sm:$0xff]  ;;  %v9329_v17 = vsub.f32 %v1391_v3, %v9314_v5  ;;  %v9387_v52 = vand.u32 4294901760, %v9362_v29 }
 0x111   : > { %7196 = vmatprep.subr.mxu0 %v9096_v58  ;;  %7223 = vmatprep.subr.mxu1 %v8992_v10  ;;  %v9326_v15 = vand.u32 4294901760, %v1389_v9 }
 0x112   : > { %7197 = vmatpush3.msra.mxu0 %v9096_v58  ;;  %7224 = vmatpush3.msra.mxu1 %v8992_v10  ;;  %v11646_v10 = vld [vmem:[#allocation28_spill] sm:$0xff]  ;;  %v9347_v23 = vand.u32 4294901760, %v9329_v17 }
 0x113   : > { %7198 = vmatprep.subr.mxu0 %v9110_v1  ;;  %7225 = vmatprep.subr.mxu1 %v8994_v11 }
 0x114   : > { %7199 = vmatpush3.msra.mxu0 %v9110_v1  ;;  %7226 = vmatpush3.msra.mxu1 %v8994_v11  ;;  %v9320_v11 = vand.u32 4294901760, %v1390_v4  ;;  %v1504_v39 = vsub.f32 %v9329_v17, %v9347_v23 }
 0x115   : > { %7200 = vmatprep.subr.mxu0 %v9122_v13  ;;  %7227 = vmatprep.subr.mxu1 %v9003_v16 }
 0x116   : > { %7201 = vmatpush3.msra.mxu0 %v9122_v13  ;;  %7228 = vmatpush3.msra.mxu1 %v9003_v16  ;;  %v1387_v16 = vld [vmem:[#allocation8 + $0x58] sm:$0xff]  ;;  %v9338_v20 = vsub.f32 %v1390_v4, %v9320_v11  ;;  %v1505_v60 = vand.u32 4294901760, %v1504_v39  ;;  %v9408_v13 = vand.u32 4294901760, %v1382_v53 }
 0x117   : > { %7202 = vmatprep.subr.mxu0 %v9140_v37  ;;  %7229 = vmatprep.subr.mxu1 %v9025_v24  ;;  %v9342_v21 = vand.u32 4294901760, %v1387_v16 }
 0x118   : > { %7203 = vmatpush3.msra.mxu0 %v9140_v37  ;;  %7230 = vmatpush3.msra.mxu1 %v9025_v24  ;;  %v9350_v24 = vsub.f32 %v1389_v9, %v9326_v15  ;;  %v9359_v28 = vand.u32 4294901760, %v9338_v20  ;;  %v1525_v37 = vsub.f32 %v9362_v29, %v9387_v52  ;;  %v9443_v0 = vsub.f32 %v1382_v53, %v9408_v13  ;;  %v1378_v9 = vld [vmem:[#allocation8 + $0x10] sm:$0xff] }
 0x119   : > { %7204 = vmatprep.subr.mxu0 %v11646_v10  ;;  %7231 = vmatprep.subr.mxu1 %v9031_v27  ;;  %v9468_v39 = vand.u32 4294901760, %v1378_v9 }
 0x11a   : > { %7205 = vmatpush3.msra.mxu0 %v11646_v10  ;;  %7232 = vmatpush3.msra.mxu1 %v9031_v27  ;;  %v9356_v27 = vand.u32 4294901760, %v1386_v22  ;;  %v9376_v43 = vand.u32 4294901760, %v9350_v24  ;;  %v1511_v46 = vsub.f32 %v9338_v20, %v9359_v28  ;;  %v1526_v44 = vand.u32 4294901760, %v1525_v37 }
 0x11b   : > { %7206 = vmatprep.subr.mxu0 %v9169_v56  ;;  %7233 = vmatprep.subr.mxu1 %v9050_v34  ;;  %v9455_v10 = vsub.f32 %v1381_v30, %v9425_v7 }
 0x11c   : > { %7207 = vmatpush3.msra.mxu0 %v9169_v56  ;;  %7234 = vmatpush3.msra.mxu1 %v9050_v34  ;;  %v9367_v34 = vsub.f32 %v1387_v16, %v9342_v21  ;;  %v1518_v1 = vsub.f32 %v9350_v24, %v9376_v43 }
 0x11d   : > { %7208 = vmatprep.subr.mxu0 %v9183_v12  ;;  %7235 = vmatprep.subr.mxu1 %v9068_v45  ;;  %v9474_v53 = vand.u32 4294901760, %v9455_v10 }
 0x11e   : > { %7209 = vmatpush3.msra.mxu0 %v9183_v12  ;;  %7236 = vmatpush3.msra.mxu1 %v9068_v45  ;;  %v1383_v45 = vld [vmem:[#allocation8 + $0x38] sm:$0xff]  ;;  %v9395_v58 = vand.u32 4294901760, %v9367_v34  ;;  %v1519_v59 = vand.u32 4294901760, %v1518_v1 }
 0x11f   : > { %7210 = vmatprep.subr.mxu0 %v9190_v36  ;;  %7237 = vmatprep.subr.mxu1 %v9074_v47  ;;  %v9401_v6 = vand.u32 4294901760, %v1383_v45 }
 0x120   : > { %7211 = vmatpush3.msra.mxu0 %v9190_v36  ;;  %7212 = vmatprep.mubr.f32.mxu0 %v9101_v61  ;;  %v1379_v36 = vld [vmem:[#allocation8 + $0x18] sm:$0xff] }
 0x121   : > { %7238 = vmatpush3.msra.mxu1 %v9074_v47  ;;  %7213 = vmatmul.mubr.f32.vlgmr.msra.gmra.mxu0 %v9104_v62  ;;  %v9384_v47 = vand.u32 4294901760, %v1384_v33  ;;  %v9431_v18 = vsub.f32 %v1383_v45, %v9401_v6  ;;  %v9449_v3 = vand.u32 4294901760, %v1379_v36 }
 0x122   : > { %7239 = vmatprep.subr.mxu1 %v9093_v57  ;;  %7250 = vmatprep.subr.mxu0 %v9314_v5 }
 0x123   : > { %7240 = vmatpush3.msra.mxu1 %v9093_v57  ;;  %7251 = vmatpush3.msra.mxu0 %v9314_v5  ;;  %v9390_v57 = vsub.f32 %v1386_v22, %v9356_v27  ;;  %v9418_v56 = vsub.f32 %v1384_v33, %v9384_v47  ;;  %v9452_v4 = vand.u32 4294901760, %v9431_v18  ;;  %v9462_v22 = vand.u32 4294901760, %v9443_v0 }
 0x124   : > { %7241 = vmatprep.subr.mxu1 %v9116_v8  ;;  %7252 = vmatprep.subr.mxu0 %v9320_v11  ;;  %v9465_v33 = vsub.f32 %v1380_v51, %v9434_v35  ;;  %v9477_v1 = vsub.f32 %v1379_v36, %v9449_v3 }
 0x125   : > { %7242 = vmatpush3.msra.mxu1 %v9116_v8  ;;  %7253 = vmatpush3.msra.mxu0 %v9320_v11  ;;  %v9404_v8 = vsub.f32 %v1385_v26, %v9373_v42  ;;  %v9415_v40 = vand.u32 4294901760, %v9390_v57  ;;  %v9440_v55 = vand.u32 4294901760, %v9418_v56  ;;  %v1377_v26 = vld [vmem:[#allocation8 + $0x8] sm:$0xff]  ;;  %v1567_v37 = vsub.f32 %v9443_v0, %v9462_v22 }
 0x126   : > { %7243 = vmatprep.subr.mxu1 %v9131_v31  ;;  %7254 = vmatprep.subr.mxu0 %v9326_v15  ;;  %v9480_v30 = vand.u32 4294901760, %v1377_v26  ;;  %v9486_v51 = vand.u32 4294901760, %v9465_v33 }
 0x127   : > { %7244 = vmatpush3.msra.mxu1 %v9131_v31  ;;  %7255 = vmatpush3.msra.mxu0 %v9326_v15  ;;  %v1512_v31 = vand.u32 4294901760, %v1511_v46  ;;  %v9428_v12 = vand.u32 4294901760, %v9404_v8  ;;  %v1539_v54 = vsub.f32 %v9390_v57, %v9415_v40  ;;  %v1553_v16 = vsub.f32 %v9418_v56, %v9440_v55 }
 0x128   : > { %7245 = vmatprep.subr.mxu1 %v9143_v38  ;;  %7256 = vmatprep.subr.mxu0 %v9335_v19  ;;  %v1560_v46 = vsub.f32 %v9431_v18, %v9452_v4 }
 0x129   : > { %7246 = vmatpush3.msra.mxu1 %v9143_v38  ;;  %7247 = vmatprep.mubr.f32.mxu1 %v9101_v61  ;;  %v1532_v38 = vsub.f32 %v9367_v34, %v9395_v58  ;;  %v1546_v2 = vsub.f32 %v9404_v8, %v9428_v12  ;;  %v1540_v14 = vand.u32 4294901760, %v1539_v54  ;;  %v9498_v54 = vand.u32 4294901760, %v9477_v1 }
 0x12a   : > { %7257 = vmatpush3.msra.mxu0 %v9335_v19  ;;  %7248 = vmatmul.mubr.f32.vlgmr.msra.gmra.mxu1 %v9104_v62  ;;  %v1561_v36 = vand.u32 4294901760, %v1560_v46 }
 0x12b   : > { %7258 = vmatprep.subr.mxu0 %v9342_v21  ;;  %7285 = vmatprep.subr.mxu1 %v1505_v60  ;;  %v1533_v63 = vand.u32 4294901760, %v1532_v38  ;;  %v1547_v45 = vand.u32 4294901760, %v1546_v2  ;;  %v1568_v2 = vand.u32 4294901760, %v1567_v37 }
 0x12c   : > { %7259 = vmatpush3.msra.mxu0 %v9342_v21  ;;  %7286 = vmatpush3.msra.mxu1 %v1505_v60  ;;  %v1376_v60 = vld [vmem:[#allocation8] sm:$0xff] }
 0x12d   : > { %7260 = vmatprep.subr.mxu0 %v9356_v27  ;;  %7287 = vmatprep.subr.mxu1 %v1512_v31  ;;  %v9489_v38 = vand.u32 4294901760, %v1376_v60 }
 0x12e   : > { %7261 = vmatpush3.msra.mxu0 %v9356_v27  ;;  %7288 = vmatpush3.msra.mxu1 %v1512_v31  ;;  %v1554_v31 = vand.u32 4294901760, %v1553_v16 }
 0x12f   : > { %7262 = vmatprep.subr.mxu0 %v9373_v42  ;;  %7289 = vmatprep.subr.mxu1 %v1519_v59  ;;  %v9512_v16 = vsub.f32 %v1376_v60, %v9489_v38 }
 0x130   : > { %7263 = vmatpush3.msra.mxu0 %v9373_v42  ;;  %7290 = vmatpush3.msra.mxu1 %v1519_v59  ;;  %v9492_v59 = vsub.f32 %v1378_v9, %v9468_v39  ;;  %v1581_v9 = vsub.f32 %v9465_v33, %v9486_v51 }
 0x131   : > { %7264 = vmatprep.subr.mxu0 %v9384_v47  ;;  %7291 = vmatprep.subr.mxu1 %v1526_v44  ;;  %v9526_v37 = vand.u32 4294901760, %v9512_v16 }
 0x132   : > { %7265 = vmatpush3.msra.mxu0 %v9384_v47  ;;  %7292 = vmatpush3.msra.mxu1 %v1526_v44  ;;  %v1574_v44 = vsub.f32 %v9455_v10, %v9474_v53 }
 0x133   : > { %7266 = vmatprep.subr.mxu0 %v9401_v6  ;;  %7293 = vmatprep.subr.mxu1 %v1533_v63 }
 0x134   : > { %7267 = vmatpush3.msra.mxu0 %v9401_v6  ;;  %7294 = vmatpush3.msra.mxu1 %v1533_v63  ;;  %v9502_v63 = vsub.f32 %v1377_v26, %v9480_v30  ;;  %v1575_v26 = vand.u32 4294901760, %v1574_v44 }
 0x135   : > { %7268 = vmatprep.subr.mxu0 %v9408_v13  ;;  %7295 = vmatprep.subr.mxu1 %v1540_v14 }
 0x136   : > { %7269 = vmatpush3.msra.mxu0 %v9408_v13  ;;  %7296 = vmatpush3.msra.mxu1 %v1540_v14  ;;  %v9509_v14 = vand.u32 4294901760, %v9492_v59  ;;  %v9519_v46 = vand.u32 4294901760, %v9502_v63 }
 0x137   : > { %7270 = vmatprep.subr.mxu0 %v9425_v7  ;;  %7297 = vmatprep.subr.mxu1 %v1547_v45 }
 0x138   : > { %7271 = vmatpush3.msra.mxu0 %v9425_v7  ;;  %7298 = vmatpush3.msra.mxu1 %v1547_v45  ;;  %v1588_v45 = vsub.f32 %v9477_v1, %v9498_v54  ;;  %v1595_v60 = vsub.f32 %v9492_v59, %v9509_v14  ;;  %v1602_v44 = vsub.f32 %v9502_v63, %v9519_v46 }
 0x139   : > { %7272 = vmatprep.subr.mxu0 %v9434_v35  ;;  %7299 = vmatprep.subr.mxu1 %v1554_v31 }
 0x13a   : > { %7273 = vmatpush3.msra.mxu0 %v9434_v35  ;;  %7300 = vmatpush3.msra.mxu1 %v1554_v31  ;;  %v1582_v31 = vand.u32 4294901760, %v1581_v9  ;;  %v1609_v9 = vsub.f32 %v9512_v16, %v9526_v37 }
 0x13b   : > { %7274 = vmatprep.subr.mxu0 %v9449_v3  ;;  %7301 = vmatprep.subr.mxu1 %v1561_v36 }
 0x13c   : > { %7275 = vmatpush3.msra.mxu0 %v9449_v3  ;;  %7302 = vmatpush3.msra.mxu1 %v1561_v36  ;;  %v1589_v36 = vand.u32 4294901760, %v1588_v45  ;;  %v1610_v45 = vand.u32 4294901760, %v1609_v9 }
 0x13d   : > { %7276 = vmatprep.subr.mxu0 %v9468_v39  ;;  %7303 = vmatprep.subr.mxu1 %v1568_v2 }
 0x13e   : > { %7277 = vmatpush3.msra.mxu0 %v9468_v39  ;;  %7304 = vmatpush3.msra.mxu1 %v1568_v2  ;;  %v1596_v2 = vand.u32 4294901760, %v1595_v60  ;;  %v2086_v60 = vld [vmem:[#allocation10 + $0x18] sm:$0xff] }
 0x13f   : > { %7278 = vmatprep.subr.mxu0 %v9480_v30  ;;  %7305 = vmatprep.subr.mxu1 %v1575_v26 }
 0x140   : > { %7279 = vmatpush3.msra.mxu0 %v9480_v30  ;;  %7306 = vmatpush3.msra.mxu1 %v1575_v26  ;;  %v1603_v26 = vand.u32 4294901760, %v1602_v44 }
 0x141   : > { %7280 = vmatprep.subr.mxu0 %v9489_v38  ;;  %7307 = vmatprep.subr.mxu1 %v1582_v31 }
 0x142   : > { %7281 = vmatpush3.msra.mxu0 %v9489_v38  ;;  %7308 = vmatpush3.msra.mxu1 %v1582_v31 }
 0x143   : > { %7282 = vmatprep.mubr.f32.mxu0 %v9193_v41  ;;  %7309 = vmatprep.subr.mxu1 %v1589_v36 }
 0x144   : > { %7320 = vmatprep.subr.mxu0 %v9329_v17  ;;  %7283 = vmatmul.mubr.f32.vlgmr.msra.gmra.mxu0 %v9196_v49 }
 0x145   : > { %7310 = vmatpush3.msra.mxu1 %v1589_v36  ;;  %7321 = vmatpush3.msra.mxu0 %v9329_v17  ;;  %v2096_v17 = vld [vmem:[#allocation10 + $0x68] sm:$0xff] }
 0x146   : > { %7311 = vmatprep.subr.mxu1 %v1596_v2  ;;  %7322 = vmatprep.subr.mxu0 %v9338_v20 }
 0x147   : > { %7312 = vmatpush3.msra.mxu1 %v1596_v2  ;;  %7323 = vmatpush3.msra.mxu0 %v9338_v20  ;;  %v2095_v20 = vld [vmem:[#allocation10 + $0x60] sm:$0xff] }
 0x148   : > { %7313 = vmatprep.subr.mxu1 %v1603_v26  ;;  %7324 = vmatprep.subr.mxu0 %v9350_v24 }
 0x149   : > { %7314 = vmatpush3.msra.mxu1 %v1603_v26  ;;  %7325 = vmatpush3.msra.mxu0 %v9350_v24 }
 0x14a   : > { %7315 = vmatprep.subr.mxu1 %v1610_v45  ;;  %7326 = vmatprep.subr.mxu0 %v9362_v29 }
 0x14b   : > { %7316 = vmatpush3.msra.mxu1 %v1610_v45  ;;  %7317 = vmatprep.mubr.f32.mxu1 %v9101_v61  ;;  %v9781_v45 = vand.u32 4294901760, %v2086_v60 }
 0x14c   : > { %7327 = vmatpush3.msra.mxu0 %v9362_v29  ;;  %7318 = vmatmul.mubr.f32.vlgmr.msra.gmra.mxu1 %v9104_v62 }
 0x14d   : > { %7328 = vmatprep.subr.mxu0 %v9367_v34  ;;  %7355 = vmatprep.subr.mxu1 %v9314_v5 }
 0x14e   : > { %7329 = vmatpush3.msra.mxu0 %v9367_v34  ;;  %7356 = vmatpush3.msra.mxu1 %v9314_v5  ;;  %v2093_v34 = vld [vmem:[#allocation10 + $0x50] sm:$0xff] }
 0x14f   : > { %7330 = vmatprep.subr.mxu0 %v9390_v57  ;;  %7357 = vmatprep.subr.mxu1 %v9320_v11 }
 0x150   : > { %7331 = vmatpush3.msra.mxu0 %v9390_v57  ;;  %7358 = vmatpush3.msra.mxu1 %v9320_v11  ;;  %v9691_v57 = vand.u32 4294901760, %v2093_v34 }
 0x151   : > { %7332 = vmatprep.subr.mxu0 %v9404_v8  ;;  %7359 = vmatprep.subr.mxu1 %v9326_v15 }
 0x152   : > { %7333 = vmatpush3.msra.mxu0 %v9404_v8  ;;  %7360 = vmatpush3.msra.mxu1 %v9326_v15 }
 0x153   : > { %7334 = vmatprep.subr.mxu0 %v9418_v56  ;;  %7361 = vmatprep.subr.mxu1 %v9335_v19 }
 0x154   : > { %7335 = vmatpush3.msra.mxu0 %v9418_v56  ;;  %7362 = vmatpush3.msra.mxu1 %v9335_v19 }
 0x155   : > { %7336 = vmatprep.subr.mxu0 %v9431_v18  ;;  %7363 = vmatprep.subr.mxu1 %v9342_v21 }
 0x156   : > { %7337 = vmatpush3.msra.mxu0 %v9431_v18  ;;  %7364 = vmatpush3.msra.mxu1 %v9342_v21 }
 0x157   : > { %7338 = vmatprep.subr.mxu0 %v9443_v0  ;;  %7365 = vmatprep.subr.mxu1 %v9356_v27 }
 0x158   : > { %7339 = vmatpush3.msra.mxu0 %v9443_v0  ;;  %7366 = vmatpush3.msra.mxu1 %v9356_v27 }
 0x159   : > { %7340 = vmatprep.subr.mxu0 %v9455_v10  ;;  %7367 = vmatprep.subr.mxu1 %v9373_v42 }
 0x15a   : > { %7341 = vmatpush3.msra.mxu0 %v9455_v10  ;;  %7368 = vmatpush3.msra.mxu1 %v9373_v42 }
 0x15b   : > { %7342 = vmatprep.subr.mxu0 %v9465_v33  ;;  %7369 = vmatprep.subr.mxu1 %v9384_v47 }
 0x15c   : > { %7343 = vmatpush3.msra.mxu0 %v9465_v33  ;;  %7370 = vmatpush3.msra.mxu1 %v9384_v47 }
 0x15d   : > { %7344 = vmatprep.subr.mxu0 %v9477_v1  ;;  %7371 = vmatprep.subr.mxu1 %v9401_v6 }
 0x15e   : > { %7345 = vmatpush3.msra.mxu0 %v9477_v1  ;;  %7372 = vmatpush3.msra.mxu1 %v9401_v6 }
 0x15f   : > { %7346 = vmatprep.subr.mxu0 %v9492_v59  ;;  %7373 = vmatprep.subr.mxu1 %v9408_v13 }
 0x160   : > { %7347 = vmatpush3.msra.mxu0 %v9492_v59  ;;  %7374 = vmatpush3.msra.mxu1 %v9408_v13 }
 0x161   : > { %7348 = vmatprep.subr.mxu0 %v9502_v63  ;;  %7375 = vmatprep.subr.mxu1 %v9425_v7 }
 0x162   : > { %7349 = vmatpush3.msra.mxu0 %v9502_v63  ;;  %7376 = vmatpush3.msra.mxu1 %v9425_v7  ;;  %v2087_v63 = vld [vmem:[#allocation10 + $0x20] sm:$0xff] }
 0x163   : > { %7350 = vmatprep.subr.mxu0 %v9512_v16  ;;  %7377 = vmatprep.subr.mxu1 %v9434_v35  ;;  %v9769_v36 = vand.u32 4294901760, %v2087_v63 }
 0x164   : > { %7351 = vmatpush3.msra.mxu0 %v9512_v16  ;;  %7352 = vmatprep.mubr.f32.mxu0 %v9125_v25 }
 0x165   : > { %7378 = vmatpush3.msra.mxu1 %v9434_v35  ;;  %7353 = vmatmul.mubr.f32.vlgmr.msra.gmra.mxu0 %v9134_v32 }
 0x166   : > { %7379 = vmatprep.subr.mxu1 %v9449_v3  ;;  %7390 = vmatprep.subr.mxu0 %v9347_v23 }
 0x167   : > { %7380 = vmatpush3.msra.mxu1 %v9449_v3  ;;  %7391 = vmatpush3.msra.mxu0 %v9347_v23  ;;  %v2094_v23 = vld [vmem:[#allocation10 + $0x58] sm:$0xff] }
 0x168   : > { %7381 = vmatprep.subr.mxu1 %v9468_v39  ;;  %7392 = vmatprep.subr.mxu0 %v9359_v28  ;;  %v9674_v29 = vand.u32 4294901760, %v2094_v23 }
 0x169   : > { %7382 = vmatpush3.msra.mxu1 %v9468_v39  ;;  %7393 = vmatpush3.msra.mxu0 %v9359_v28 }
 0x16a   : > { %7383 = vmatprep.subr.mxu1 %v9480_v30  ;;  %7394 = vmatprep.subr.mxu0 %v9376_v43  ;;  %v9699_v8 = vsub.f32 %v2094_v23, %v9674_v29 }
 0x16b   : > { %7384 = vmatpush3.msra.mxu1 %v9480_v30  ;;  %7395 = vmatpush3.msra.mxu0 %v9376_v43 }
 0x16c   : > { %7385 = vmatprep.subr.mxu1 %v9489_v38  ;;  %7396 = vmatprep.subr.mxu0 %v9387_v52  ;;  %v9727_v0 = vand.u32 4294901760, %v9699_v8 }
 0x16d   : > { %7386 = vmatpush3.msra.mxu1 %v9489_v38  ;;  %7387 = vmatprep.mubr.f32.mxu1 %v9152_v48 }
 0x16e   : > { %7397 = vmatpush3.msra.mxu0 %v9387_v52  ;;  %7388 = vmatmul.mubr.f32.vlgmr.msra.gmra.mxu1 %v9159_v50 }
 0x16f   : > { %7398 = vmatprep.subr.mxu0 %v9395_v58  ;;  %7425 = vmatprep.subr.mxu1 %v9314_v5 }
 0x170   : > { %7399 = vmatpush3.msra.mxu0 %v9395_v58  ;;  %7426 = vmatpush3.msra.mxu1 %v9314_v5  ;;  %v2098_v5 = vld [vmem:[#allocation10 + $0x78] sm:$0xff] }
 0x171   : > { %7400 = vmatprep.subr.mxu0 %v9415_v40  ;;  %7427 = vmatprep.subr.mxu1 %v9320_v11 }
 0x172   : > { %7401 = vmatpush3.msra.mxu0 %v9415_v40  ;;  %7428 = vmatpush3.msra.mxu1 %v9320_v11  ;;  %v2097_v11 = vld [vmem:[#allocation10 + $0x70] sm:$0xff] }
 0x173   : > { %7402 = vmatprep.subr.mxu0 %v9428_v12  ;;  %7429 = vmatprep.subr.mxu1 %v9326_v15 }
 0x174   : > { %7403 = vmatpush3.msra.mxu0 %v9428_v12  ;;  %7430 = vmatpush3.msra.mxu1 %v9326_v15  ;;  %v9646_v15 = vand.u32 4294901760, %v2098_v5  ;;  %v2090_v12 = vld [vmem:[#allocation10 + $0x38] sm:$0xff] }
 0x175   : > { %7404 = vmatprep.subr.mxu0 %v9440_v55  ;;  %7431 = vmatprep.subr.mxu1 %v9335_v19 }
 0x176   : > { %7405 = vmatpush3.msra.mxu0 %v9440_v55  ;;  %7432 = vmatpush3.msra.mxu1 %v9335_v19  ;;  %v9652_v19 = vand.u32 4294901760, %v2097_v11  ;;  %v9661_v24 = vsub.f32 %v2098_v5, %v9646_v15  ;;  %v9722_v55 = vsub.f32 %v2093_v34, %v9691_v57 }
 0x177   : > { %7406 = vmatprep.subr.mxu0 %v9452_v4  ;;  %7433 = vmatprep.subr.mxu1 %v9342_v21 }
 0x178   : > { %7407 = vmatpush3.msra.mxu0 %v9452_v4  ;;  %7434 = vmatpush3.msra.mxu1 %v9342_v21  ;;  %v9658_v21 = vand.u32 4294901760, %v2096_v17  ;;  %v9670_v28 = vsub.f32 %v2097_v11, %v9652_v19  ;;  %v2085_v11 = vld [vmem:[#allocation10 + $0x10] sm:$0xff] }
 0x179   : > { %7408 = vmatprep.subr.mxu0 %v9462_v22  ;;  %7435 = vmatprep.subr.mxu1 %v9356_v27 }
 0x17a   : > { %7409 = vmatpush3.msra.mxu0 %v9462_v22  ;;  %7436 = vmatpush3.msra.mxu1 %v9356_v27  ;;  %v9665_v27 = vand.u32 4294901760, %v2095_v20  ;;  %v9682_v43 = vsub.f32 %v2096_v17, %v9658_v21  ;;  %v9694_v58 = vand.u32 4294901760, %v9670_v28  ;;  %v9733_v22 = vand.u32 4294901760, %v2090_v12 }
 0x17b   : > { %7410 = vmatprep.subr.mxu0 %v9474_v53  ;;  %7437 = vmatprep.subr.mxu1 %v9373_v42 }
 0x17c   : > { %7411 = vmatpush3.msra.mxu0 %v9474_v53  ;;  %7438 = vmatpush3.msra.mxu1 %v9373_v42  ;;  %v9679_v42 = vand.u32 4294901760, %v9661_v24  ;;  %v9687_v52 = vsub.f32 %v2095_v20, %v9665_v27  ;;  %v9708_v56 = vand.u32 4294901760, %v9682_v43  ;;  %v2218_v18 = vsub.f32 %v9670_v28, %v9694_v58  ;;  %v2088_v53 = vld [vmem:[#allocation10 + $0x28] sm:$0xff] }
 0x17d   : > { %7412 = vmatprep.subr.mxu0 %v9486_v51  ;;  %7439 = vmatprep.subr.mxu1 %v9384_v47 }
 0x17e   : > { %7413 = vmatpush3.msra.mxu0 %v9486_v51  ;;  %7440 = vmatpush3.msra.mxu1 %v9384_v47  ;;  %v2092_v47 = vld [vmem:[#allocation10 + $0x48] sm:$0xff]  ;;  %v2225_v10 = vsub.f32 %v9682_v43, %v9708_v56  ;;  %v2219_v1 = vand.u32 4294901760, %v2218_v18  ;;  %v9747_v51 = vand.u32 4294901760, %v9722_v55 }
 0x17f   : > { %7414 = vmatprep.subr.mxu0 %v9498_v54  ;;  %7441 = vmatprep.subr.mxu1 %v9401_v6  ;;  %v9705_v40 = vand.u32 4294901760, %v2092_v47 }
 0x180   : > { %7415 = vmatpush3.msra.mxu0 %v9498_v54  ;;  %7442 = vmatpush3.msra.mxu1 %v9401_v6  ;;  %v2091_v6 = vld [vmem:[#allocation10 + $0x40] sm:$0xff]  ;;  %v2239_v54 = vsub.f32 %v9699_v8, %v9727_v0 }
 0x181   : > { %7416 = vmatprep.subr.mxu0 %v9509_v14  ;;  %7443 = vmatprep.subr.mxu1 %v9408_v13  ;;  %v9736_v33 = vsub.f32 %v2092_v47, %v9705_v40  ;;  %v2084_v47 = vld [vmem:[#allocation10 + $0x8] sm:$0xff] }
 0x182   : > { %7417 = vmatpush3.msra.mxu0 %v9509_v14  ;;  %7444 = vmatpush3.msra.mxu1 %v9408_v13  ;;  %v2211_v13 = vsub.f32 %v9661_v24, %v9679_v42  ;;  %v9757_v14 = vand.u32 4294901760, %v2088_v53  ;;  %v2240_v9 = vand.u32 4294901760, %v2239_v54 }
 0x183   : > { %7418 = vmatprep.subr.mxu0 %v9519_v46  ;;  %7445 = vmatprep.subr.mxu1 %v9425_v7  ;;  %v9760_v16 = vand.u32 4294901760, %v9736_v33 }
 0x184   : > { %7419 = vmatpush3.msra.mxu0 %v9519_v46  ;;  %7446 = vmatpush3.msra.mxu1 %v9425_v7  ;;  %v9713_v7 = vand.u32 4294901760, %v9687_v52  ;;  %v2212_v4 = vand.u32 4294901760, %v2211_v13  ;;  %v9763_v46 = vsub.f32 %v2090_v12, %v9733_v22  ;;  %v9787_v17 = vsub.f32 %v2088_v53, %v9757_v14 }
 0x185   : > { %7420 = vmatprep.subr.mxu0 %v9526_v37  ;;  %7447 = vmatprep.subr.mxu1 %v9434_v35  ;;  %v2253_v26 = vsub.f32 %v9736_v33, %v9760_v16  ;;  %v9800_v13 = vand.u32 4294901760, %v2085_v11 }
 0x186   : > { %7421 = vmatpush3.msra.mxu0 %v9526_v37  ;;  %7422 = vmatprep.mubr.f32.mxu0 %v9101_v61  ;;  %v2246_v37 = vsub.f32 %v9722_v55, %v9747_v51  ;;  %v9784_v5 = vand.u32 4294901760, %v9763_v46 }
 0x187   : > { %7448 = vmatpush3.msra.mxu1 %v9434_v35  ;;  %7423 = vmatmul.mubr.f32.vlgmr.msra.gmra.mxu0 %v9104_v62  ;;  %v9719_v35 = vand.u32 4294901760, %v2091_v6  ;;  %v2254_v12 = vand.u32 4294901760, %v2253_v26 }
 0x188   : > { %7449 = vmatprep.subr.mxu1 %v9449_v3  ;;  %7460 = vmatprep.subr.mxu0 %v9646_v15  ;;  %v2247_v20 = vand.u32 4294901760, %v2246_v37  ;;  %v2267_v18 = vsub.f32 %v9763_v46, %v9784_v5 }
 0x189   : > { %7450 = vmatpush3.msra.mxu1 %v9449_v3  ;;  %7461 = vmatpush3.msra.mxu0 %v9646_v15  ;;  %v2089_v3 = vld [vmem:[#allocation10 + $0x30] sm:$0xff]  ;;  %v9750_v59 = vsub.f32 %v2091_v6, %v9719_v35  ;;  %v9797_v6 = vsub.f32 %v2087_v63, %v9769_v36 }
 0x18a   : > { %7451 = vmatprep.subr.mxu1 %v9468_v39  ;;  %7462 = vmatprep.subr.mxu0 %v9652_v19 }
 0x18b   : > { %7452 = vmatpush3.msra.mxu1 %v9468_v39  ;;  %7463 = vmatpush3.msra.mxu0 %v9652_v19  ;;  %v2232_v39 = vsub.f32 %v9687_v52, %v9713_v7  ;;  %v9772_v44 = vand.u32 4294901760, %v9750_v59  ;;  %v9818_v54 = vand.u32 4294901760, %v9797_v6 }
 0x18c   : > { %7453 = vmatprep.subr.mxu1 %v9480_v30  ;;  %7464 = vmatprep.subr.mxu0 %v9658_v21 }
 0x18d   : > { %7454 = vmatpush3.msra.mxu1 %v9480_v30  ;;  %7465 = vmatpush3.msra.mxu0 %v9658_v21  ;;  %v9744_v30 = vand.u32 4294901760, %v2089_v3  ;;  %v2233_v31 = vand.u32 4294901760, %v2232_v39  ;;  %v2260_v23 = vsub.f32 %v9750_v59, %v9772_v44  ;;  %v9812_v39 = vand.u32 4294901760, %v2084_v47 }
 0x18e   : > { %7455 = vmatprep.subr.mxu1 %v9489_v38  ;;  %7466 = vmatprep.subr.mxu0 %v9665_v27 }
 0x18f   : > { %7456 = vmatpush3.msra.mxu1 %v9489_v38  ;;  %7457 = vmatprep.mubr.f32.mxu1 %v9101_v61  ;;  %v2226_v38 = vand.u32 4294901760, %v2225_v10  ;;  %v9775_v2 = vsub.f32 %v2089_v3, %v9744_v30  ;;  %v9806_v3 = vand.u32 4294901760, %v9787_v17  ;;  %v9809_v10 = vsub.f32 %v2086_v60, %v9781_v45 }
 0x190   : > { %7467 = vmatpush3.msra.mxu0 %v9665_v27  ;;  %7458 = vmatmul.mubr.f32.vlgmr.msra.gmra.mxu1 %v9104_v62  ;;  %v2261_v53 = vand.u32 4294901760, %v2260_v23 }
 0x191   : > { %7468 = vmatprep.subr.mxu0 %v9674_v29  ;;  %7495 = vmatprep.subr.mxu1 %v2212_v4  ;;  %v9794_v34 = vand.u32 4294901760, %v9775_v2  ;;  %v2281_v60 = vsub.f32 %v9787_v17, %v9806_v3  ;;  %v9830_v37 = vand.u32 4294901760, %v9809_v10 }
 0x192   : > { %7469 = vmatpush3.msra.mxu0 %v9674_v29  ;;  %7496 = vmatpush3.msra.mxu1 %v2212_v4  ;;  %v2083_v4 = vld [vmem:[#allocation10] sm:$0xff] }
 0x193   : > { %7470 = vmatprep.subr.mxu0 %v9691_v57  ;;  %7497 = vmatprep.subr.mxu1 %v2219_v1  ;;  %v9821_v63 = vand.u32 4294901760, %v2083_v4 }
 0x194   : > { %7471 = vmatpush3.msra.mxu0 %v9691_v57  ;;  %7498 = vmatpush3.msra.mxu1 %v2219_v1  ;;  %v2274_v1 = vsub.f32 %v9775_v2, %v9794_v34 }
 0x195   : > { %7472 = vmatprep.subr.mxu0 %v9705_v40  ;;  %7499 = vmatprep.subr.mxu1 %v2226_v38  ;;  %v9844_v23 = vsub.f32 %v2083_v4, %v9821_v63 }
 0x196   : > { %7473 = vmatpush3.msra.mxu0 %v9705_v40  ;;  %7500 = vmatpush3.msra.mxu1 %v2226_v38  ;;  %v9824_v38 = vsub.f32 %v2085_v11, %v9800_v13  ;;  %v2275_v26 = vand.u32 4294901760, %v2274_v1  ;;  %v2288_v11 = vsub.f32 %v9797_v6, %v9818_v54 }
 0x197   : > { %7474 = vmatprep.subr.mxu0 %v9719_v35  ;;  %7501 = vmatprep.subr.mxu1 %v2233_v31  ;;  %v9858_v1 = vand.u32 4294901760, %v9844_v23 }
 0x198   : > { %7475 = vmatpush3.msra.mxu0 %v9719_v35  ;;  %7502 = vmatpush3.msra.mxu1 %v2233_v31  ;;  %v2268_v31 = vand.u32 4294901760, %v2267_v18 }
 0x199   : > { %7476 = vmatprep.subr.mxu0 %v9733_v22  ;;  %7503 = vmatprep.subr.mxu1 %v2240_v9 }
 0x19a   : > { %7477 = vmatpush3.msra.mxu0 %v9733_v22  ;;  %7504 = vmatpush3.msra.mxu1 %v2240_v9  ;;  %v9834_v9 = vsub.f32 %v2084_v47, %v9812_v39  ;;  %v2282_v47 = vand.u32 4294901760, %v2281_v60 }
 0x19b   : > { %7478 = vmatprep.subr.mxu0 %v9744_v30  ;;  %7505 = vmatprep.subr.mxu1 %v2247_v20 }
 0x19c   : > { %7479 = vmatpush3.msra.mxu0 %v9744_v30  ;;  %7506 = vmatpush3.msra.mxu1 %v2247_v20  ;;  %v9841_v20 = vand.u32 4294901760, %v9824_v38  ;;  %v9851_v18 = vand.u32 4294901760, %v9834_v9 }
 0x19d   : > { %7480 = vmatprep.subr.mxu0 %v9757_v14  ;;  %7507 = vmatprep.subr.mxu1 %v2254_v12 }
 0x19e   : > { %7481 = vmatpush3.msra.mxu0 %v9757_v14  ;;  %7508 = vmatpush3.msra.mxu1 %v2254_v12  ;;  %v2295_v12 = vsub.f32 %v9809_v10, %v9830_v37  ;;  %v2302_v4 = vsub.f32 %v9824_v38, %v9841_v20  ;;  %v2309_v60 = vsub.f32 %v9834_v9, %v9851_v18 }
 0x19f   : > { %7482 = vmatprep.subr.mxu0 %v9769_v36  ;;  %7509 = vmatprep.subr.mxu1 %v2261_v53 }
 0x1a0   : > { %7483 = vmatpush3.msra.mxu0 %v9769_v36  ;;  %7510 = vmatpush3.msra.mxu1 %v2261_v53  ;;  %v2289_v53 = vand.u32 4294901760, %v2288_v11  ;;  %v2316_v11 = vsub.f32 %v9844_v23, %v9858_v1 }
 0x1a1   : > { %7484 = vmatprep.subr.mxu0 %v9781_v45  ;;  %7511 = vmatprep.subr.mxu1 %v2268_v31 }
 0x1a2   : > { %7485 = vmatpush3.msra.mxu0 %v9781_v45  ;;  %7512 = vmatpush3.msra.mxu1 %v2268_v31  ;;  %v2296_v31 = vand.u32 4294901760, %v2295_v12  ;;  %v2317_v12 = vand.u32 4294901760, %v2316_v11 }
 0x1a3   : > { %7486 = vmatprep.subr.mxu0 %v9800_v13  ;;  %7513 = vmatprep.subr.mxu1 %v2275_v26 }
 0x1a4   : > { %7487 = vmatpush3.msra.mxu0 %v9800_v13  ;;  %7514 = vmatpush3.msra.mxu1 %v2275_v26  ;;  %v2303_v26 = vand.u32 4294901760, %v2302_v4 }
 0x1a5   : > { %7488 = vmatprep.subr.mxu0 %v9812_v39  ;;  %7515 = vmatprep.subr.mxu1 %v2282_v47 }
 0x1a6   : > { %7489 = vmatpush3.msra.mxu0 %v9812_v39  ;;  %7516 = vmatpush3.msra.mxu1 %v2282_v47  ;;  %v2310_v47 = vand.u32 4294901760, %v2309_v60 }
 0x1a7   : > { %7490 = vmatprep.subr.mxu0 %v9821_v63  ;;  %7517 = vmatprep.subr.mxu1 %v2289_v53 }
 0x1a8   : > { %7491 = vmatpush3.msra.mxu0 %v9821_v63  ;;  %7518 = vmatpush3.msra.mxu1 %v2289_v53 }
 0x1a9   : > { %7492 = vmatprep.mubr.f32.mxu0 %v9193_v41  ;;  %7519 = vmatprep.subr.mxu1 %v2296_v31  ;;  %v2805_v41 = vld [vmem:[#allocation11 + $0x78] sm:$0xff] }
 0x1aa   : > { %7530 = vmatprep.subr.mxu0 %v9661_v24  ;;  %7493 = vmatmul.mubr.f32.vlgmr.msra.gmra.mxu0 %v9196_v49  ;;  %v6433_v49 = vld [vmem:[%s11442_s3] ss:$0 sm:$0xff] }
 0x1ab   : > { %7520 = vmatpush3.msra.mxu1 %v2296_v31  ;;  %7531 = vmatpush3.msra.mxu0 %v9661_v24  ;;  %v9987_v24 = vand.u32 4294901760, %v2805_v41  ;;  %v2796_v31 = vld [vmem:[#allocation11 + $0x30] sm:$0xff] }
 0x1ac   : > { %7521 = vmatprep.subr.mxu1 %v2303_v26  ;;  %7532 = vmatprep.subr.mxu0 %v9670_v28 }
 0x1ad   : > { %7522 = vmatpush3.msra.mxu1 %v2303_v26  ;;  %7533 = vmatpush3.msra.mxu0 %v9670_v28 }
 0x1ae   : > { %7523 = vmatprep.subr.mxu1 %v2310_v47  ;;  %7534 = vmatprep.subr.mxu0 %v9682_v43 }
 0x1af   : > { %7524 = vmatpush3.msra.mxu1 %v2310_v47  ;;  %7535 = vmatpush3.msra.mxu0 %v9682_v43 }
 0x1b0   : > { %7525 = vmatprep.subr.mxu1 %v2317_v12  ;;  %7536 = vmatprep.subr.mxu0 %v9687_v52 }
 0x1b1   : > { %7526 = vmatpush3.msra.mxu1 %v2317_v12  ;;  %7527 = vmatprep.mubr.f32.mxu1 %v9101_v61 }
 0x1b2   : > { %7537 = vmatpush3.msra.mxu0 %v9687_v52  ;;  %7528 = vmatmul.mubr.f32.vlgmr.msra.gmra.mxu1 %v9104_v62  ;;  %v2802_v52 = vld [vmem:[#allocation11 + $0x60] sm:$0xff] }
 0x1b3   : > { %7538 = vmatprep.subr.mxu0 %v9699_v8  ;;  %7565 = vmatprep.subr.mxu1 %v9646_v15 }
 0x1b4   : > { %7539 = vmatpush3.msra.mxu0 %v9699_v8  ;;  %7566 = vmatpush3.msra.mxu1 %v9646_v15  ;;  %v10006_v8 = vsub.f32 %v2805_v41, %v9987_v24  ;;  %v2794_v41 = vld [vmem:[#allocation11 + $0x20] sm:$0xff] }
 0x1b5   : > { %7540 = vmatprep.subr.mxu0 %v9722_v55  ;;  %7567 = vmatprep.subr.mxu1 %v9652_v19 }
 0x1b6   : > { %7541 = vmatpush3.msra.mxu0 %v9722_v55  ;;  %7568 = vmatpush3.msra.mxu1 %v9652_v19 }
 0x1b7   : > { %7542 = vmatprep.subr.mxu0 %v9736_v33  ;;  %7569 = vmatprep.subr.mxu1 %v9658_v21 }
 0x1b8   : > { %7543 = vmatpush3.msra.mxu0 %v9736_v33  ;;  %7570 = vmatpush3.msra.mxu1 %v9658_v21  ;;  %v2800_v33 = vld [vmem:[#allocation11 + $0x50] sm:$0xff] }
 0x1b9   : > { %7544 = vmatprep.subr.mxu0 %v9750_v59  ;;  %7571 = vmatprep.subr.mxu1 %v9665_v27 }
 0x1ba   : > { %7545 = vmatpush3.msra.mxu0 %v9750_v59  ;;  %7572 = vmatpush3.msra.mxu1 %v9665_v27  ;;  %v10026_v59 = vand.u32 4294901760, %v10006_v8 }
 0x1bb   : > { %7546 = vmatprep.subr.mxu0 %v9763_v46  ;;  %7573 = vmatprep.subr.mxu1 %v9674_v29 }
 0x1bc   : > { %7547 = vmatpush3.msra.mxu0 %v9763_v46  ;;  %7574 = vmatpush3.msra.mxu1 %v9674_v29 }
 0x1bd   : > { %7548 = vmatprep.subr.mxu0 %v9775_v2  ;;  %7575 = vmatprep.subr.mxu1 %v9691_v57 }
 0x1be   : > { %7549 = vmatpush3.msra.mxu0 %v9775_v2  ;;  %7576 = vmatpush3.msra.mxu1 %v9691_v57 }
 0x1bf   : > { %7550 = vmatprep.subr.mxu0 %v9787_v17  ;;  %7577 = vmatprep.subr.mxu1 %v9705_v40 }
 0x1c0   : > { %7551 = vmatpush3.msra.mxu0 %v9787_v17  ;;  %7578 = vmatpush3.msra.mxu1 %v9705_v40 }
 0x1c1   : > { %7552 = vmatprep.subr.mxu0 %v9797_v6  ;;  %7579 = vmatprep.subr.mxu1 %v9719_v35 }
 0x1c2   : > { %7553 = vmatpush3.msra.mxu0 %v9797_v6  ;;  %7580 = vmatpush3.msra.mxu1 %v9719_v35 }
 0x1c3   : > { %7554 = vmatprep.subr.mxu0 %v9809_v10  ;;  %7581 = vmatprep.subr.mxu1 %v9733_v22 }
 0x1c4   : > { %7555 = vmatpush3.msra.mxu0 %v9809_v10  ;;  %7582 = vmatpush3.msra.mxu1 %v9733_v22  ;;  %v2798_v10 = vld [vmem:[#allocation11 + $0x40] sm:$0xff] }
 0x1c5   : > { %7556 = vmatprep.subr.mxu0 %v9824_v38  ;;  %7583 = vmatprep.subr.mxu1 %v9744_v30 }
 0x1c6   : > { %7557 = vmatpush3.msra.mxu0 %v9824_v38  ;;  %7584 = vmatpush3.msra.mxu1 %v9744_v30 }
 0x1c7   : > { %7558 = vmatprep.subr.mxu0 %v9834_v9  ;;  %7585 = vmatprep.subr.mxu1 %v9757_v14 }
 0x1c8   : > { %7559 = vmatpush3.msra.mxu0 %v9834_v9  ;;  %7586 = vmatpush3.msra.mxu1 %v9757_v14  ;;  %v2797_v9 = vld [vmem:[#allocation11 + $0x38] sm:$0xff] }
 0x1c9   : > { %7560 = vmatprep.subr.mxu0 %v9844_v23  ;;  %7587 = vmatprep.subr.mxu1 %v9769_v36 }
 0x1ca   : > { %7561 = vmatpush3.msra.mxu0 %v9844_v23  ;;  %7562 = vmatprep.mubr.f32.mxu0 %v9125_v25  ;;  %v9958_v25 = vpop.f32.mrf.mxu0 }
 0x1cb   : > { %7588 = vmatpush3.msra.mxu1 %v9769_v36  ;;  %7563 = vmatmul.mubr.f32.vlgmr.msra.gmra.mxu0 %v9134_v32 }
 0x1cc   : > { %7589 = vmatprep.subr.mxu1 %v9781_v45  ;;  %7600 = vmatprep.subr.mxu0 %v9679_v42  ;;  %v779_v32 = vpop.f32.mrf.mxu0 }
 0x1cd   : > { %7590 = vmatpush3.msra.mxu1 %v9781_v45  ;;  %7601 = vmatpush3.msra.mxu0 %v9679_v42 }
 0x1ce   : > { %7591 = vmatprep.subr.mxu1 %v9800_v13  ;;  %7602 = vmatprep.subr.mxu0 %v9694_v58 }
 0x1cf   : > { %7592 = vmatpush3.msra.mxu1 %v9800_v13  ;;  %7603 = vmatpush3.msra.mxu0 %v9694_v58 }
 0x1d0   : > { %7593 = vmatprep.subr.mxu1 %v9812_v39  ;;  %7604 = vmatprep.subr.mxu0 %v9708_v56 }
 0x1d1   : > { %7594 = vmatpush3.msra.mxu1 %v9812_v39  ;;  %7605 = vmatpush3.msra.mxu0 %v9708_v56  ;;  %v2801_v56 = vld [vmem:[#allocation11 + $0x58] sm:$0xff] }
 0x1d2   : > { %7595 = vmatprep.subr.mxu1 %v9821_v63  ;;  %7606 = vmatprep.subr.mxu0 %v9713_v7 }
 0x1d3   : > { %7596 = vmatpush3.msra.mxu1 %v9821_v63  ;;  %7597 = vmatprep.mubr.f32.mxu1 %v9152_v48  ;;  %v9968_v48 = vpop.f32.mrf.mxu1 }
 0x1d4   : > { %7607 = vmatpush3.msra.mxu0 %v9713_v7  ;;  %7598 = vmatmul.mubr.f32.vlgmr.msra.gmra.mxu1 %v9159_v50  ;;  %v9977_v50 = vpop.f32.mrf.mxu0 }
 0x1d5   : > { %7608 = vmatprep.subr.mxu0 %v9727_v0  ;;  %7635 = vmatprep.subr.mxu1 %v9646_v15 }
 0x1d6   : > { %7609 = vmatpush3.msra.mxu0 %v9727_v0  ;;  %7636 = vmatpush3.msra.mxu1 %v9646_v15  ;;  %v940_v15 = vpop.f32.mrf.mxu1 }
 0x1d7   : > { %7610 = vmatprep.subr.mxu0 %v9747_v51  ;;  %7637 = vmatprep.subr.mxu1 %v9652_v19 }
 0x1d8   : > { %7611 = vmatpush3.msra.mxu0 %v9747_v51  ;;  %7638 = vmatpush3.msra.mxu1 %v9652_v19  ;;  %v2804_v19 = vld [vmem:[#allocation11 + $0x70] sm:$0xff]  ;;  %v9989_v28 = vpop.f32.mrf.mxu1  ;;  %v10023_v51 = vand.u32 4294901760, %v2801_v56 }
 0x1d9   : > { %7612 = vmatprep.subr.mxu0 %v9760_v16  ;;  %7639 = vmatprep.subr.mxu1 %v9658_v21  ;;  %v9995_v42 = vand.u32 4294901760, %v2804_v19 }
 0x1da   : > { %7613 = vmatpush3.msra.mxu0 %v9760_v16  ;;  %7640 = vmatpush3.msra.mxu1 %v9658_v21  ;;  %v780_v21 = vadd.f32 %v6433_v49, %v779_v32 }
 0x1db   : > { %7614 = vmatprep.subr.mxu0 %v9772_v44  ;;  %7641 = vmatprep.subr.mxu1 %v9665_v27  ;;  %v10015_v55 = vsub.f32 %v2804_v19, %v9995_v42 }
 0x1dc   : > { %7615 = vmatpush3.msra.mxu0 %v9772_v44  ;;  %7642 = vmatpush3.msra.mxu1 %v9665_v27  ;;  %v1050_v27 = vpop.f32.mrf.mxu0  ;;  %v10035_v44 = vand.u32 4294901760, %v2800_v33 }
 0x1dd   : > { %7616 = vmatprep.subr.mxu0 %v9784_v5  ;;  %7643 = vmatprep.subr.mxu1 %v9674_v29  ;;  %v10038_v2 = vand.u32 4294901760, %v10015_v55 }
 0x1de   : > { %7617 = vmatpush3.msra.mxu0 %v9784_v5  ;;  %7644 = vmatpush3.msra.mxu1 %v9674_v29  ;;  %v2803_v29 = vld [vmem:[#allocation11 + $0x68] sm:$0xff] }
 0x1df   : > { %7618 = vmatprep.subr.mxu0 %v9794_v34  ;;  %7645 = vmatprep.subr.mxu1 %v9691_v57  ;;  %v10003_v58 = vand.u32 4294901760, %v2803_v29  ;;  %v2799_v5 = vld [vmem:[#allocation11 + $0x48] sm:$0xff] }
 0x1e0   : > { %7619 = vmatpush3.msra.mxu0 %v9794_v34  ;;  %7646 = vmatpush3.msra.mxu1 %v9691_v57  ;;  %v941_v57 = vadd.f32 %v940_v15, %v780_v21  ;;  %v790_v34 = vadd.f32 %v9958_v25, %v6433_v49  ;;  %v10060_v38 = vand.u32 4294901760, %v2799_v5  ;;  %v2795_v25 = vld [vmem:[#allocation11 + $0x28] sm:$0xff] }
 0x1e1   : > { %7620 = vmatprep.subr.mxu0 %v9806_v3  ;;  %7647 = vmatprep.subr.mxu1 %v9705_v40  ;;  %v9999_v43 = vpop.f32.mrf.mxu0  ;;  %v10029_v16 = vsub.f32 %v2803_v29, %v10003_v58  ;;  %v2793_v29 = vld [vmem:[#allocation11 + $0x18] sm:$0xff] }
 0x1e2   : > { %7621 = vmatpush3.msra.mxu0 %v9806_v3  ;;  %7648 = vmatpush3.msra.mxu1 %v9705_v40  ;;  %v1146_v40 = vpop.f32.mrf.mxu1  ;;  %v1051_v7 = vadd.f32 %v1050_v27, %v941_v57  ;;  %v947_v23 = vadd.f32 %v9968_v48, %v790_v34  ;;  %v10093_v26 = vsub.f32 %v2799_v5, %v10060_v38  ;;  %v10105_v48 = vand.u32 4294901760, %v2796_v31 }
 0x1e3   : > { %7622 = vmatprep.subr.mxu0 %v9818_v54  ;;  %7649 = vmatprep.subr.mxu1 %v9719_v35  ;;  %v1273_v0 = vpop.f32.mrf.mxu0  ;;  %v10053_v3 = vand.u32 4294901760, %v10029_v16 }
 0x1e4   : > { %7623 = vmatpush3.msra.mxu0 %v9818_v54  ;;  %7650 = vmatpush3.msra.mxu1 %v9719_v35  ;;  %v10012_v35 = vand.u32 4294901760, %v2802_v52  ;;  %v10056_v54 = vsub.f32 %v2801_v56, %v10023_v51  ;;  %v1058_v60 = vadd.f32 %v9977_v50, %v947_v23  ;;  %v10122_v19 = vand.u32 4294901760, %v10093_v26 }
 0x1e5   : > { %7624 = vmatprep.subr.mxu0 %v9830_v37  ;;  %7651 = vmatprep.subr.mxu1 %v9733_v22  ;;  %v2932_v4 = vsub.f32 %v10029_v16, %v10053_v3 }
 0x1e6   : > { %7625 = vmatpush3.msra.mxu0 %v9830_v37  ;;  %7652 = vmatpush3.msra.mxu1 %v9733_v22  ;;  %v10041_v17 = vsub.f32 %v2802_v52, %v10012_v35  ;;  %v1155_v32 = vadd.f32 %v9989_v28, %v1058_v60  ;;  %v10134_v52 = vand.u32 4294901760, %v2794_v41  ;;  %v2790_v60 = vld [vmem:[#allocation11] sm:$0xff] }
 0x1e7   : > { %7626 = vmatprep.subr.mxu0 %v9841_v20  ;;  %7653 = vmatprep.subr.mxu1 %v9744_v30  ;;  %v2933_v49 = vand.u32 4294901760, %v2932_v4 }
 0x1e8   : > { %7627 = vmatpush3.msra.mxu0 %v9841_v20  ;;  %7654 = vmatpush3.msra.mxu1 %v9744_v30  ;;  %v1147_v30 = vadd.f32 %v1146_v40, %v1051_v7  ;;  %v10067_v37 = vand.u32 4294901760, %v10041_v17  ;;  %v10070_v20 = vsub.f32 %v2800_v33, %v10035_v44  ;;  %v1280_v15 = vadd.f32 %v9999_v43, %v1155_v32 }
 0x1e9   : > { %7628 = vmatprep.subr.mxu0 %v9851_v18  ;;  %7655 = vmatprep.subr.mxu1 %v9757_v14  ;;  %v10140_v40 = vsub.f32 %v2796_v31, %v10105_v48 }
 0x1ea   : > { %7629 = vmatpush3.msra.mxu0 %v9851_v18  ;;  %7656 = vmatpush3.msra.mxu1 %v9757_v14  ;;  %v10019_v22 = vpop.f32.mrf.mxu1  ;;  %v1274_v46 = vadd.f32 %v1273_v0, %v1147_v30  ;;  %v10075_v18 = vand.u32 4294901760, %v2798_v10  ;;  %v2939_v47 = vsub.f32 %v10041_v17, %v10067_v37  ;;  %v10100_v12 = vand.u32 4294901760, %v10070_v20  ;;  %v2792_v30 = vld [vmem:[#allocation11 + $0x10] sm:$0xff] }
 0x1eb   : > { %7630 = vmatprep.subr.mxu0 %v9858_v1  ;;  %7657 = vmatprep.subr.mxu1 %v9769_v36  ;;  %v10131_v43 = vadd.f32 %v10019_v22, %v1280_v15  ;;  %v2960_v0 = vsub.f32 %v10093_v26, %v10122_v19  ;;  %v10147_v22 = vand.u32 4294901760, %v2793_v29  ;;  %v10173_v23 = vand.u32 4294901760, %v2792_v30 }
 0x1ec   : > { %7631 = vmatpush3.msra.mxu0 %v9858_v1  ;;  %7632 = vmatprep.mubr.f32.mxu0 %v9101_v61  ;;  %v1366_v14 = vpop.f32.mrf.mxu1  ;;  %v10085_v1 = vand.u32 4294901760, %v10056_v54  ;;  %v2940_v27 = vand.u32 4294901760, %v2939_v47  ;;  %v2953_v28 = vsub.f32 %v10070_v20, %v10100_v12  ;;  %v10198_v15 = vand.u32 4294901760, %v2790_v60 }
 0x1ed   : > { %7658 = vmatpush3.msra.mxu1 %v9769_v36  ;;  %7633 = vmatmul.mubr.f32.vlgmr.msra.gmra.mxu0 %v9104_v62  ;;  %v2918_v36 = vsub.f32 %v10006_v8, %v10026_v59  ;;  %v10050_v6 = vadd.f32 %v1366_v14, %v1274_v46  ;;  %11648 = vst [vmem:[#allocation29_spill] sm:$0xff] %v10131_v43  ;;  %v10157_v5 = vand.u32 4294901760, %v10131_v43 }
 0x1ee   : > { %7659 = vmatprep.subr.mxu1 %v9781_v45  ;;  %7670 = vmatprep.subr.mxu0 %v9987_v24  ;;  %v2946_v50 = vsub.f32 %v10056_v54, %v10085_v1  ;;  %v2954_v46 = vand.u32 4294901760, %v2953_v28 }
 0x1ef   : > { %7660 = vmatpush3.msra.mxu1 %v9781_v45  ;;  %7671 = vmatpush3.msra.mxu0 %v9987_v24  ;;  %11647 = vst [vmem:[#allocation28_spill] sm:$0xff] %v10050_v6  ;;  %v2925_v45 = vsub.f32 %v10015_v55, %v10038_v2  ;;  %v10080_v53 = vand.u32 4294901760, %v10050_v6 }
 0x1f0   : > { %7661 = vmatprep.subr.mxu1 %v9800_v13  ;;  %7672 = vmatprep.subr.mxu0 %v9995_v42  ;;  %v2947_v56 = vand.u32 4294901760, %v2946_v50 }
 0x1f1   : > { %7662 = vmatpush3.msra.mxu1 %v9800_v13  ;;  %7673 = vmatpush3.msra.mxu0 %v9995_v42  ;;  %v2919_v13 = vand.u32 4294901760, %v2918_v36  ;;  %v2926_v11 = vand.u32 4294901760, %v2925_v45  ;;  %v10163_v36 = vand.u32 4294901760, %v10140_v40  ;;  %v10166_v45 = vsub.f32 %v2794_v41, %v10134_v52 }
 0x1f2   : > { %7663 = vmatprep.subr.mxu1 %v9812_v39  ;;  %7674 = vmatprep.subr.mxu0 %v10003_v58 }
 0x1f3   : > { %7664 = vmatpush3.msra.mxu1 %v9812_v39  ;;  %7675 = vmatpush3.msra.mxu0 %v10003_v58  ;;  %v10090_v39 = vand.u32 4294901760, %v2797_v9  ;;  %v10195_v50 = vand.u32 4294901760, %v10166_v45 }
 0x1f4   : > { %7665 = vmatprep.subr.mxu1 %v9821_v63  ;;  %7676 = vmatprep.subr.mxu0 %v10012_v35 }
 0x1f5   : > { %7666 = vmatpush3.msra.mxu1 %v9821_v63  ;;  %7667 = vmatprep.mubr.f32.mxu1 %v9101_v61  ;;  %v10108_v63 = vsub.f32 %v2798_v10, %v10075_v18  ;;  %v10113_v61 = vsub.f32 %v10050_v6, %v10080_v53  ;;  %v10125_v21 = vsub.f32 %v2797_v9, %v10090_v39  ;;  %v2791_v10 = vld [vmem:[#allocation11 + $0x8] sm:$0xff] }
 0x1f6   : > { %7677 = vmatpush3.msra.mxu0 %v10012_v35  ;;  %7668 = vmatmul.mubr.f32.vlgmr.msra.gmra.mxu1 %v9104_v62  ;;  %v10119_v62 = vand.u32 4294901760, %v2795_v25  ;;  %v10185_v47 = vand.u32 4294901760, %v2791_v10 }
 0x1f7   : > { %7678 = vmatprep.subr.mxu0 %v10023_v51  ;;  %7705 = vmatprep.subr.mxu1 %v2919_v13  ;;  %v10137_v57 = vand.u32 4294901760, %v10108_v63  ;;  %v11473_v7 = vand.u32 4294901760, %v10113_v61  ;;  %v10150_v33 = vand.u32 4294901760, %v10125_v21 }
 0x1f8   : > { %7679 = vmatpush3.msra.mxu0 %v10023_v51  ;;  %7706 = vmatpush3.msra.mxu1 %v2919_v13  ;;  %v10153_v14 = vsub.f32 %v2795_v25, %v10119_v62  ;;  %v2961_v13 = vand.u32 4294901760, %v2960_v0  ;;  %v10189_v25 = vsub.f32 %v10131_v43, %v10157_v5  ;;  %v10211_v0 = vsub.f32 %v2791_v10, %v10185_v47 }
 0x1f9   : > { %7680 = vmatprep.subr.mxu0 %v10035_v44  ;;  %7707 = vmatprep.subr.mxu1 %v2926_v11  ;;  %v2967_v34 = vsub.f32 %v10108_v63, %v10137_v57  ;;  %v2897_v9 = vsub.f32 %v10113_v61, %v11473_v7  ;;  %v2974_v4 = vsub.f32 %v10125_v21, %v10150_v33 }
 0x1fa   : > { %7681 = vmatpush3.msra.mxu0 %v10035_v44  ;;  %7708 = vmatpush3.msra.mxu1 %v2926_v11  ;;  %v10179_v31 = vand.u32 4294901760, %v10153_v14  ;;  %v10182_v11 = vsub.f32 %v2793_v29, %v10147_v22 }
 0x1fb   : > { %7682 = vmatprep.subr.mxu0 %v10060_v38  ;;  %7709 = vmatprep.subr.mxu1 %v2933_v49  ;;  %v2968_v32 = vand.u32 4294901760, %v2967_v34  ;;  %v2898_v41 = vand.u32 4294901760, %v2897_v9  ;;  %v2975_v28 = vand.u32 4294901760, %v2974_v4  ;;  %v2995_v34 = vsub.f32 %v10166_v45, %v10195_v50 }
 0x1fc   : > { %7683 = vmatpush3.msra.mxu0 %v10060_v38  ;;  %7710 = vmatpush3.msra.mxu1 %v2933_v49  ;;  %v2981_v49 = vsub.f32 %v10140_v40, %v10163_v36  ;;  %v2988_v29 = vsub.f32 %v10153_v14, %v10179_v31 }
 0x1fd   : > { %7684 = vmatprep.subr.mxu0 %v10075_v18  ;;  %7711 = vmatprep.subr.mxu1 %v2940_v27 }
 0x1fe   : > { %7685 = vmatpush3.msra.mxu0 %v10075_v18  ;;  %7712 = vmatpush3.msra.mxu1 %v2940_v27  ;;  %v10201_v27 = vsub.f32 %v2792_v30, %v10173_v23  ;;  %v2982_v30 = vand.u32 4294901760, %v2981_v49  ;;  %v2989_v10 = vand.u32 4294901760, %v2988_v29  ;;  %v10228_v49 = vand.u32 4294901760, %v10211_v0 }
 0x1ff   : > { %7737 = vmatprep.mubr.f32.mxu1 %v10080_v53  ;;  %7686 = vmatprep.subr.mxu0 %v10090_v39 }
 0x200   : > { %7713 = vmatprep.subr.mxu1 %v2947_v56  ;;  %7687 = vmatpush3.msra.mxu0 %v10090_v39  ;;  %v10218_v9 = vand.u32 4294901760, %v10201_v27 }
 0x201   : > { %7714 = vmatpush3.msra.mxu1 %v2947_v56  ;;  %7688 = vmatprep.subr.mxu0 %v10105_v48  ;;  %v10207_v56 = vand.u32 4294901760, %v10182_v11 }
 0x202   : > { %7715 = vmatprep.subr.mxu1 %v2954_v46  ;;  %7689 = vmatpush3.msra.mxu0 %v10105_v48 }
 0x203   : > { %7716 = vmatpush3.msra.mxu1 %v2954_v46  ;;  %7690 = vmatprep.subr.mxu0 %v10119_v62  ;;  %v11472_v46 = vand.u32 4294901760, %v10189_v25  ;;  %v3002_v4 = vsub.f32 %v10182_v11, %v10207_v56 }
 0x204   : > { %7717 = vmatprep.subr.mxu1 %v2961_v13  ;;  %7691 = vmatpush3.msra.mxu0 %v10119_v62 }
 0x205   : > { %7718 = vmatpush3.msra.mxu1 %v2961_v13  ;;  %7692 = vmatprep.subr.mxu0 %v10134_v52  ;;  %v10221_v13 = vsub.f32 %v2790_v60, %v10198_v15  ;;  %v2907_v60 = vsub.f32 %v10189_v25, %v11472_v46 }
 0x206   : > { %7719 = vmatprep.subr.mxu1 %v2968_v32  ;;  %7693 = vmatpush3.msra.mxu0 %v10134_v52 }
 0x207   : > { %7702 = vmatprep.mubr.f32.mxu0 %v2898_v41  ;;  %7720 = vmatpush3.msra.mxu1 %v2968_v32  ;;  %v2996_v32 = vand.u32 4294901760, %v2995_v34  ;;  %v3009_v41 = vsub.f32 %v10201_v27, %v10218_v9  ;;  %v10238_v29 = vand.u32 4294901760, %v10221_v13  ;;  %v3016_v34 = vsub.f32 %v10211_v0, %v10228_v49 }
 0x208   : > { %7694 = vmatprep.subr.mxu0 %v10147_v22  ;;  %7721 = vmatprep.subr.mxu1 %v2975_v28 }
 0x209   : > { %7695 = vmatpush3.msra.mxu0 %v10147_v22  ;;  %7722 = vmatpush3.msra.mxu1 %v2975_v28  ;;  %v3003_v28 = vand.u32 4294901760, %v3002_v4  ;;  %v3010_v46 = vand.u32 4294901760, %v3009_v41  ;;  %v3023_v7 = vsub.f32 %v10221_v13, %v10238_v29 }
 0x20a   : > { %7696 = vmatprep.subr.mxu0 %v10173_v23  ;;  %7723 = vmatprep.subr.mxu1 %v2982_v30 }
 0x20b   : > { %7697 = vmatpush3.msra.mxu0 %v10173_v23  ;;  %7724 = vmatpush3.msra.mxu1 %v2982_v30  ;;  %v2908_v30 = vand.u32 4294901760, %v2907_v60  ;;  %v3024_v4 = vand.u32 4294901760, %v3023_v7 }
 0x20c   : > { %7698 = vmatprep.subr.mxu0 %v10185_v47  ;;  %7725 = vmatprep.subr.mxu1 %v2989_v10 }
 0x20d   : > { %7699 = vmatpush3.msra.mxu0 %v10185_v47  ;;  %7726 = vmatpush3.msra.mxu1 %v2989_v10  ;;  %v3017_v10 = vand.u32 4294901760, %v3016_v34 }
 0x20e   : > { %7700 = vmatprep.subr.mxu0 %v10198_v15  ;;  %7727 = vmatprep.subr.mxu1 %v2996_v32 }
 0x20f   : > { %7701 = vmatpush3.msra.mxu0 %v10198_v15  ;;  %7728 = vmatpush3.msra.mxu1 %v2996_v32 }
 0x210   : > { %7703 = vmatmul.mubr.f32.vlgmr.msra.gmra.mxu0 %v2908_v30  ;;  %7729 = vmatprep.subr.mxu1 %v3003_v28  ;;  %v3503_v30 = vld [vmem:[#allocation13 + $0x30] sm:$0xff] }
 0x211   : > { %7740 = vmatprep.subr.mxu0 %v10006_v8  ;;  %7730 = vmatpush3.msra.mxu1 %v3003_v28 }
 0x212   : > { %7741 = vmatpush3.msra.mxu0 %v10006_v8  ;;  %7772 = vmatprep.mubr.f32.mxu0 %v10113_v61  ;;  %v11649_v8 = vand.u32 4294901760, %v10113_v61 }
 0x213   : > { %7731 = vmatprep.subr.mxu1 %v3010_v46  ;;  %7742 = vmatprep.subr.mxu0 %v10015_v55 }
 0x214   : > { %7732 = vmatpush3.msra.mxu1 %v3010_v46  ;;  %7743 = vmatpush3.msra.mxu0 %v10015_v55  ;;  %v11650_v55 = vand.u32 4294901760, %v10189_v25 }
 0x215   : > { %7733 = vmatprep.subr.mxu1 %v3017_v10  ;;  %7744 = vmatprep.subr.mxu0 %v10029_v16 }
 0x216   : > { %7734 = vmatpush3.msra.mxu1 %v3017_v10  ;;  %7745 = vmatpush3.msra.mxu0 %v10029_v16 }
 0x217   : > { %7735 = vmatprep.subr.mxu1 %v3024_v4  ;;  %7746 = vmatprep.subr.mxu0 %v10041_v17 }
 0x218   : > { %7736 = vmatpush3.msra.mxu1 %v3024_v4  ;;  %7747 = vmatpush3.msra.mxu0 %v10041_v17 }
 0x219   : > { %7738 = vmatmul.mubr.f32.vlgmr.msra.gmra.mxu1 %v10157_v5  ;;  %7748 = vmatprep.subr.mxu0 %v10056_v54 }
 0x21a   : > { %7775 = vmatprep.subr.mxu1 %v9987_v24  ;;  %7749 = vmatpush3.msra.mxu0 %v10056_v54 }
 0x21b   : > { %7776 = vmatpush3.msra.mxu1 %v9987_v24  ;;  %7807 = vmatprep.mubr.f32.mxu1 %v11649_v8 }
 0x21c   : > { %7750 = vmatprep.subr.mxu0 %v10070_v20  ;;  %7777 = vmatprep.subr.mxu1 %v9995_v42 }
 0x21d   : > { %7751 = vmatpush3.msra.mxu0 %v10070_v20  ;;  %7778 = vmatpush3.msra.mxu1 %v9995_v42 }
 0x21e   : > { %7752 = vmatprep.subr.mxu0 %v10093_v26  ;;  %7779 = vmatprep.subr.mxu1 %v10003_v58 }
 0x21f   : > { %7753 = vmatpush3.msra.mxu0 %v10093_v26  ;;  %7780 = vmatpush3.msra.mxu1 %v10003_v58 }
 0x220   : > { %7754 = vmatprep.subr.mxu0 %v10108_v63  ;;  %7781 = vmatprep.subr.mxu1 %v10012_v35 }
 0x221   : > { %7755 = vmatpush3.msra.mxu0 %v10108_v63  ;;  %7782 = vmatpush3.msra.mxu1 %v10012_v35  ;;  %v3508_v63 = vld [vmem:[#allocation13 + $0x58] sm:$0xff] }
 0x222   : > { %7756 = vmatprep.subr.mxu0 %v10125_v21  ;;  %7783 = vmatprep.subr.mxu1 %v10023_v51 }
 0x223   : > { %7757 = vmatpush3.msra.mxu0 %v10125_v21  ;;  %7784 = vmatpush3.msra.mxu1 %v10023_v51 }
 0x224   : > { %7758 = vmatprep.subr.mxu0 %v10140_v40  ;;  %7785 = vmatprep.subr.mxu1 %v10035_v44 }
 0x225   : > { %7759 = vmatpush3.msra.mxu0 %v10140_v40  ;;  %7786 = vmatpush3.msra.mxu1 %v10035_v44  ;;  %v3507_v40 = vld [vmem:[#allocation13 + $0x50] sm:$0xff] }
 0x226   : > { %7760 = vmatprep.subr.mxu0 %v10153_v14  ;;  %7787 = vmatprep.subr.mxu1 %v10060_v38 }
 0x227   : > { %7761 = vmatpush3.msra.mxu0 %v10153_v14  ;;  %7788 = vmatpush3.msra.mxu1 %v10060_v38 }
 0x228   : > { %7762 = vmatprep.subr.mxu0 %v10166_v45  ;;  %7789 = vmatprep.subr.mxu1 %v10075_v18 }
 0x229   : > { %7763 = vmatpush3.msra.mxu0 %v10166_v45  ;;  %7790 = vmatpush3.msra.mxu1 %v10075_v18 }
 0x22a   : > { %7764 = vmatprep.subr.mxu0 %v10182_v11  ;;  %7791 = vmatprep.subr.mxu1 %v10090_v39 }
 0x22b   : > { %7765 = vmatpush3.msra.mxu0 %v10182_v11  ;;  %7792 = vmatpush3.msra.mxu1 %v10090_v39  ;;  %v3506_v11 = vld [vmem:[#allocation13 + $0x48] sm:$0xff] }
 0x22c   : > { %7766 = vmatprep.subr.mxu0 %v10201_v27  ;;  %7793 = vmatprep.subr.mxu1 %v10105_v48 }
 0x22d   : > { %7767 = vmatpush3.msra.mxu0 %v10201_v27  ;;  %7794 = vmatpush3.msra.mxu1 %v10105_v48 }
 0x22e   : > { %7768 = vmatprep.subr.mxu0 %v10211_v0  ;;  %7795 = vmatprep.subr.mxu1 %v10119_v62 }
 0x22f   : > { %7769 = vmatpush3.msra.mxu0 %v10211_v0  ;;  %7796 = vmatpush3.msra.mxu1 %v10119_v62  ;;  %v3505_v0 = vld [vmem:[#allocation13 + $0x40] sm:$0xff] }
 0x230   : > { %7770 = vmatprep.subr.mxu0 %v10221_v13  ;;  %7797 = vmatprep.subr.mxu1 %v10134_v52  ;;  %v10454_v41 = vand.u32 4294901760, %v3505_v0 }
 0x231   : > { %7771 = vmatpush3.msra.mxu0 %v10221_v13  ;;  %7798 = vmatpush3.msra.mxu1 %v10134_v52 }
 0x232   : > { %7773 = vmatmul.mubr.f32.vlgmr.msra.gmra.mxu0 %v10189_v25  ;;  %7799 = vmatprep.subr.mxu1 %v10147_v22 }
 0x233   : > { %7810 = vmatprep.subr.mxu0 %v10026_v59  ;;  %7800 = vmatpush3.msra.mxu1 %v10147_v22 }
 0x234   : > { %7811 = vmatpush3.msra.mxu0 %v10026_v59  ;;  %7842 = vmatprep.mubr.f32.mxu0 %v10080_v53  ;;  %v10337_v59 = vpop.f32.mrf.mxu0 }
 0x235   : > { %7801 = vmatprep.subr.mxu1 %v10173_v23  ;;  %7812 = vmatprep.subr.mxu0 %v10038_v2 }
 0x236   : > { %7802 = vmatpush3.msra.mxu1 %v10173_v23  ;;  %7813 = vmatpush3.msra.mxu0 %v10038_v2 }
 0x237   : > { %7803 = vmatprep.subr.mxu1 %v10185_v47  ;;  %7814 = vmatprep.subr.mxu0 %v10053_v3 }
 0x238   : > { %7804 = vmatpush3.msra.mxu1 %v10185_v47  ;;  %7815 = vmatpush3.msra.mxu0 %v10053_v3 }
 0x239   : > { %7805 = vmatprep.subr.mxu1 %v10198_v15  ;;  %7816 = vmatprep.subr.mxu0 %v10067_v37 }
 0x23a   : > { %7806 = vmatpush3.msra.mxu1 %v10198_v15  ;;  %7817 = vmatpush3.msra.mxu0 %v10067_v37 }
 0x23b   : > { %7808 = vmatmul.mubr.f32.vlgmr.msra.gmra.mxu1 %v11650_v55  ;;  %7818 = vmatprep.subr.mxu0 %v10085_v1 }
 0x23c   : > { %7845 = vmatprep.subr.mxu1 %v9987_v24  ;;  %7819 = vmatpush3.msra.mxu0 %v10085_v1 }
 0x23d   : > { %7846 = vmatpush3.msra.mxu1 %v9987_v24  ;;  %7877 = vmatprep.mubr.f32.mxu1 %v10080_v53  ;;  %v1486_v24 = vpop.f32.mrf.mxu0  ;;  %v3509_v53 = vld [vmem:[#allocation13 + $0x60] sm:$0xff] }
 0x23e   : > { %7820 = vmatprep.subr.mxu0 %v10100_v12  ;;  %7847 = vmatprep.subr.mxu1 %v9995_v42 }
 0x23f   : > { %7821 = vmatpush3.msra.mxu0 %v10100_v12  ;;  %7848 = vmatpush3.msra.mxu1 %v9995_v42  ;;  %v10347_v42 = vpop.f32.mrf.mxu1  ;;  %v10356_v16 = vpop.f32.mrf.mxu0 }
 0x240   : > { %7822 = vmatprep.subr.mxu0 %v10122_v19  ;;  %7849 = vmatprep.subr.mxu1 %v10003_v58 }
 0x241   : > { %7823 = vmatpush3.msra.mxu0 %v10122_v19  ;;  %7850 = vmatpush3.msra.mxu1 %v10003_v58  ;;  %v6434_v58 = vld [vmem:[%s11444_s5] ss:$0 sm:$0xff]  ;;  %v1647_v2 = vpop.f32.mrf.mxu1  ;;  %v1757_v54 = vpop.f32.mrf.mxu0  ;;  %v10391_v19 = vand.u32 4294901760, %v3509_v53 }
 0x242   : > { %7824 = vmatprep.subr.mxu0 %v10137_v57  ;;  %7851 = vmatprep.subr.mxu1 %v10012_v35  ;;  %v1487_v17 = vadd.f32 %v6434_v58, %v1486_v24  ;;  %v3502_v24 = vld [vmem:[#allocation13 + $0x28] sm:$0xff] }
 0x243   : > { %7825 = vmatpush3.msra.mxu0 %v10137_v57  ;;  %7852 = vmatpush3.msra.mxu1 %v10012_v35  ;;  %v3512_v35 = vld [vmem:[#allocation13 + $0x78] sm:$0xff]  ;;  %v10368_v37 = vpop.f32.mrf.mxu1  ;;  %v10420_v25 = vsub.f32 %v3509_v53, %v10391_v19 }
 0x244   : > { %7826 = vmatprep.subr.mxu0 %v10150_v33  ;;  %7853 = vmatprep.subr.mxu1 %v10023_v51  ;;  %v10366_v3 = vand.u32 4294901760, %v3512_v35  ;;  %v1648_v1 = vadd.f32 %v1647_v2, %v1487_v17 }
 0x245   : > { %7827 = vmatpush3.msra.mxu0 %v10150_v33  ;;  %7854 = vmatpush3.msra.mxu1 %v10023_v51  ;;  %v3511_v51 = vld [vmem:[#allocation13 + $0x70] sm:$0xff]  ;;  %v10402_v33 = vand.u32 4294901760, %v3508_v63  ;;  %v10446_v13 = vand.u32 4294901760, %v10420_v25 }
 0x246   : > { %7828 = vmatprep.subr.mxu0 %v10163_v36  ;;  %7855 = vmatprep.subr.mxu1 %v10035_v44  ;;  %v10374_v20 = vand.u32 4294901760, %v3511_v51  ;;  %v10385_v12 = vsub.f32 %v3512_v35, %v10366_v3  ;;  %v1758_v61 = vadd.f32 %v1757_v54, %v1648_v1  ;;  %v3500_v1 = vld [vmem:[#allocation13 + $0x18] sm:$0xff] }
 0x247   : > { %7829 = vmatpush3.msra.mxu0 %v10163_v36  ;;  %7856 = vmatpush3.msra.mxu1 %v10035_v44  ;;  %v3510_v44 = vld [vmem:[#allocation13 + $0x68] sm:$0xff]  ;;  %v10435_v46 = vsub.f32 %v3508_v63, %v10402_v33  ;;  %v3646_v55 = vsub.f32 %v10420_v25, %v10446_v13 }
 0x248   : > { %7830 = vmatprep.subr.mxu0 %v10179_v31  ;;  %7857 = vmatprep.subr.mxu1 %v10060_v38  ;;  %v10382_v26 = vand.u32 4294901760, %v3510_v44 }
 0x249   : > { %7831 = vmatpush3.msra.mxu0 %v10179_v31  ;;  %7858 = vmatpush3.msra.mxu1 %v10060_v38  ;;  %v10378_v38 = vpop.f32.mrf.mxu0  ;;  %v10414_v31 = vand.u32 4294901760, %v3507_v40  ;;  %v10464_v34 = vand.u32 4294901760, %v10435_v46 }
 0x24a   : > { %7832 = vmatprep.subr.mxu0 %v10195_v50  ;;  %7859 = vmatprep.subr.mxu1 %v10075_v18  ;;  %v10408_v14 = vsub.f32 %v3510_v44, %v10382_v26  ;;  %v3647_v44 = vand.u32 4294901760, %v3646_v55  ;;  %v3497_v55 = vld [vmem:[#allocation13] sm:$0xff] }
 0x24b   : > { %7833 = vmatpush3.msra.mxu0 %v10195_v50  ;;  %7860 = vmatpush3.msra.mxu1 %v10075_v18  ;;  %v1853_v18 = vpop.f32.mrf.mxu1  ;;  %v1980_v21 = vpop.f32.mrf.mxu0  ;;  %v1497_v50 = vadd.f32 %v10337_v59, %v6434_v58  ;;  %v10449_v32 = vsub.f32 %v3507_v40, %v10414_v31  ;;  %v10484_v58 = vand.u32 4294901760, %v3503_v30  ;;  %v3653_v2 = vsub.f32 %v10435_v46, %v10464_v34 }
 0x24c   : > { %7834 = vmatprep.subr.mxu0 %v10207_v56  ;;  %7861 = vmatprep.subr.mxu1 %v10090_v39  ;;  %v1854_v7 = vadd.f32 %v1853_v18, %v1758_v61 }
 0x24d   : > { %7835 = vmatpush3.msra.mxu0 %v10207_v56  ;;  %7862 = vmatpush3.msra.mxu1 %v10090_v39  ;;  %v10394_v39 = vsub.f32 %v3511_v51, %v10374_v20  ;;  %v10432_v56 = vand.u32 4294901760, %v10408_v14  ;;  %v1654_v60 = vadd.f32 %v10347_v42, %v1497_v50  ;;  %v10479_v59 = vand.u32 4294901760, %v10449_v32  ;;  %v3501_v51 = vld [vmem:[#allocation13 + $0x20] sm:$0xff] }
 0x24e   : > { %7836 = vmatprep.subr.mxu0 %v10218_v9  ;;  %7863 = vmatprep.subr.mxu1 %v10105_v48  ;;  %v1981_v45 = vadd.f32 %v1980_v21, %v1854_v7  ;;  %v10513_v18 = vand.u32 4294901760, %v3501_v51  ;;  %v10519_v61 = vsub.f32 %v3503_v30, %v10484_v58  ;;  %v3654_v21 = vand.u32 4294901760, %v3653_v2 }
 0x24f   : > { %7837 = vmatpush3.msra.mxu0 %v10218_v9  ;;  %7864 = vmatpush3.msra.mxu1 %v10105_v48  ;;  %v10405_v48 = vand.u32 4294901760, %v10385_v12  ;;  %v10439_v9 = vand.u32 4294901760, %v3506_v11  ;;  %v3639_v28 = vsub.f32 %v10408_v14, %v10432_v56  ;;  %v1765_v10 = vadd.f32 %v10356_v16, %v1654_v60 }
 0x250   : > { %7838 = vmatprep.subr.mxu0 %v10228_v49  ;;  %7865 = vmatprep.subr.mxu1 %v10119_v62  ;;  %v10398_v57 = vpop.f32.mrf.mxu1  ;;  %v10487_v16 = vsub.f32 %v3505_v0, %v10454_v41  ;;  %v3660_v53 = vsub.f32 %v10449_v32, %v10479_v59  ;;  %v10526_v7 = vand.u32 4294901760, %v3500_v1  ;;  %v10545_v60 = vsub.f32 %v3501_v51, %v10513_v18 }
 0x251   : > { %7839 = vmatpush3.msra.mxu0 %v10228_v49  ;;  %7866 = vmatpush3.msra.mxu1 %v10119_v62  ;;  %v10417_v62 = vand.u32 4294901760, %v10394_v39  ;;  %v3504_v49 = vld [vmem:[#allocation13 + $0x38] sm:$0xff]  ;;  %v1862_v42 = vadd.f32 %v10368_v37, %v1765_v10  ;;  %v3640_v35 = vand.u32 4294901760, %v3639_v28 }
 0x252   : > { %7840 = vmatprep.subr.mxu0 %v10238_v29  ;;  %7867 = vmatprep.subr.mxu1 %v10134_v52  ;;  %v2073_v36 = vpop.f32.mrf.mxu1  ;;  %v10469_v4 = vand.u32 4294901760, %v3504_v49  ;;  %v10516_v63 = vand.u32 4294901760, %v10487_v16  ;;  %v3661_v50 = vand.u32 4294901760, %v3660_v53  ;;  %v10577_v53 = vand.u32 4294901760, %v3497_v55 }
 0x253   : > { %7841 = vmatpush3.msra.mxu0 %v10238_v29  ;;  %7868 = vmatpush3.msra.mxu1 %v10134_v52  ;;  %v3625_v52 = vsub.f32 %v10385_v12, %v10405_v48  ;;  %v10429_v27 = vadd.f32 %v2073_v36, %v1981_v45  ;;  %v1987_v17 = vadd.f32 %v10378_v38, %v1862_v42  ;;  %v3499_v45 = vld [vmem:[#allocation13 + $0x10] sm:$0xff] }
 0x254   : > { %7843 = vmatmul.mubr.f32.vlgmr.msra.gmra.mxu0 %v10157_v5  ;;  %7869 = vmatprep.subr.mxu1 %v10147_v22  ;;  %v10504_v37 = vsub.f32 %v3504_v49, %v10469_v4  ;;  %v3674_v0 = vsub.f32 %v10487_v16, %v10516_v63  ;;  %v3498_v49 = vld [vmem:[#allocation13 + $0x8] sm:$0xff]  ;;  %v10552_v28 = vand.u32 4294901760, %v3499_v45 }
 0x255   : > { %7880 = vmatprep.subr.mxu0 %v10366_v3  ;;  %7870 = vmatpush3.msra.mxu1 %v10147_v22  ;;  %11651 = vst [vmem:[#allocation30_spill] sm:$0xff] %v10429_v27  ;;  %v3632_v22 = vsub.f32 %v10394_v39, %v10417_v62  ;;  %v10459_v29 = vand.u32 4294901760, %v10429_v27  ;;  %v10510_v38 = vadd.f32 %v10398_v57, %v1987_v17  ;;  %v10564_v42 = vand.u32 4294901760, %v3498_v49 }
 0x256   : > { %7881 = vmatpush3.msra.mxu0 %v10366_v3  ;;  %7871 = vmatprep.subr.mxu1 %v10173_v23  ;;  %v10529_v36 = vand.u32 4294901760, %v10504_v37  ;;  %v3675_v2 = vand.u32 4294901760, %v3674_v0  ;;  %v10574_v17 = vand.u32 4294901760, %v10545_v60 }
 0x257   : > { %7882 = vmatprep.subr.mxu0 %v10374_v20  ;;  %7872 = vmatpush3.msra.mxu1 %v10173_v23  ;;  %v3626_v23 = vand.u32 4294901760, %v3625_v52  ;;  %v3633_v8 = vand.u32 4294901760, %v3632_v22  ;;  %11652 = vst [vmem:[#allocation31_spill] sm:$0xff] %v10510_v38  ;;  %v10536_v52 = vand.u32 4294901760, %v10510_v38  ;;  %v10542_v22 = vand.u32 4294901760, %v10519_v61 }
 0x258   : > { %7883 = vmatpush3.msra.mxu0 %v10374_v20  ;;  %7873 = vmatprep.subr.mxu1 %v10185_v47  ;;  %v3681_v10 = vsub.f32 %v10504_v37, %v10529_v36  ;;  %11653 = vst [vmem:[#allocation32_spill] sm:$0xff] %v10574_v17 }
 0x259   : > { %7884 = vmatprep.subr.mxu0 %v10382_v26  ;;  %7874 = vmatpush3.msra.mxu1 %v10185_v47  ;;  %v10472_v47 = vsub.f32 %v3506_v11, %v10439_v9  ;;  %v3688_v51 = vsub.f32 %v10519_v61, %v10542_v22 }
 0x25a   : > { %7885 = vmatpush3.msra.mxu0 %v10382_v26  ;;  %7875 = vmatprep.subr.mxu1 %v10198_v15 }
 0x25b   : > { %7886 = vmatprep.subr.mxu0 %v10391_v19  ;;  %7876 = vmatpush3.msra.mxu1 %v10198_v15  ;;  %v10492_v15 = vsub.f32 %v10429_v27, %v10459_v29  ;;  %v10501_v54 = vand.u32 4294901760, %v10472_v47 }
 0x25c   : > { %7887 = vmatpush3.msra.mxu0 %v10391_v19  ;;  %7878 = vmatmul.mubr.f32.vlgmr.msra.gmra.mxu1 %v10157_v5  ;;  %v10498_v5 = vand.u32 4294901760, %v3502_v24 }
 0x25d   : > { %7888 = vmatprep.subr.mxu0 %v10402_v33  ;;  %7915 = vmatprep.subr.mxu1 %v3626_v23  ;;  %v11474_v40 = vand.u32 4294901760, %v10492_v15  ;;  %v3667_v57 = vsub.f32 %v10472_v47, %v10501_v54 }
 0x25e   : > { %7889 = vmatpush3.msra.mxu0 %v10402_v33  ;;  %7916 = vmatpush3.msra.mxu1 %v3626_v23  ;;  %v10532_v11 = vsub.f32 %v3502_v24, %v10498_v5  ;;  %v10561_v24 = vsub.f32 %v3500_v1, %v10526_v7  ;;  %v10580_v1 = vsub.f32 %v3499_v45, %v10552_v28 }
 0x25f   : > { %7890 = vmatprep.subr.mxu0 %v10414_v31  ;;  %7917 = vmatprep.subr.mxu1 %v3633_v8  ;;  %v3604_v23 = vsub.f32 %v10492_v15, %v11474_v40  ;;  %v3668_v30 = vand.u32 4294901760, %v3667_v57 }
 0x260   : > { %7891 = vmatpush3.msra.mxu0 %v10414_v31  ;;  %7918 = vmatpush3.msra.mxu1 %v3633_v8  ;;  %v10558_v8 = vand.u32 4294901760, %v10532_v11  ;;  %v10586_v0 = vand.u32 4294901760, %v10561_v24 }
 0x261   : > { %7892 = vmatprep.subr.mxu0 %v10439_v9  ;;  %7919 = vmatprep.subr.mxu1 %v3640_v35 }
 0x262   : > { %7893 = vmatpush3.msra.mxu0 %v10439_v9  ;;  %7920 = vmatpush3.msra.mxu1 %v3640_v35  ;;  %v10568_v35 = vsub.f32 %v10510_v38, %v10536_v52  ;;  %v3695_v57 = vsub.f32 %v10532_v11, %v10558_v8  ;;  %11654 = vst [vmem:[#allocation33_spill] sm:$0xff] %v10586_v0  ;;  %v6435_v38 = vld [vmem:[%s11446_s7] ss:$0 sm:$0xff] }
 0x263   : > { %7894 = vmatprep.subr.mxu0 %v10454_v41  ;;  %7921 = vmatprep.subr.mxu1 %v3647_v44 }
 0x264   : > { %7895 = vmatpush3.msra.mxu0 %v10454_v41  ;;  %7922 = vmatpush3.msra.mxu1 %v3647_v44  ;;  %v3605_v44 = vand.u32 4294901760, %v3604_v23  ;;  %v3689_v23 = vand.u32 4294901760, %v3688_v51  ;;  %v3696_v45 = vand.u32 4294901760, %v3695_v57  ;;  %v3709_v51 = vsub.f32 %v10561_v24, %v10586_v0 }
 0x265   : > { %7947 = vmatprep.mubr.f32.mxu1 %v10459_v29  ;;  %7896 = vmatprep.subr.mxu0 %v10469_v4  ;;  %v11656_v27 = vand.u32 4294901760, %v10568_v35 }
 0x266   : > { %7923 = vmatprep.subr.mxu1 %v3654_v21  ;;  %7897 = vmatpush3.msra.mxu0 %v10469_v4 }
 0x267   : > { %7924 = vmatpush3.msra.mxu1 %v3654_v21  ;;  %7898 = vmatprep.subr.mxu0 %v10484_v58  ;;  %v3682_v21 = vand.u32 4294901760, %v3681_v10  ;;  %v3702_v10 = vsub.f32 %v10545_v60, %v10574_v17  ;;  %v3614_v6 = vsub.f32 %v10568_v35, %v11656_v27 }
 0x268   : > { %7925 = vmatprep.subr.mxu1 %v3661_v50  ;;  %7899 = vmatpush3.msra.mxu0 %v10484_v58 }
 0x269   : > { %7926 = vmatpush3.msra.mxu1 %v3661_v50  ;;  %7900 = vmatprep.subr.mxu0 %v10498_v5  ;;  %v10590_v50 = vsub.f32 %v3498_v49, %v10564_v42  ;;  %v10603_v49 = vsub.f32 %v3497_v55, %v10577_v53  ;;  %v3703_v55 = vand.u32 4294901760, %v3702_v10 }
 0x26a   : > { %7927 = vmatprep.subr.mxu1 %v3668_v30  ;;  %7901 = vmatpush3.msra.mxu0 %v10498_v5  ;;  %v7494_v40 = vpop.f32.mrf.mxu0 }
 0x26b   : > { %7928 = vmatpush3.msra.mxu1 %v3668_v30  ;;  %7902 = vmatprep.subr.mxu0 %v10513_v18  ;;  %v10600_v30 = vand.u32 4294901760, %v10580_v1 }
 0x26c   : > { %7929 = vmatprep.subr.mxu1 %v3675_v2  ;;  %7903 = vmatpush3.msra.mxu0 %v10513_v18  ;;  %v2193_v43 = vpop.f32.mrf.mxu0 }
 0x26d   : > { %7912 = vmatprep.mubr.f32.mxu0 %v3605_v44  ;;  %7930 = vmatpush3.msra.mxu1 %v3675_v2  ;;  %11655 = vst [vmem:[#allocation34_spill] sm:$0xff] %v10600_v30  ;;  %v10610_v44 = vand.u32 4294901760, %v10590_v50  ;;  %v2204_v2 = vadd.f32 %v7494_v40, %v6435_v38  ;;  %v3716_v57 = vsub.f32 %v10580_v1, %v10600_v30  ;;  %v3710_v40 = vand.u32 4294901760, %v3709_v51 }
 0x26e   : > { %7904 = vmatprep.subr.mxu0 %v10526_v7  ;;  %7931 = vmatprep.subr.mxu1 %v3682_v21  ;;  %v2194_v0 = vadd.f32 %v6435_v38, %v2193_v43 }
 0x26f   : > { %7905 = vmatpush3.msra.mxu0 %v10526_v7  ;;  %7932 = vmatpush3.msra.mxu1 %v3682_v21  ;;  %v10620_v21 = vand.u32 4294901760, %v10603_v49  ;;  %v3723_v27 = vsub.f32 %v10590_v50, %v10610_v44  ;;  %v3717_v43 = vand.u32 4294901760, %v3716_v57 }
 0x270   : > { %7906 = vmatprep.subr.mxu0 %v10552_v28  ;;  %7933 = vmatprep.subr.mxu1 %v3689_v23 }
 0x271   : > { %7907 = vmatpush3.msra.mxu0 %v10552_v28  ;;  %7934 = vmatpush3.msra.mxu1 %v3689_v23  ;;  %v3615_v23 = vand.u32 4294901760, %v3614_v6  ;;  %v3730_v38 = vsub.f32 %v10603_v49, %v10620_v21 }
 0x272   : > { %7908 = vmatprep.subr.mxu0 %v10564_v42  ;;  %7935 = vmatprep.subr.mxu1 %v3696_v45  ;;  %v7529_v17 = vpop.f32.mrf.mxu1 }
 0x273   : > { %7909 = vmatpush3.msra.mxu0 %v10564_v42  ;;  %7936 = vmatpush3.msra.mxu1 %v3696_v45  ;;  %v2361_v10 = vadd.f32 %v7529_v17, %v2204_v2  ;;  %v3724_v45 = vand.u32 4294901760, %v3723_v27  ;;  %v3731_v6 = vand.u32 4294901760, %v3730_v38  ;;  %v4227_v38 = vld [vmem:[#allocation14 + $0xa8] sm:$0xff] }
 0x274   : > { %7910 = vmatprep.subr.mxu0 %v10577_v53  ;;  %7937 = vmatprep.subr.mxu1 %v3703_v55  ;;  %v2354_v30 = vpop.f32.mrf.mxu1 }
 0x275   : > { %7911 = vmatpush3.msra.mxu0 %v10577_v53  ;;  %7938 = vmatpush3.msra.mxu1 %v3703_v55  ;;  %v2355_v51 = vadd.f32 %v2354_v30, %v2194_v0 }
 0x276   : > { %7913 = vmatmul.mubr.f32.vlgmr.msra.gmra.mxu0 %v3615_v23  ;;  %7939 = vmatprep.subr.mxu1 %v3710_v40 }
 0x277   : > { %7950 = vmatprep.subr.mxu0 %v10385_v12  ;;  %7940 = vmatpush3.msra.mxu1 %v3710_v40  ;;  %v4228_v40 = vld [vmem:[#allocation14 + $0xb0] sm:$0xff] }
 0x278   : > { %7951 = vmatpush3.msra.mxu0 %v10385_v12  ;;  %7982 = vmatprep.mubr.f32.mxu0 %v10492_v15  ;;  %v11657_v12 = vand.u32 4294901760, %v10492_v15 }
 0x279   : > { %7941 = vmatprep.subr.mxu1 %v3717_v43  ;;  %7952 = vmatprep.subr.mxu0 %v10394_v39 }
 0x27a   : > { %7942 = vmatpush3.msra.mxu1 %v3717_v43  ;;  %7953 = vmatpush3.msra.mxu0 %v10394_v39 }
 0x27b   : > { %7943 = vmatprep.subr.mxu1 %v3724_v45  ;;  %7954 = vmatprep.subr.mxu0 %v10408_v14 }
 0x27c   : > { %7944 = vmatpush3.msra.mxu1 %v3724_v45  ;;  %7955 = vmatpush3.msra.mxu0 %v10408_v14 }
 0x27d   : > { %7945 = vmatprep.subr.mxu1 %v3731_v6  ;;  %7956 = vmatprep.subr.mxu0 %v10420_v25 }
 0x27e   : > { %7946 = vmatpush3.msra.mxu1 %v3731_v6  ;;  %7957 = vmatpush3.msra.mxu0 %v10420_v25 }
 0x27f   : > { %7948 = vmatmul.mubr.f32.vlgmr.msra.gmra.mxu1 %v10536_v52  ;;  %7958 = vmatprep.subr.mxu0 %v10435_v46 }
 0x280   : > { %7985 = vmatprep.subr.mxu1 %v10366_v3  ;;  %7959 = vmatpush3.msra.mxu0 %v10435_v46 }
 0x281   : > { %7986 = vmatpush3.msra.mxu1 %v10366_v3  ;;  %8017 = vmatprep.mubr.f32.mxu1 %v11657_v12 }
 0x282   : > { %7960 = vmatprep.subr.mxu0 %v10449_v32  ;;  %7987 = vmatprep.subr.mxu1 %v10374_v20 }
 0x283   : > { %7961 = vmatpush3.msra.mxu0 %v10449_v32  ;;  %7988 = vmatpush3.msra.mxu1 %v10374_v20 }
 0x284   : > { %7962 = vmatprep.subr.mxu0 %v10472_v47  ;;  %7989 = vmatprep.subr.mxu1 %v10382_v26 }
 0x285   : > { %7963 = vmatpush3.msra.mxu0 %v10472_v47  ;;  %7990 = vmatpush3.msra.mxu1 %v10382_v26 }
 0x286   : > { %7964 = vmatprep.subr.mxu0 %v10487_v16  ;;  %7991 = vmatprep.subr.mxu1 %v10391_v19 }
 0x287   : > { %7965 = vmatpush3.msra.mxu0 %v10487_v16  ;;  %7992 = vmatpush3.msra.mxu1 %v10391_v19 }
 0x288   : > { %7966 = vmatprep.subr.mxu0 %v10504_v37  ;;  %7993 = vmatprep.subr.mxu1 %v10402_v33 }
 0x289   : > { %7967 = vmatpush3.msra.mxu0 %v10504_v37  ;;  %7994 = vmatpush3.msra.mxu1 %v10402_v33  ;;  %v4234_v37 = vld [vmem:[#allocation14 + $0xe0] sm:$0xff] }
 0x28a   : > { %7968 = vmatprep.subr.mxu0 %v10519_v61  ;;  %7995 = vmatprep.subr.mxu1 %v10414_v31 }
 0x28b   : > { %7969 = vmatpush3.msra.mxu0 %v10519_v61  ;;  %7996 = vmatpush3.msra.mxu1 %v10414_v31  ;;  %v7564_v39 = vpop.f32.mrf.mxu0  ;;  %v4233_v61 = vld [vmem:[#allocation14 + $0xd8] sm:$0xff] }
 0x28c   : > { %7970 = vmatprep.subr.mxu0 %v10532_v11  ;;  %7997 = vmatprep.subr.mxu1 %v10439_v9  ;;  %v2472_v14 = vadd.f32 %v7564_v39, %v2361_v10  ;;  %v4226_v39 = vld [vmem:[#allocation14 + $0xa0] sm:$0xff] }
 0x28d   : > { %7971 = vmatpush3.msra.mxu0 %v10532_v11  ;;  %7998 = vmatpush3.msra.mxu1 %v10439_v9  ;;  %v2464_v25 = vpop.f32.mrf.mxu0  ;;  %v10793_v11 = vand.u32 4294901760, %v4233_v61 }
 0x28e   : > { %7972 = vmatprep.subr.mxu0 %v10545_v60  ;;  %7999 = vmatprep.subr.mxu1 %v10454_v41  ;;  %v2465_v46 = vadd.f32 %v2464_v25, %v2355_v51 }
 0x28f   : > { %7973 = vmatpush3.msra.mxu0 %v10545_v60  ;;  %8000 = vmatpush3.msra.mxu1 %v10454_v41  ;;  %v4230_v60 = vld [vmem:[#allocation14 + $0xc0] sm:$0xff] }
 0x290   : > { %7974 = vmatprep.subr.mxu0 %v10561_v24  ;;  %8001 = vmatprep.subr.mxu1 %v10469_v4 }
 0x291   : > { %7975 = vmatpush3.msra.mxu0 %v10561_v24  ;;  %8002 = vmatpush3.msra.mxu1 %v10469_v4 }
 0x292   : > { %7976 = vmatprep.subr.mxu0 %v10580_v1  ;;  %8003 = vmatprep.subr.mxu1 %v10484_v58 }
 0x293   : > { %7977 = vmatpush3.msra.mxu0 %v10580_v1  ;;  %8004 = vmatpush3.msra.mxu1 %v10484_v58  ;;  %v10812_v1 = vand.u32 4294901760, %v4230_v60 }
 0x294   : > { %7978 = vmatprep.subr.mxu0 %v10590_v50  ;;  %8005 = vmatprep.subr.mxu1 %v10498_v5  ;;  %v7599_v32 = vpop.f32.mrf.mxu1 }
 0x295   : > { %7979 = vmatpush3.msra.mxu0 %v10590_v50  ;;  %8006 = vmatpush3.msra.mxu1 %v10498_v5  ;;  %v2569_v47 = vadd.f32 %v7599_v32, %v2472_v14  ;;  %v10852_v32 = vand.u32 4294901760, %v4228_v40 }
 0x296   : > { %7980 = vmatprep.subr.mxu0 %v10603_v49  ;;  %8007 = vmatprep.subr.mxu1 %v10513_v18  ;;  %v2560_v16 = vpop.f32.mrf.mxu1 }
 0x297   : > { %7981 = vmatpush3.msra.mxu0 %v10603_v49  ;;  %8008 = vmatpush3.msra.mxu1 %v10513_v18  ;;  %v2561_v15 = vadd.f32 %v2560_v16, %v2465_v46 }
 0x298   : > { %7983 = vmatmul.mubr.f32.vlgmr.msra.gmra.mxu0 %v10568_v35  ;;  %8009 = vmatprep.subr.mxu1 %v10526_v7 }
 0x299   : > { %8020 = vmatprep.subr.mxu0 %v10405_v48  ;;  %8010 = vmatpush3.msra.mxu1 %v10526_v7 }
 0x29a   : > { %8021 = vmatpush3.msra.mxu0 %v10405_v48  ;;  %8052 = vmatprep.mubr.f32.mxu0 %v10459_v29  ;;  %v11658_v48 = vand.u32 4294901760, %v10568_v35 }
 0x29b   : > { %8011 = vmatprep.subr.mxu1 %v10552_v28  ;;  %8022 = vmatprep.subr.mxu0 %v10417_v62 }
 0x29c   : > { %8012 = vmatpush3.msra.mxu1 %v10552_v28  ;;  %8023 = vmatpush3.msra.mxu0 %v10417_v62  ;;  %v11661_v62 = vld [vmem:[#allocation34_spill] sm:$0xff] }
 0x29d   : > { %8013 = vmatprep.subr.mxu1 %v10564_v42  ;;  %8024 = vmatprep.subr.mxu0 %v10432_v56 }
 0x29e   : > { %8014 = vmatpush3.msra.mxu1 %v10564_v42  ;;  %8025 = vmatpush3.msra.mxu0 %v10432_v56 }
 0x29f   : > { %8015 = vmatprep.subr.mxu1 %v10577_v53  ;;  %8026 = vmatprep.subr.mxu0 %v10446_v13 }
 0x2a0   : > { %8016 = vmatpush3.msra.mxu1 %v10577_v53  ;;  %8027 = vmatpush3.msra.mxu0 %v10446_v13 }
 0x2a1   : > { %8018 = vmatmul.mubr.f32.vlgmr.msra.gmra.mxu1 %v11658_v48  ;;  %8028 = vmatprep.subr.mxu0 %v10464_v34 }
 0x2a2   : > { %8055 = vmatprep.subr.mxu1 %v10366_v3  ;;  %8029 = vmatpush3.msra.mxu0 %v10464_v34 }
 0x2a3   : > { %8056 = vmatpush3.msra.mxu1 %v10366_v3  ;;  %8087 = vmatprep.mubr.f32.mxu1 %v10459_v29  ;;  %v4237_v29 = vld [vmem:[#allocation14 + $0xf8] sm:$0xff] }
 0x2a4   : > { %8030 = vmatprep.subr.mxu0 %v10479_v59  ;;  %8057 = vmatprep.subr.mxu1 %v10374_v20  ;;  %v10773_v34 = vand.u32 4294901760, %v4237_v29 }
 0x2a5   : > { %8031 = vmatpush3.msra.mxu0 %v10479_v59  ;;  %8058 = vmatpush3.msra.mxu1 %v10374_v20 }
 0x2a6   : > { %8032 = vmatprep.subr.mxu0 %v10501_v54  ;;  %8059 = vmatprep.subr.mxu1 %v10382_v26  ;;  %11664 = vst [vmem:[#allocation34_spill] sm:$0xff] %v10773_v34 }
 0x2a7   : > { %8033 = vmatpush3.msra.mxu0 %v10501_v54  ;;  %8060 = vmatpush3.msra.mxu1 %v10382_v26 }
 0x2a8   : > { %8034 = vmatprep.subr.mxu0 %v10516_v63  ;;  %8061 = vmatprep.subr.mxu1 %v10391_v19 }
 0x2a9   : > { %8035 = vmatpush3.msra.mxu0 %v10516_v63  ;;  %8062 = vmatpush3.msra.mxu1 %v10391_v19  ;;  %v11659_v19 = vld [vmem:[#allocation32_spill] sm:$0xff]  ;;  %v10786_v63 = vand.u32 4294901760, %v4234_v37 }
 0x2aa   : > { %8036 = vmatprep.subr.mxu0 %v10529_v36  ;;  %8063 = vmatprep.subr.mxu1 %v10402_v33 }
 0x2ab   : > { %8037 = vmatpush3.msra.mxu0 %v10529_v36  ;;  %8064 = vmatpush3.msra.mxu1 %v10402_v33 }
 0x2ac   : > { %8038 = vmatprep.subr.mxu0 %v10542_v22  ;;  %8065 = vmatprep.subr.mxu1 %v10414_v31 }
 0x2ad   : > { %8039 = vmatpush3.msra.mxu0 %v10542_v22  ;;  %8066 = vmatpush3.msra.mxu1 %v10414_v31  ;;  %v7634_v3 = vpop.f32.mrf.mxu0  ;;  %v11660_v31 = vld [vmem:[#allocation33_spill] sm:$0xff] }
 0x2ae   : > { %8040 = vmatprep.subr.mxu0 %v10558_v8  ;;  %8067 = vmatprep.subr.mxu1 %v10439_v9  ;;  %v2694_v20 = vadd.f32 %v7634_v3, %v2569_v47  ;;  %v4231_v22 = vld [vmem:[#allocation14 + $0xc8] sm:$0xff]  ;;  %v4225_v47 = vld [vmem:[#allocation14 + $0x98] sm:$0xff]  ;;  %v10860_v3 = vand.u32 4294901760, %v4227_v38 }
 0x2af   : > { %8041 = vmatpush3.msra.mxu0 %v10558_v8  ;;  %8068 = vmatpush3.msra.mxu1 %v10439_v9  ;;  %v2687_v26 = vpop.f32.mrf.mxu0  ;;  %v10798_v8 = vsub.f32 %v4234_v37, %v10786_v63 }
 0x2b0   : > { %8042 = vmatprep.subr.mxu0 %v11659_v19  ;;  %8069 = vmatprep.subr.mxu1 %v10454_v41  ;;  %v2688_v33 = vadd.f32 %v2687_v26, %v2561_v15  ;;  %v4223_v26 = vld [vmem:[#allocation14 + $0x88] sm:$0xff] }
 0x2b1   : > { %8043 = vmatpush3.msra.mxu0 %v11659_v19  ;;  %8070 = vmatpush3.msra.mxu1 %v10454_v41  ;;  %v11498_v50 = vand.u32 4294901760, %v10798_v8 }
 0x2b2   : > { %8044 = vmatprep.subr.mxu0 %v11660_v31  ;;  %8071 = vmatprep.subr.mxu1 %v10469_v4 }
 0x2b3   : > { %8045 = vmatpush3.msra.mxu0 %v11660_v31  ;;  %8072 = vmatpush3.msra.mxu1 %v10469_v4  ;;  %v4236_v4 = vld [vmem:[#allocation14 + $0xf0] sm:$0xff]  ;;  %v4390_v10 = vsub.f32 %v10798_v8, %v11498_v50  ;;  %v10864_v31 = vsub.f32 %v4228_v40, %v10852_v32 }
 0x2b4   : > { %8046 = vmatprep.subr.mxu0 %v11661_v62  ;;  %8073 = vmatprep.subr.mxu1 %v10484_v58  ;;  %v10775_v59 = vand.u32 4294901760, %v4236_v4 }
 0x2b5   : > { %8047 = vmatpush3.msra.mxu0 %v11661_v62  ;;  %8074 = vmatpush3.msra.mxu1 %v10484_v58  ;;  %v4235_v58 = vld [vmem:[#allocation14 + $0xe8] sm:$0xff]  ;;  %v4391_v14 = vand.u32 4294901760, %v4390_v10  ;;  %11666 = vst [vmem:[#allocation36_spill] sm:$0xff] %v10864_v31  ;;  %v10866_v62 = vand.u32 4294901760, %v4226_v39  ;;  %v11489_v37 = vand.u32 4294901760, %v10864_v31 }
 0x2b6   : > { %8048 = vmatprep.subr.mxu0 %v10610_v44  ;;  %8075 = vmatprep.subr.mxu1 %v10498_v5  ;;  %v7669_v56 = vpop.f32.mrf.mxu1  ;;  %v10780_v54 = vand.u32 4294901760, %v4235_v58 }
 0x2b7   : > { %8049 = vmatpush3.msra.mxu0 %v10610_v44  ;;  %8076 = vmatpush3.msra.mxu1 %v10498_v5  ;;  %v10755_v9 = vadd.f32 %v7669_v56, %v2694_v20  ;;  %v10778_v5 = vsub.f32 %v4237_v29, %v10773_v34  ;;  %v4229_v44 = vld [vmem:[#allocation14 + $0xb8] sm:$0xff]  ;;  %v4224_v20 = vld [vmem:[#allocation14 + $0x90] sm:$0xff]  ;;  %v4222_v56 = vld [vmem:[#allocation14 + $0x80] sm:$0xff] }
 0x2b8   : > { %8050 = vmatprep.subr.mxu0 %v10620_v21  ;;  %8077 = vmatprep.subr.mxu1 %v10513_v18  ;;  %v2780_v13 = vpop.f32.mrf.mxu1  ;;  %v10791_v36 = vsub.f32 %v4235_v58, %v10780_v54  ;;  %v10844_v12 = vand.u32 4294901760, %v4229_v44  ;;  %v10873_v58 = vand.u32 4294901760, %v4225_v47 }
 0x2b9   : > { %11662 = vst [vmem:[#allocation32_spill] sm:$0xff] %v10755_v9  ;;  %8051 = vmatpush3.msra.mxu0 %v10620_v21  ;;  %8078 = vmatpush3.msra.mxu1 %v10513_v18  ;;  %v10761_v41 = vadd.f32 %v2780_v13, %v2688_v33  ;;  %11665 = vst [vmem:[#allocation35_spill] sm:$0xff] %v10778_v5  ;;  %v10784_v18 = vsub.f32 %v4236_v4, %v10775_v59 }
 0x2ba   : > { %8053 = vmatmul.mubr.f32.vlgmr.msra.gmra.mxu0 %v10536_v52  ;;  %8079 = vmatprep.subr.mxu1 %v10526_v7  ;;  %v11499_v17 = vand.u32 4294901760, %v10791_v36  ;;  %v10831_v21 = vsub.f32 %v4230_v60, %v10812_v1  ;;  %v10858_v48 = vsub.f32 %v4229_v44, %v10844_v12  ;;  %v10871_v4 = vsub.f32 %v4227_v38, %v10860_v3 }
 0x2bb   : > { %11663 = vst [vmem:[#allocation33_spill] sm:$0xff] %v10761_v41  ;;  %8080 = vmatpush3.msra.mxu1 %v10526_v7  ;;  %4251 = vmatprep.subr.mxu0 %v10773_v34  ;;  %v11502_v7 = vand.u32 4294901760, %v10778_v5  ;;  %v10892_v44 = vand.u32 4294901760, %v4222_v56  ;;  %v4210_v41 = vld [vmem:[#allocation14 + $0x20] sm:$0xff] }
 0x2bc   : > { %8081 = vmatprep.subr.mxu1 %v10552_v28  ;;  %4253 = vmatpush1.msra.mxu0 %v10775_v59  ;;  %v4384_v55 = vsub.f32 %v10791_v36, %v11499_v17  ;;  %v11493_v6 = vand.u32 4294901760, %v10831_v21  ;;  %v11491_v29 = vand.u32 4294901760, %v10858_v48  ;;  %11667 = vst [vmem:[#allocation37_spill] sm:$0xff] %v10871_v4  ;;  %v4213_v17 = vld [vmem:[#allocation14 + $0x38] sm:$0xff] }
 0x2bd   : > { %8082 = vmatpush3.msra.mxu1 %v10552_v28  ;;  %4255 = vmatprep.subr.mxu0 %v10780_v54  ;;  %v11501_v28 = vand.u32 4294901760, %v10784_v18  ;;  %v4372_v35 = vsub.f32 %v10778_v5, %v11502_v7  ;;  %v4211_v7 = vld [vmem:[#allocation14 + $0x28] sm:$0xff] }
 0x2be   : > { %8083 = vmatprep.subr.mxu1 %v10564_v42  ;;  %4257 = vmatpush1.msra.mxu0 %v10786_v63  ;;  %v4385_v51 = vand.u32 4294901760, %v4384_v55  ;;  %v4414_v15 = vsub.f32 %v10831_v21, %v11493_v6  ;;  %v4420_v60 = vsub.f32 %v10858_v48, %v11491_v29 }
 0x2bf   : > { %8084 = vmatpush3.msra.mxu1 %v10564_v42  ;;  %v10802_v42 = vand.u32 4294901760, %v4231_v22  ;;  %4259 = vmatprep.subr.mxu0 %v10793_v11  ;;  %v4378_v0 = vsub.f32 %v10784_v18, %v11501_v28  ;;  %v4373_v2 = vand.u32 4294901760, %v4372_v35  ;;  %v11488_v35 = vand.u32 4294901760, %v10871_v4 }
 0x2c0   : > { %8085 = vmatprep.subr.mxu1 %v10577_v53  ;;  %v4415_v13 = vand.u32 4294901760, %v4414_v15  ;;  %v4421_v10 = vand.u32 4294901760, %v4420_v60 }
 0x2c1   : > { %8086 = vmatpush3.msra.mxu1 %v10577_v53  ;;  %v10810_v53 = vsub.f32 %v4233_v61, %v10793_v11  ;;  %v10823_v49 = vsub.f32 %v4231_v22, %v10802_v42  ;;  %v4379_v27 = vand.u32 4294901760, %v4378_v0  ;;  %v10878_v61 = vsub.f32 %v4226_v39, %v10866_v62  ;;  %v4221_v39 = vld [vmem:[#allocation14 + $0x78] sm:$0xff] }
 0x2c2   : > { %8088 = vmatmul.mubr.f32.vlgmr.msra.gmra.mxu1 %v10536_v52  ;;  %v4232_v52 = vld [vmem:[#allocation14 + $0xd0] sm:$0xff]  ;;  %4374 = vmatprep.subr.mxu1 %v4373_v2  ;;  %v10882_v22 = vand.u32 4294901760, %v4223_v26  ;;  %v10890_v0 = vsub.f32 %v4225_v47, %v10873_v58  ;;  %v4426_v2 = vsub.f32 %v10864_v31, %v11489_v37  ;;  %v4432_v38 = vsub.f32 %v10871_v4, %v11488_v35  ;;  %v4214_v37 = vld [vmem:[#allocation14 + $0x40] sm:$0xff] }
 0x2c3   : > { %v10800_v24 = vand.u32 4294901760, %v4232_v52  ;;  %v11497_v57 = vand.u32 4294901760, %v10810_v53  ;;  %v11494_v43 = vand.u32 4294901760, %v10823_v49  ;;  %4380 = vmatpush1.msra.mxu1 %v4379_v27  ;;  %11668 = vst [vmem:[#allocation38_spill] sm:$0xff] %v10878_v61  ;;  %v11486_v55 = vand.u32 4294901760, %v10878_v61  ;;  %v4220_v47 = vld [vmem:[#allocation14 + $0x70] sm:$0xff] }
 0x2c4   : > { %4386 = vmatprep.subr.mxu1 %v4385_v51  ;;  %11669 = vst [vmem:[#allocation39_spill] sm:$0xff] %v10890_v0  ;;  %v10903_v27 = vsub.f32 %v4223_v26, %v10882_v22  ;;  %v11485_v51 = vand.u32 4294901760, %v10890_v0  ;;  %v10927_v60 = vand.u32 4294901760, %v4221_v39 }
 0x2c5   : > { %v10820_v30 = vsub.f32 %v4232_v52, %v10800_v24  ;;  %4261 = vmatpush1.msra.mxu0 %v10800_v24  ;;  %v4396_v45 = vsub.f32 %v10810_v53, %v11497_v57  ;;  %v4408_v46 = vsub.f32 %v10823_v49, %v11494_v43  ;;  %4392 = vmatpush1.msra.mxu1 %v4391_v14  ;;  %v10880_v52 = vand.u32 4294901760, %v4224_v20 }
 0x2c6   : > { %4263 = vmatprep.subr.mxu0 %v10802_v42  ;;  %11671 = vst [vmem:[#allocation41_spill] sm:$0xff] %v10903_v27  ;;  %v4427_v14 = vand.u32 4294901760, %v4426_v2  ;;  %v4444_v15 = vsub.f32 %v10890_v0, %v11485_v51  ;;  %11673 = vst [vmem:[#allocation43_spill] sm:$0xff] %v10927_v60  ;;  %v4217_v2 = vld [vmem:[#allocation14 + $0x58] sm:$0xff] }
 0x2c7   : > { %v11495_v23 = vand.u32 4294901760, %v10820_v30  ;;  %4265 = vmatpush1.msra.mxu0 %v10812_v1  ;;  %v4397_v16 = vand.u32 4294901760, %v4396_v45  ;;  %v4409_v33 = vand.u32 4294901760, %v4408_v46  ;;  %v10900_v40 = vsub.f32 %v4224_v20, %v10880_v52 }
 0x2c8   : > { %4267 = vmatprep.subr.mxu0 %v10844_v12  ;;  %v10911_v45 = vsub.f32 %v4222_v56, %v10892_v44  ;;  %v11490_v20 = vand.u32 4294901760, %v10903_v27  ;;  %v10948_v6 = vand.u32 4294901760, %v4217_v2 }
 0x2c9   : > { %v4402_v25 = vsub.f32 %v10820_v30, %v11495_v23  ;;  %4269 = vmatpush1.msra.mxu0 %v10852_v32  ;;  %4398 = vmatprep.subr.mxu1 %v4397_v16  ;;  %11670 = vst [vmem:[#allocation40_spill] sm:$0xff] %v10900_v40  ;;  %v11487_v46 = vand.u32 4294901760, %v10900_v40  ;;  %v4433_v16 = vand.u32 4294901760, %v4432_v38 }
 0x2ca   : > { %4271 = vmatprep.subr.mxu0 %v10860_v3  ;;  %11672 = vst [vmem:[#allocation42_spill] sm:$0xff] %v10911_v45  ;;  %v11492_v26 = vand.u32 4294901760, %v10911_v45  ;;  %v4456_v38 = vsub.f32 %v10903_v27, %v11490_v20  ;;  %11679 = vst [vmem:[#allocation49_spill] sm:$0xff] %v10948_v6 }
 0x2cb   : > { %v4403_v19 = vand.u32 4294901760, %v4402_v25  ;;  %4273 = vmatpush1.msra.mxu0 %v10866_v62  ;;  %v4438_v25 = vsub.f32 %v10878_v61, %v11486_v55  ;;  %v10935_v55 = vand.u32 4294901760, %v4220_v47 }
 0x2cc   : > { %4275 = vmatprep.subr.mxu0 %v10873_v58  ;;  %v4462_v51 = vsub.f32 %v10911_v45, %v11492_v26  ;;  %v4457_v20 = vand.u32 4294901760, %v4456_v38  ;;  %v10967_v38 = vand.u32 4294901760, %v4214_v37 }
 0x2cd   : > { %4404 = vmatpush1.msra.mxu1 %v4403_v19  ;;  %4277 = vmatpush1.msra.mxu0 %v10880_v52  ;;  %v4219_v19 = vld [vmem:[#allocation14 + $0x68] sm:$0xff]  ;;  %v4439_v56 = vand.u32 4294901760, %v4438_v25  ;;  %11674 = vst [vmem:[#allocation44_spill] sm:$0xff] %v10935_v55  ;;  %v10946_v26 = vsub.f32 %v4220_v47, %v10935_v55  ;;  %v10963_v47 = vsub.f32 %v4217_v2, %v10948_v6 }
 0x2ce   : > { %4410 = vmatprep.subr.mxu1 %v4409_v33  ;;  %4279 = vmatprep.subr.mxu0 %v10882_v22  ;;  %v4218_v33 = vld [vmem:[#allocation14 + $0x60] sm:$0xff]  ;;  %v10940_v35 = vand.u32 4294901760, %v4219_v19  ;;  %v4463_v29 = vand.u32 4294901760, %v4462_v51  ;;  %11685 = vst [vmem:[#allocation55_spill] sm:$0xff] %v10967_v38 }
 0x2cf   : > { %4416 = vmatpush1.msra.mxu1 %v4415_v13  ;;  %4281 = vmatpush1.msra.mxu0 %v10892_v44  ;;  %v4450_v13 = vsub.f32 %v10900_v40, %v11487_v46  ;;  %v10938_v46 = vsub.f32 %v4221_v39, %v10927_v60  ;;  %11678 = vst [vmem:[#allocation48_spill] sm:$0xff] %v10946_v26  ;;  %v11500_v51 = vand.u32 4294901760, %v10946_v26  ;;  %11683 = vst [vmem:[#allocation53_spill] sm:$0xff] %v10963_v47 }
 0x2d0   : > { %4422 = vmatprep.subr.mxu1 %v4421_v10  ;;  %v4445_v10 = vand.u32 4294901760, %v4444_v15  ;;  %11676 = vst [vmem:[#allocation46_spill] sm:$0xff] %v10940_v35  ;;  %v4215_v15 = vld [vmem:[#allocation14 + $0x48] sm:$0xff]  ;;  %4283 = vmatprep.subr.mxu0 %v10927_v60  ;;  %v11511_v23 = vand.u32 4294901760, %v10963_v47 }
 0x2d1   : > { %4428 = vmatpush1.msra.mxu1 %v4427_v14  ;;  %v4216_v14 = vld [vmem:[#allocation14 + $0x50] sm:$0xff]  ;;  %v4451_v25 = vand.u32 4294901760, %v4450_v13  ;;  %11675 = vst [vmem:[#allocation45_spill] sm:$0xff] %v10938_v46  ;;  %4285 = vmatpush1.msra.mxu0 %v10935_v55  ;;  %v11496_v39 = vand.u32 4294901760, %v10938_v46  ;;  %v4474_v2 = vsub.f32 %v10946_v26, %v11500_v51 }
 0x2d2   : > { %4434 = vmatprep.subr.mxu1 %v4433_v16  ;;  %v10942_v16 = vand.u32 4294901760, %v4218_v33  ;;  %v10958_v43 = vand.u32 4294901760, %v4216_v14  ;;  %4287 = vmatprep.subr.mxu0 %v10940_v35  ;;  %v4212_v51 = vld [vmem:[#allocation14 + $0x30] sm:$0xff] }
 0x2d3   : > { %4440 = vmatpush1.msra.mxu1 %v4439_v56  ;;  %v10953_v56 = vsub.f32 %v4219_v19, %v10940_v35  ;;  %v4468_v19 = vsub.f32 %v10938_v46, %v11496_v39  ;;  %v4475_v28 = vand.u32 4294901760, %v4474_v2  ;;  %v4209_v2 = vld [vmem:[#allocation14 + $0x18] sm:$0xff]  ;;  %v11011_v26 = vand.u32 4294901760, %v4212_v51 }
 0x2d4   : > { %11677 = vst [vmem:[#allocation47_spill] sm:$0xff] %v10942_v16  ;;  %4446 = vmatprep.subr.mxu1 %v4445_v10  ;;  %v10956_v13 = vsub.f32 %v4218_v33, %v10942_v16  ;;  %11682 = vst [vmem:[#allocation52_spill] sm:$0xff] %v10958_v43  ;;  %v10965_v10 = vand.u32 4294901760, %v4215_v15  ;;  %4289 = vmatpush1.msra.mxu0 %v10942_v16 }
 0x2d5   : > { %4452 = vmatpush1.msra.mxu1 %v4451_v25  ;;  %11680 = vst [vmem:[#allocation50_spill] sm:$0xff] %v10953_v56  ;;  %v11504_v33 = vand.u32 4294901760, %v10953_v56  ;;  %v10976_v25 = vsub.f32 %v4216_v14, %v10958_v43  ;;  %4291 = vmatprep.subr.mxu0 %v10948_v6  ;;  %v4469_v39 = vand.u32 4294901760, %v4468_v19  ;;  %11690 = vst [vmem:[#allocation60_spill] sm:$0xff] %v11011_v26 }
 0x2d6   : > { %11681 = vst [vmem:[#allocation51_spill] sm:$0xff] %v10956_v13  ;;  %4458 = vmatprep.subr.mxu1 %v4457_v20  ;;  %11684 = vst [vmem:[#allocation54_spill] sm:$0xff] %v10965_v10  ;;  %v11505_v20 = vand.u32 4294901760, %v10956_v13  ;;  %4293 = vmatpush1.msra.mxu0 %v10958_v43 }
 0x2d7   : > { %4464 = vmatpush1.msra.mxu1 %v4463_v29  ;;  %11686 = vst [vmem:[#allocation56_spill] sm:$0xff] %v10976_v25  ;;  %v10984_v29 = vsub.f32 %v4215_v15, %v10965_v10  ;;  %v4480_v57 = vsub.f32 %v10953_v56, %v11504_v33  ;;  %v11516_v50 = vand.u32 4294901760, %v10976_v25  ;;  %4295 = vmatprep.subr.mxu0 %v10965_v10 }
 0x2d8   : > { %v4486_v14 = vsub.f32 %v10956_v13, %v11505_v20  ;;  %v4492_v15 = vsub.f32 %v10963_v47, %v11511_v23  ;;  %4297 = vmatpush1.msra.mxu0 %v10967_v38  ;;  %4470 = vmatprep.subr.mxu1 %v4469_v39  ;;  %v11004_v13 = vsub.f32 %v4214_v37, %v10967_v38  ;;  %v11009_v47 = vand.u32 4294901760, %v4213_v17 }
 0x2d9   : > { %11687 = vst [vmem:[#allocation57_spill] sm:$0xff] %v10984_v29  ;;  %v11519_v19 = vand.u32 4294901760, %v10984_v29  ;;  %v4481_v33 = vand.u32 4294901760, %v4480_v57  ;;  %v4498_v9 = vsub.f32 %v10976_v25, %v11516_v50  ;;  %4476 = vmatpush1.msra.mxu1 %v4475_v28  ;;  %v4208_v57 = vld [vmem:[#allocation14 + $0x10] sm:$0xff]  ;;  %v11014_v50 = vand.u32 4294901760, %v4211_v7  ;;  %v4207_v25 = vld [vmem:[#allocation14 + $0x8] sm:$0xff] }
 0x2da   : > { %v4487_v20 = vand.u32 4294901760, %v4486_v14  ;;  %11688 = vst [vmem:[#allocation58_spill] sm:$0xff] %v11004_v13  ;;  %v4493_v56 = vand.u32 4294901760, %v4492_v15  ;;  %11689 = vst [vmem:[#allocation59_spill] sm:$0xff] %v11009_v47  ;;  %v11524_v14 = vand.u32 4294901760, %v11004_v13  ;;  %v11016_v37 = vand.u32 4294901760, %v4210_v41  ;;  %4299 = vmatprep.subr.mxu0 %v11009_v47 }
 0x2db   : > { %v4504_v23 = vsub.f32 %v10984_v29, %v11519_v19  ;;  %4482 = vmatprep.subr.mxu1 %v4481_v33  ;;  %v4499_v39 = vand.u32 4294901760, %v4498_v9  ;;  %11691 = vst [vmem:[#allocation61_spill] sm:$0xff] %v11014_v50  ;;  %v11019_v15 = vsub.f32 %v4213_v17, %v11009_v47  ;;  %v11022_v19 = vsub.f32 %v4212_v51, %v11011_v26 }
 0x2dc   : > { %11692 = vst [vmem:[#allocation62_spill] sm:$0xff] %v11016_v37  ;;  %4488 = vmatpush1.msra.mxu1 %v4487_v20  ;;  %v11024_v29 = vand.u32 4294901760, %v4209_v2  ;;  %v4510_v9 = vsub.f32 %v11004_v13, %v11524_v14  ;;  %v11031_v33 = vsub.f32 %v4211_v7, %v11014_v50  ;;  %v11036_v17 = vand.u32 4294901760, %v4208_v57  ;;  %4301 = vmatpush1.msra.mxu0 %v11011_v26  ;;  %v4206_v14 = vld [vmem:[#allocation14] sm:$0xff] }
 0x2dd   : > { %v4505_v28 = vand.u32 4294901760, %v4504_v23  ;;  %11693 = vst [vmem:[#allocation63_spill] sm:$0xff] %v11019_v15  ;;  %11694 = vst [vmem:[#allocation64_spill] sm:$0xff] %v11022_v19  ;;  %4494 = vmatprep.subr.mxu1 %v4493_v56  ;;  %v11034_v23 = vsub.f32 %v4210_v41, %v11016_v37  ;;  %v11529_v51 = vand.u32 4294901760, %v11019_v15  ;;  %v11534_v20 = vand.u32 4294901760, %v11022_v19  ;;  %4303 = vmatprep.subr.mxu0 %v11014_v50 }
 0x2de   : > { %11695 = vst [vmem:[#allocation65_spill] sm:$0xff] %v11024_v29  ;;  %11696 = vst [vmem:[#allocation66_spill] sm:$0xff] %v11031_v33  ;;  %4500 = vmatpush1.msra.mxu1 %v4499_v39  ;;  %v11042_v56 = vsub.f32 %v4209_v2, %v11024_v29  ;;  %v11044_v47 = vand.u32 4294901760, %v4207_v25  ;;  %v4511_v41 = vand.u32 4294901760, %v4510_v9  ;;  %v11537_v7 = vand.u32 4294901760, %v11031_v33  ;;  %4305 = vmatpush1.msra.mxu0 %v11016_v37 }
 0x2df   : > { %11697 = vst [vmem:[#allocation67_spill] sm:$0xff] %v11034_v23  ;;  %11698 = vst [vmem:[#allocation68_spill] sm:$0xff] %v11036_v17  ;;  %4506 = vmatprep.subr.mxu1 %v4505_v28  ;;  %v11540_v13 = vand.u32 4294901760, %v11034_v23  ;;  %v11050_v39 = vsub.f32 %v4208_v57, %v11036_v17  ;;  %v4516_v2 = vsub.f32 %v11019_v15, %v11529_v51  ;;  %4307 = vmatprep.subr.mxu0 %v11024_v29 }
 0x2e0   : > { %11699 = vst [vmem:[#allocation69_spill] sm:$0xff] %v11042_v56  ;;  %11700 = vst [vmem:[#allocation70_spill] sm:$0xff] %v11044_v47  ;;  %v4522_v26 = vsub.f32 %v11022_v19, %v11534_v20  ;;  %v11543_v28 = vand.u32 4294901760, %v11042_v56  ;;  %v11061_v9 = vsub.f32 %v4207_v25, %v11044_v47  ;;  %4512 = vmatpush1.msra.mxu1 %v4511_v41  ;;  %v11071_v37 = vand.u32 4294901760, %v4206_v14 }
 0x2e1   : > { %11701 = vst [vmem:[#allocation71_spill] sm:$0xff] %v11050_v39  ;;  %v4528_v57 = vsub.f32 %v11031_v33, %v11537_v7  ;;  %v4534_v51 = vsub.f32 %v11034_v23, %v11540_v13  ;;  %v11545_v15 = vand.u32 4294901760, %v11050_v39  ;;  %4309 = vmatpush1.msra.mxu0 %v11036_v17  ;;  %v4517_v20 = vand.u32 4294901760, %v4516_v2 }
 0x2e2   : > { %11702 = vst [vmem:[#allocation72_spill] sm:$0xff] %v11061_v9  ;;  %11703 = vst [vmem:[#allocation73_spill] sm:$0xff] %v11071_v37  ;;  %v4523_v25 = vand.u32 4294901760, %v4522_v26  ;;  %v4540_v41 = vsub.f32 %v11042_v56, %v11543_v28  ;;  %v11544_v19 = vand.u32 4294901760, %v11061_v9  ;;  %4311 = vmatprep.subr.mxu0 %v11044_v47  ;;  %v11083_v23 = vsub.f32 %v4206_v14, %v11071_v37 }
 0x2e3   : > { %v4529_v7 = vand.u32 4294901760, %v4528_v57  ;;  %v4535_v33 = vand.u32 4294901760, %v4534_v51  ;;  %v4546_v13 = vsub.f32 %v11050_v39, %v11545_v15  ;;  %4313 = vmatpush1.msra.mxu0 %v11071_v37  ;;  %4518 = vmatprep.subr.mxu1 %v4517_v20  ;;  %v11547_v28 = vmov 0.0  }
 0x2e4   : > { %11704 = vst [vmem:[#allocation74_spill] sm:$0xff] %v11083_v23  ;;  %v4541_v26 = vand.u32 4294901760, %v4540_v41  ;;  %v4552_v2 = vsub.f32 %v11061_v9, %v11544_v19  ;;  %4610 = vmatprep.subr.mxu0 %v10778_v5  ;;  %4524 = vmatpush1.msra.mxu1 %v4523_v25  ;;  %v11555_v51 = vand.u32 4294901760, %v11083_v23  ;;  %v7739_v19 = vpop.f32.mrf.mxu1 }
 0x2e5   : > { %v4547_v57 = vand.u32 4294901760, %v4546_v13  ;;  %4593 = vmatprep.mubr.f32.mxu1 %v11547_v28  ;;  %4530 = vmatprep.subr.mxu1 %v4529_v7  ;;  %v7704_v13 = vpop.f32.mrf.mxu0 }
 0x2e6   : > { %v4553_v14 = vand.u32 4294901760, %v4552_v2  ;;  %4346 = vmatprep.mubr.f32.mxu0 %v11547_v28  ;;  %4536 = vmatpush1.msra.mxu1 %v4535_v33  ;;  %v4558_v20 = vsub.f32 %v11083_v23, %v11555_v51  ;;  %v3061_v7 = vpop.f32.mrf.mxu1 }
 0x2e7   : > { %4542 = vmatprep.subr.mxu1 %v4541_v26  ;;  %v2900_v25 = vpop.f32.mrf.mxu0 }
 0x2e8   : > { %4548 = vmatpush1.msra.mxu1 %v4547_v57  ;;  %v4559_v41 = vand.u32 4294901760, %v4558_v20  ;;  %v6437_v20 = vld [vmem:[%s11450_s11] ss:$0 sm:$0xff] }
 0x2e9   : > { %4554 = vmatprep.subr.mxu1 %v4553_v14  ;;  %v6436_v14 = vld [vmem:[%s11448_s9] ss:$0 sm:$0xff] }
 0x2ea   : > { %4560 = vmatpush1.msra.mxu1 %v4559_v41  ;;  %v2901_v29 = vadd.f32 %v6436_v14, %v2900_v25 }
 0x2eb   : > { %4754 = vmatprep.subr.mxu1 %v10773_v34  ;;  %v2911_v34 = vadd.f32 %v7704_v13, %v6436_v14  ;;  %v11724_v14 = vld [vmem:[#allocation59_spill] sm:$0xff] }
 0x2ec   : > { %v3062_v10 = vadd.f32 %v3061_v7, %v2901_v29  ;;  %v11720_v7 = vld [vmem:[#allocation54_spill] sm:$0xff] }
 0x2ed   : > { %v3068_v50 = vadd.f32 %v7739_v19, %v2911_v34 }
 0x2f2   : > { %v7774_v15 = vpop.f32.mrf.mxu0 }
 0x2f3   : > { %v3179_v27 = vadd.f32 %v7774_v15, %v3068_v50  ;;  %v11713_v15 = vld [vmem:[#allocation38_spill] sm:$0xff] }
 0x2f4   : > { %v3171_v2 = vpop.f32.mrf.mxu0 }
 0x2f5   : > { %v3172_v0 = vadd.f32 %v3171_v2, %v3062_v10  ;;  %v11721_v2 = vld [vmem:[#allocation42_spill] sm:$0xff] }
 0x2fb   : > { %v7809_v5 = vpop.f32.mrf.mxu1 }
 0x2fc   : > { %v3276_v16 = vadd.f32 %v7809_v5, %v3179_v27  ;;  %v11708_v27 = vld [vmem:[#allocation43_spill] sm:$0xff] }
 0x2fd   : > { %v3267_v33 = vpop.f32.mrf.mxu1 }
 0x2fe   : > { %v3268_v55 = vadd.f32 %v3267_v33, %v3172_v0  ;;  %v11722_v33 = vld [vmem:[#allocation55_spill] sm:$0xff] }
 0x314   : > { %v7844_v28 = vpop.f32.mrf.mxu0 }
 0x315   : > { %v3401_v13 = vadd.f32 %v7844_v28, %v3276_v16  ;;  %v11711_v16 = vld [vmem:[#allocation37_spill] sm:$0xff]  ;;  %v11717_v28 = vld [vmem:[#allocation40_spill] sm:$0xff] }
 0x316   : > { %v3394_v9 = vpop.f32.mrf.mxu0 }
 0x317   : > { %v3395_v25 = vadd.f32 %v3394_v9, %v3268_v55  ;;  %v11718_v9 = vld [vmem:[#allocation52_spill] sm:$0xff] }
 0x31c   : > { %v7879_v39 = vpop.f32.mrf.mxu1 }
 0x31d   : > { %v3494_v34 = vadd.f32 %v7879_v39, %v3401_v13  ;;  %v11716_v39 = vld [vmem:[#allocation49_spill] sm:$0xff]  ;;  %v11727_v13 = vld [vmem:[#allocation50_spill] sm:$0xff] }
 0x31e   : > { %v3487_v51 = vpop.f32.mrf.mxu1 }
 0x31f   : > { %v3488_v29 = vadd.f32 %v3487_v51, %v3395_v25  ;;  %v11719_v51 = vld [vmem:[#allocation41_spill] sm:$0xff]  ;;  %v11729_v25 = vld [vmem:[#allocation51_spill] sm:$0xff] }
 0x336   : > { %v7914_v56 = vpop.f32.mrf.mxu0 }
 0x337   : > { %v3618_v37 = vadd.f32 %v7914_v56, %v6437_v20 }
 0x338   : > { %v3607_v26 = vpop.f32.mrf.mxu0 }
 0x339   : > { %v3608_v46 = vadd.f32 %v6437_v20, %v3607_v26  ;;  %v11725_v20 = vld [vmem:[#allocation48_spill] sm:$0xff] }
 0x33f   : > { %v7949_v57 = vpop.f32.mrf.mxu1 }
 0x340   : > { %v3775_v38 = vadd.f32 %v7949_v57, %v3618_v37  ;;  %v11723_v57 = vld [vmem:[#allocation45_spill] sm:$0xff] }
 0x341   : > { %v3768_v23 = vpop.f32.mrf.mxu1 }
 0x342   : > { %v3769_v43 = vadd.f32 %v3768_v23, %v3608_v46  ;;  %v11714_v23 = vld [vmem:[#allocation47_spill] sm:$0xff] }
 0x358   : > { %v7984_v41 = vpop.f32.mrf.mxu0 }
 0x359   : > { %v3886_v40 = vadd.f32 %v7984_v41, %v3775_v38  ;;  %v11726_v41 = vld [vmem:[#allocation60_spill] sm:$0xff] }
 0x35a   : > { %v3878_v47 = vpop.f32.mrf.mxu0 }
 0x35b   : > { %v3879_v61 = vadd.f32 %v3878_v47, %v3769_v43  ;;  %v11712_v47 = vld [vmem:[#allocation46_spill] sm:$0xff] }
 0x361   : > { %v8019_v17 = vpop.f32.mrf.mxu1 }
 0x362   : > { %v3983_v35 = vadd.f32 %v8019_v17, %v3886_v40  ;;  %v11715_v17 = vld [vmem:[#allocation39_spill] sm:$0xff] }
 0x363   : > { %v3974_v6 = vpop.f32.mrf.mxu1 }
 0x364   : > { %v3975_v56 = vadd.f32 %v3974_v6, %v3879_v61 }
 0x37a   : > { %v8054_v45 = vpop.f32.mrf.mxu0 }
 0x37b   : > { %v4108_v31 = vadd.f32 %v8054_v45, %v3983_v35  ;;  %v11709_v45 = vld [vmem:[#allocation36_spill] sm:$0xff] }
 0x37c   : > { %v4101_v4 = vpop.f32.mrf.mxu0 }
 0x37d   : > { %v4102_v19 = vadd.f32 %v4101_v4, %v3975_v56  ;;  %v11728_v56 = vld [vmem:[#allocation61_spill] sm:$0xff] }
 0x382   : > { %v8089_v60 = vpop.f32.mrf.mxu1 }
 0x383   : > { %v4201_v37 = vadd.f32 %v8089_v60, %v4108_v31  ;;  %v11707_v31 = vmov 0.0   ;;  %v11710_v60 = vld [vmem:[#allocation44_spill] sm:$0xff] }
 0x384   : > { %v4194_v26 = vpop.f32.mrf.mxu1 }
 0x385   : > { %v4205_v50 = vmul.f32 %v4201_v37, %v3494_v34  ;;  %v4195_v46 = vadd.f32 %v4194_v26, %v4102_v19  ;;  %v11730_v34 = vld [vmem:[#allocation62_spill] sm:$0xff]  ;;  %v11731_v19 = vld [vmem:[#allocation53_spill] sm:$0xff]  ;;  %v11733_v26 = vld [vmem:[#allocation56_spill] sm:$0xff] }
 0x386   : > { %v11732_v37 = vld [vmem:[#allocation65_spill] sm:$0xff] }
 0x387   : > { %v11103_v38 = vand.u32 4294901760, %v4205_v50  ;;  %v4204_v10 = vmul.f32 %v4195_v46, %v3488_v29  ;;  %v11734_v29 = vld [vmem:[#allocation68_spill] sm:$0xff]  ;;  %v11736_v46 = vld [vmem:[#allocation70_spill] sm:$0xff] }
 0x389   : > { %11705 = vst [vmem:[#allocation75_spill] sm:$0xff] %v11103_v38  ;;  %v11105_v5 = vand.u32 4294901760, %v4204_v10  ;;  %v11108_v43 = vsub.f32 %v4205_v50, %v11103_v38  ;;  %v11735_v50 = vld [vmem:[#allocation57_spill] sm:$0xff] }
 0x38b   : > { %11706 = vst [vmem:[#allocation76_spill] sm:$0xff] %v11105_v5  ;;  %v11111_v6 = vsub.f32 %v4204_v10, %v11105_v5  ;;  %4595 = vmatmul.mubr.f32.vlgmr.msra.gmra.mxu1 %v11105_v5  ;;  %v11601_v61 = vand.u32 4294901760, %v11108_v43  ;;  %v11737_v10 = vld [vmem:[#allocation58_spill] sm:$0xff]  ;;  %v11744_v5 = vld [vmem:[#allocation69_spill] sm:$0xff] }
 0x38c   : > { %4756 = vmatpush1.msra.mxu1 %v10775_v59  ;;  %4600 = vmatprep.mubr.f32.mxu1 %v11707_v31 }
 0x38d   : > { %v4349_v4 = vand.u32 4294901760, %v11111_v6  ;;  %4758 = vmatprep.subr.mxu1 %v10780_v54  ;;  %v4361_v55 = vsub.f32 %v11108_v43, %v11601_v61  ;;  %v11742_v61 = vld [vmem:[#allocation66_spill] sm:$0xff] }
 0x38e   : > { %4760 = vmatpush1.msra.mxu1 %v10786_v63 }
 0x38f   : > { %4762 = vmatprep.subr.mxu1 %v10793_v11  ;;  %4602 = vmatmul.mubr.f32.gmra.mxu1 %v11103_v38  ;;  %v4350_v35 = vsub.f32 %v11111_v6, %v4349_v4  ;;  %v4362_v40 = vand.u32 4294901760, %v4361_v55  ;;  %v11740_v55 = vld [vmem:[#allocation34_spill] sm:$0xff]  ;;  %v11743_v38 = vld [vmem:[#allocation67_spill] sm:$0xff] }
 0x390   : > { %4764 = vmatpush1.msra.mxu1 %v10800_v24  ;;  %4849 = vmatprep.mubr.f32.mxu1 %v11707_v31 }
 0x391   : > { %4766 = vmatprep.subr.mxu1 %v10802_v42  ;;  %v4351_v0 = vand.u32 4294901760, %v4350_v35  ;;  %v11738_v35 = vld [vmem:[#allocation73_spill] sm:$0xff] }
 0x392   : > { %4768 = vmatpush1.msra.mxu1 %v10812_v1 }
 0x393   : > { %4770 = vmatprep.subr.mxu1 %v10844_v12  ;;  %4352 = vmatmul.mubr.f32.vlgmr.msra.gmra.mxu0 %v4351_v0  ;;  %v11739_v0 = vld [vmem:[#allocation63_spill] sm:$0xff] }
 0x394   : > { %4613 = vmatpush1.msra.mxu0 %v10784_v18  ;;  %4772 = vmatpush1.msra.mxu1 %v10852_v32 }
 0x395   : > { %4616 = vmatprep.subr.mxu0 %v10791_v36  ;;  %4774 = vmatprep.subr.mxu1 %v10860_v3 }
 0x396   : > { %4619 = vmatpush1.msra.mxu0 %v10798_v8  ;;  %4776 = vmatpush1.msra.mxu1 %v10866_v62 }
 0x397   : > { %4357 = vmatprep.mubr.f32.mxu0 %v11707_v31  ;;  %4622 = vmatprep.subr.mxu0 %v10810_v53 }
 0x398   : > { %4778 = vmatprep.subr.mxu1 %v10873_v58  ;;  %4363 = vmatmul.mubr.f32.gmra.mxu0 %v4362_v40  ;;  %v11741_v40 = vld [vmem:[#allocation64_spill] sm:$0xff] }
 0x399   : > { %4625 = vmatpush1.msra.mxu0 %v10820_v30  ;;  %4780 = vmatpush1.msra.mxu1 %v10880_v52 }
 0x39a   : > { %4628 = vmatprep.subr.mxu0 %v10823_v49  ;;  %4782 = vmatprep.subr.mxu1 %v10882_v22 }
 0x39b   : > { %4631 = vmatpush1.msra.mxu0 %v10831_v21  ;;  %4784 = vmatpush1.msra.mxu1 %v10892_v44 }
 0x39c   : > { %4634 = vmatprep.subr.mxu0 %v10858_v48  ;;  %4786 = vmatprep.subr.mxu1 %v11708_v27 }
 0x39d   : > { %4637 = vmatpush1.msra.mxu0 %v11709_v45  ;;  %4788 = vmatpush1.msra.mxu1 %v11710_v60 }
 0x39e   : > { %4640 = vmatprep.subr.mxu0 %v11711_v16  ;;  %4790 = vmatprep.subr.mxu1 %v11712_v47 }
 0x39f   : > { %4643 = vmatpush1.msra.mxu0 %v11713_v15  ;;  %4792 = vmatpush1.msra.mxu1 %v11714_v23 }
 0x3a0   : > { %4646 = vmatprep.subr.mxu0 %v11715_v17  ;;  %4794 = vmatprep.subr.mxu1 %v11716_v39 }
 0x3a1   : > { %4649 = vmatpush1.msra.mxu0 %v11717_v28  ;;  %4796 = vmatpush1.msra.mxu1 %v11718_v9 }
 0x3a2   : > { %4652 = vmatprep.subr.mxu0 %v11719_v51  ;;  %4798 = vmatprep.subr.mxu1 %v11720_v7 }
 0x3a3   : > { %4655 = vmatpush1.msra.mxu0 %v11721_v2  ;;  %4800 = vmatpush1.msra.mxu1 %v11722_v33 }
 0x3a4   : > { %4658 = vmatprep.subr.mxu0 %v11723_v57  ;;  %4802 = vmatprep.subr.mxu1 %v11724_v14 }
 0x3a5   : > { %4661 = vmatpush1.msra.mxu0 %v11725_v20  ;;  %4804 = vmatpush1.msra.mxu1 %v11726_v41 }
 0x3a6   : > { %4664 = vmatprep.subr.mxu0 %v11727_v13  ;;  %4806 = vmatprep.subr.mxu1 %v11728_v56 }
 0x3a7   : > { %4667 = vmatpush1.msra.mxu0 %v11729_v25  ;;  %4808 = vmatpush1.msra.mxu1 %v11730_v34 }
 0x3a8   : > { %4670 = vmatprep.subr.mxu0 %v11731_v19  ;;  %4810 = vmatprep.subr.mxu1 %v11732_v37 }
 0x3a9   : > { %4673 = vmatpush1.msra.mxu0 %v11733_v26  ;;  %4812 = vmatpush1.msra.mxu1 %v11734_v29 }
 0x3aa   : > { %4676 = vmatprep.subr.mxu0 %v11735_v50  ;;  %4814 = vmatprep.subr.mxu1 %v11736_v46 }
 0x3ab   : > { %4679 = vmatpush1.msra.mxu0 %v11737_v10  ;;  %4816 = vmatpush1.msra.mxu1 %v11738_v35 }
 0x3ac   : > { %4682 = vmatprep.subr.mxu0 %v11739_v0  ;;  %4853 = vmatmul.mubr.f32.vlgmr.msra.gmra.mxu1 %v4349_v4  ;;  %v11745_v4 = vand.u32 4294901760, %v11108_v43 }
 0x3ad   : > { %5044 = vmatprep.subr.mxu1 %v11740_v55  ;;  %4685 = vmatpush1.msra.mxu0 %v11741_v40  ;;  %v11746_v55 = vld [vmem:[#allocation71_spill] sm:$0xff] }
 0x3ae   : > { %5046 = vmatpush1.msra.mxu1 %v10775_v59  ;;  %4688 = vmatprep.subr.mxu0 %v11742_v61  ;;  %v11747_v59 = vld [vmem:[#allocation72_spill] sm:$0xff] }
 0x3af   : > { %5048 = vmatprep.subr.mxu1 %v10780_v54  ;;  %4691 = vmatpush1.msra.mxu0 %v11743_v38  ;;  %v11748_v54 = vld [vmem:[#allocation74_spill] sm:$0xff] }
 0x3b0   : > { %4858 = vmatprep.mubr.f32.mxu1 %v11707_v31  ;;  %5050 = vmatpush1.msra.mxu1 %v10786_v63  ;;  %v11749_v63 = vld [vmem:[#allocation35_spill] sm:$0xff] }
 0x3b1   : > { %4694 = vmatprep.subr.mxu0 %v11744_v5  ;;  %4862 = vmatmul.mubr.f32.gmra.mxu1 %v11745_v4  ;;  %v11750_v4 = vand.u32 4294901760, %v11749_v63 }
 0x3b2   : > { %5052 = vmatprep.subr.mxu1 %v10793_v11  ;;  %4697 = vmatpush1.msra.mxu0 %v11746_v55  ;;  %v11751_v11 = vand.u32 4294901760, %v10784_v18  ;;  %v11755_v18 = vand.u32 4294901760, %v10820_v30  ;;  %v11759_v30 = vand.u32 4294901760, %v11709_v45  ;;  %v11774_v45 = vand.u32 4294901760, %v11739_v0 }
 0x3b3   : > { %5054 = vmatpush1.msra.mxu1 %v10800_v24  ;;  %4700 = vmatprep.subr.mxu0 %v11747_v59  ;;  %v11752_v24 = vand.u32 4294901760, %v10791_v36  ;;  %v11756_v36 = vand.u32 4294901760, %v10823_v49  ;;  %v11760_v49 = vand.u32 4294901760, %v11711_v16  ;;  %v11776_v16 = vand.u32 4294901760, %v11741_v40 }
 0x3b4   : > { %5056 = vmatprep.subr.mxu1 %v10802_v42  ;;  %4703 = vmatpush1.msra.mxu0 %v11748_v54  ;;  %v11753_v42 = vand.u32 4294901760, %v10798_v8  ;;  %v11757_v8 = vand.u32 4294901760, %v10831_v21  ;;  %v11761_v21 = vand.u32 4294901760, %v11713_v15  ;;  %v11778_v15 = vand.u32 4294901760, %v11743_v38 }
 0x3b5   : > { %4736 = vmatprep.mubr.f32.mxu0 %v11707_v31  ;;  %5058 = vmatpush1.msra.mxu1 %v10812_v1  ;;  %v11754_v1 = vand.u32 4294901760, %v10810_v53  ;;  %v11758_v53 = vand.u32 4294901760, %v10858_v48  ;;  %v11764_v48 = vand.u32 4294901760, %v11719_v51  ;;  %v4240_v51 = vlaneseq }
 0x3b6   : > { %4739 = vmatmul.mubr.f32.vlgmr.msra.gmra.mxu0 %v11111_v6  ;;  %4871 = vmatprep.subr.mxu0 %v11750_v4  ;;  %v11772_v6 = vand.u32 4294901760, %v11735_v50 }
 0x3b7   : > { %5060 = vmatprep.subr.mxu1 %v10844_v12  ;;  %4875 = vmatpush1.msra.mxu0 %v11751_v11  ;;  %v11762_v12 = vand.u32 4294901760, %v11715_v17  ;;  %v11780_v17 = vld [vmem:[#allocation75_spill] sm:$0xff] }
 0x3b8   : > { %5062 = vmatpush1.msra.mxu1 %v10852_v32  ;;  %4879 = vmatprep.subr.mxu0 %v11752_v24  ;;  %v11763_v32 = vand.u32 4294901760, %v11717_v28  ;;  %v11782_v28 = vand.u32 4294901760, %v11747_v59 }
 0x3b9   : > { %5064 = vmatprep.subr.mxu1 %v10860_v3  ;;  %4744 = vmatprep.mubr.f32.mxu0 %v11707_v31  ;;  %v11765_v3 = vand.u32 4294901760, %v11721_v2 }
 0x3ba   : > { %4883 = vmatpush1.msra.mxu0 %v11753_v42  ;;  %5066 = vmatpush1.msra.mxu1 %v10866_v62  ;;  %v11766_v62 = vand.u32 4294901760, %v11723_v57 }
 0x3bb   : > { %4747 = vmatmul.mubr.f32.gmra.mxu0 %v11108_v43  ;;  %4887 = vmatprep.subr.mxu0 %v11754_v1  ;;  %v11771_v43 = vand.u32 4294901760, %v11733_v26 }
 0x3bc   : > { %5068 = vmatprep.subr.mxu1 %v10873_v58  ;;  %4891 = vmatpush1.msra.mxu0 %v11755_v18  ;;  %v11767_v58 = vand.u32 4294901760, %v11725_v20 }
 0x3bd   : > { %5070 = vmatpush1.msra.mxu1 %v10880_v52  ;;  %4895 = vmatprep.subr.mxu0 %v11756_v36  ;;  %v11768_v52 = vand.u32 4294901760, %v11727_v13 }
 0x3be   : > { %5072 = vmatprep.subr.mxu1 %v10882_v22  ;;  %4899 = vmatpush1.msra.mxu0 %v11757_v8  ;;  %v11769_v22 = vand.u32 4294901760, %v11729_v25 }
 0x3bf   : > { %5074 = vmatpush1.msra.mxu1 %v10892_v44  ;;  %4903 = vmatprep.subr.mxu0 %v11758_v53  ;;  %v11770_v44 = vand.u32 4294901760, %v11731_v19 }
 0x3c0   : > { %5076 = vmatprep.subr.mxu1 %v11708_v27  ;;  %4907 = vmatpush1.msra.mxu0 %v11759_v30  ;;  %v11773_v27 = vand.u32 4294901760, %v11737_v10 }
 0x3c1   : > { %5078 = vmatpush1.msra.mxu1 %v11710_v60  ;;  %4911 = vmatprep.subr.mxu0 %v11760_v49  ;;  %v11775_v60 = vld [vmem:[#allocation76_spill] sm:$0xff] }
 0x3c2   : > { %5080 = vmatprep.subr.mxu1 %v11712_v47  ;;  %4915 = vmatpush1.msra.mxu0 %v11761_v21  ;;  %v11777_v47 = vand.u32 4294901760, %v11742_v61 }
 0x3c3   : > { %5082 = vmatpush1.msra.mxu1 %v11714_v23  ;;  %4919 = vmatprep.subr.mxu0 %v11762_v12  ;;  %v11779_v23 = vand.u32 4294901760, %v11744_v5 }
 0x3c4   : > { %5084 = vmatprep.subr.mxu1 %v11716_v39  ;;  %4923 = vmatpush1.msra.mxu0 %v11763_v32  ;;  %v11781_v39 = vand.u32 4294901760, %v11746_v55 }
 0x3c5   : > { %5086 = vmatpush1.msra.mxu1 %v11718_v9  ;;  %4927 = vmatprep.subr.mxu0 %v11764_v48  ;;  %v11783_v9 = vand.u32 4294901760, %v11748_v54 }
 0x3c6   : > { %5088 = vmatprep.subr.mxu1 %v11720_v7  ;;  %4931 = vmatpush1.msra.mxu0 %v11765_v3 }
 0x3c7   : > { %5090 = vmatpush1.msra.mxu1 %v11722_v33  ;;  %4935 = vmatprep.subr.mxu0 %v11766_v62  ;;  %v4241_v33 = vshrl.u32 %v4240_v51, 7 }
 0x3c8   : > { %5092 = vmatprep.subr.mxu1 %v11724_v14  ;;  %4939 = vmatpush1.msra.mxu0 %v11767_v58 }
 0x3c9   : > { %5094 = vmatpush1.msra.mxu1 %v11726_v41  ;;  %4943 = vmatprep.subr.mxu0 %v11768_v52  ;;  %v4242_v20 = vsub.s32 0, %v4241_v33  ;;  %v4238_v41 = vld [vmem:[%s11452_s13] sm:$0x3] }
 0x3ca   : > { %5096 = vmatprep.subr.mxu1 %v11728_v56  ;;  %4947 = vmatpush1.msra.mxu0 %v11769_v22  ;;  %v4246_v56 = vsub.s32 1, %v4241_v33 }
 0x3cb   : > { %5098 = vmatpush1.msra.mxu1 %v11730_v34  ;;  %4951 = vmatprep.subr.mxu0 %v11770_v44 }
 0x3cc   : > { %5100 = vmatprep.subr.mxu1 %v11732_v37  ;;  %4955 = vmatpush1.msra.mxu0 %v11771_v43  ;;  %v4247_v37 = vrot.slane %v4238_v41, %v4246_v56 }
 0x3cd   : > { %5102 = vmatpush1.msra.mxu1 %v11734_v29  ;;  %4959 = vmatprep.subr.mxu0 %v11772_v6 }
 0x3ce   : > { %5104 = vmatprep.subr.mxu1 %v11736_v46  ;;  %4963 = vmatpush1.msra.mxu0 %v11773_v27 }
 0x3cf   : > { %5106 = vmatpush1.msra.mxu1 %v11738_v35  ;;  %5139 = vmatprep.mubr.f32.mxu1 %v11707_v31 }
 0x3d0   : > { %4967 = vmatprep.subr.mxu0 %v11774_v45  ;;  %5141 = vmatmul.mubr.f32.vlgmr.msra.gmra.mxu1 %v11775_v60 }
 0x3d1   : > { %4971 = vmatpush1.msra.mxu0 %v11776_v16  ;;  %5146 = vmatprep.mubr.f32.mxu1 %v11707_v31 }
 0x3d2   : > { %4975 = vmatprep.subr.mxu0 %v11777_v47  ;;  %5028 = vmatprep.mubr.f32.mxu0 %v11707_v31 }
 0x3d3   : > { %4979 = vmatpush1.msra.mxu0 %v11778_v15 }
 0x3d4   : > { %4983 = vmatprep.subr.mxu0 %v11779_v23  ;;  %5148 = vmatmul.mubr.f32.gmra.mxu1 %v11780_v17 }
 0x3d5   : > { %4987 = vmatpush1.msra.mxu0 %v11781_v39 }
 0x3d6   : > { %4991 = vmatprep.subr.mxu0 %v11782_v28 }
 0x3d7   : > { %4995 = vmatpush1.msra.mxu0 %v11783_v9 }
 0x3d8   : > { %5030 = vmatmul.mubr.f32.vlgmr.msra.gmra.mxu0 %v11775_v60 }
 0x3d9   : > { %5035 = vmatprep.mubr.f32.mxu0 %v11707_v31  ;;  %v4243_v31 = vrot.slane %v4238_v41, %v4242_v20 }
 0x3dc   : > { %5037 = vmatmul.mubr.f32.gmra.mxu0 %v11780_v17 }
 0x44b   : > { %v4596_v38 = vpop.f32.mrf.mxu1 }
 0x44d   : > { %v4598_v5 = vpop.f32.mrf.mxu1 }
 0x44f   : > { %v4603_v7 = vpop.f32.mrf.mxu1 }
 0x451   : > { %v4605_v57 = vpop.f32.mrf.mxu1 }
 0x453   : > { %v4353_v61 = vpop.f32.mrf.mxu0 }
 0x454   : > { %v4354_v26 = vadd.f32 %v4353_v61, %v4243_v31 }
 0x455   : > { %v4355_v2 = vpop.f32.mrf.mxu0 }
 0x456   : > { %v4356_v46 = vadd.f32 %v4355_v2, %v4247_v37  ;;  %v4597_v35 = vadd.f32 %v4596_v38, %v4354_v26 }
 0x458   : > { %v4364_v14 = vpop.f32.mrf.mxu0  ;;  %v4599_v54 = vadd.f32 %v4598_v5, %v4356_v46 }
 0x459   : > { %v4365_v10 = vadd.f32 %v4364_v14, %v4243_v31 }
 0x45a   : > { %v4366_v25 = vpop.f32.mrf.mxu0 }
 0x45b   : > { %v4367_v55 = vadd.f32 %v4366_v25, %v4247_v37  ;;  %v4604_v11 = vadd.f32 %v4603_v7, %v4365_v10  ;;  %v11784_v7 = vld [vmem:[#allocation28_spill] sm:$0xff]  ;;  %v11786_v25 = vld [vmem:[#allocation29_spill] sm:$0xff] }
 0x45d   : > { %v4606_v1 = vadd.f32 %v4605_v57, %v4367_v55  ;;  %v11785_v57 = vld [vmem:[#allocation30_spill] sm:$0xff] }
 0x46c   : > { %v4854_v13 = vpop.f32.mrf.mxu1 }
 0x46e   : > { %v4856_v34 = vpop.f32.mrf.mxu1 }
 0x471   : > { %v4863_v29 = vpop.f32.mrf.mxu1 }
 0x473   : > { %v4865_v0 = vpop.f32.mrf.mxu1 }
 0x476   : > { %v4740_v19 = vpop.f32.mrf.mxu0 }
 0x477   : > { %v4741_v59 = vadd.f32 %v4740_v19, %v4597_v35  ;;  %v11787_v19 = vld [vmem:[#allocation31_spill] sm:$0xff] }
 0x478   : > { %v4742_v50 = vpop.f32.mrf.mxu0 }
 0x479   : > { %v4743_v4 = vadd.f32 %v4742_v50, %v4599_v54  ;;  %v4855_v18 = vadd.f32 %v4854_v13, %v4741_v59 }
 0x47b   : > { %v4748_v40 = vpop.f32.mrf.mxu0  ;;  %v4857_v49 = vadd.f32 %v4856_v34, %v4743_v4 }
 0x47c   : > { %v4749_v42 = vadd.f32 %v4748_v40, %v4604_v11 }
 0x47d   : > { %v4750_v24 = vpop.f32.mrf.mxu0 }
 0x47e   : > { %v4751_v53 = vadd.f32 %v4750_v24, %v4606_v1  ;;  %v4864_v48 = vadd.f32 %v4863_v29, %v4749_v42 }
 0x480   : > { %v4866_v44 = vadd.f32 %v4865_v0, %v4751_v53  ;;  %v11789_v53 = vld [vmem:[#allocation33_spill] sm:$0xff] }
 0x490   : > { %v5142_v63 = vpop.f32.mrf.mxu1 }
 0x492   : > { %v5144_v36 = vpop.f32.mrf.mxu1 }
 0x494   : > { %v5149_v3 = vpop.f32.mrf.mxu1 }
 0x496   : > { %v5151_v60 = vpop.f32.mrf.mxu1 }
 0x498   : > { %v5031_v8 = vpop.f32.mrf.mxu0 }
 0x499   : > { %v5032_v30 = vadd.f32 %v5031_v8, %v4855_v18  ;;  %v11788_v18 = vld [vmem:[#allocation32_spill] sm:$0xff] }
 0x49a   : > { %v5033_v21 = vpop.f32.mrf.mxu0 }
 0x49b   : > { %v5143_v12 = vadd.f32 %v5142_v63, %v5032_v30  ;;  %v5034_v32 = vadd.f32 %v5033_v21, %v4857_v49  ;;  %v11328_v30 = vand.u32 4294901760, %v11789_v53 }
 0x49c   : > { %v5038_v62 = vpop.f32.mrf.mxu0 }
 0x49d   : > { %v6438_v58 = vmul.f32 -1.442695, %v5143_v12  ;;  %v5145_v52 = vadd.f32 %v5144_v36, %v5034_v32  ;;  %v5039_v22 = vadd.f32 %v5038_v62, %v4864_v48  ;;  %v11321_v36 = vand.u32 4294901760, %v11788_v18 }
 0x49e   : > { %v5040_v43 = vpop.f32.mrf.mxu0  ;;  %v11335_v49 = vsub.f32 %v11789_v53, %v11328_v30 }
 0x49f   : > { %8293 = vpow2.f32 %v6438_v58  ;;  %v6439_v6 = vmul.f32 -1.442695, %v5145_v52  ;;  %v5150_v27 = vadd.f32 %v5149_v3, %v5039_v22  ;;  %v5041_v45 = vadd.f32 %v5040_v43, %v4866_v44 }
 0x4a0   : > { %v11325_v8 = vsub.f32 %v11788_v18, %v11321_v36  ;;  %v11345_v32 = vand.u32 4294901760, %v11335_v49 }
 0x4a1   : > { %8295 = vpow2.f32 %v6439_v6  ;;  %v6440_v16 = vmul.f32 -1.442695, %v5150_v27  ;;  %v5152_v47 = vadd.f32 %v5151_v60, %v5041_v45 }
 0x4a2   : > { %v11338_v21 = vand.u32 4294901760, %v11325_v8  ;;  %v5841_v3 = vsub.f32 %v11335_v49, %v11345_v32 }
 0x4a3   : > { %8297 = vpow2.f32 %v6440_v16  ;;  %v6441_v15 = vmul.f32 -1.442695, %v5152_v47 }
 0x4a4   : > { %v5834_v12 = vsub.f32 %v11325_v8, %v11338_v21  ;;  %v5842_v62 = vand.u32 4294901760, %v5841_v3 }
 0x4a5   : > { %8299 = vpow2.f32 %v6441_v15 }
 0x4a6   : > { %v5835_v48 = vand.u32 4294901760, %v5834_v12 }
 0x4ac   : > { %v8294_v23 = vpop.eup %8293 }
 0x4ad   : > { %v5166_v17 = vadd.f32 1.0, %v8294_v23 }
 0x4ae   : > { %v8296_v39 = vpop.eup %8295 }
 0x4af   : > { %8301 = vrcp.f32 %v5166_v17  ;;  %v5167_v28 = vadd.f32 1.0, %v8296_v39 }
 0x4b0   : > { %v8298_v9 = vpop.eup %8297 }
 0x4b1   : > { %8303 = vrcp.f32 %v5167_v28  ;;  %v5168_v38 = vadd.f32 1.0, %v8298_v9 }
 0x4b2   : > { %v8300_v5 = vpop.eup %8299 }
 0x4b3   : > { %8305 = vrcp.f32 %v5168_v38  ;;  %v5169_v61 = vadd.f32 1.0, %v8300_v5 }
 0x4b5   : > { %8307 = vrcp.f32 %v5169_v61 }
 0x4bc   : > { %v8302_v51 = vpop.eup %8301 }
 0x4bd   : > { %v5178_v2 = vmul.f32 %v8302_v51, %v11784_v7 }
 0x4be   : > { %v8304_v33 = vpop.eup %8303 }
 0x4bf   : > { %v5180_v14 = vmul.f32 %v8304_v33, %v11785_v57  ;;  %v11306_v20 = vand.u32 4294901760, %v5178_v2 }
 0x4c0   : > { %v8306_v41 = vpop.eup %8305 }
 0x4c1   : > { %v11308_v13 = vand.u32 4294901760, %v5180_v14  ;;  %8101 = vmatprep.mubr.f32.mxu1 %v11306_v20  ;;  %v5250_v56 = vsub.f32 %v5178_v2, %v11306_v20  ;;  %v5179_v31 = vmul.f32 %v8306_v41, %v11786_v25 }
 0x4c2   : > { %v8308_v34 = vpop.eup %8307 }
 0x4c3   : > { %v5181_v37 = vmul.f32 %v8308_v34, %v11787_v19  ;;  %v5251_v26 = vand.u32 4294901760, %v5250_v56  ;;  %v11314_v29 = vand.u32 4294901760, %v5179_v31  ;;  %v5306_v50 = vsub.f32 %v5180_v14, %v11308_v13 }
 0x4c5   : > { %v5211_v46 = vand.u32 4294901760, %v5181_v37  ;;  %v5252_v10 = vsub.f32 %v5250_v56, %v5251_v26  ;;  %v5260_v35 = vsub.f32 %v5179_v31, %v11314_v29  ;;  %v5307_v59 = vand.u32 4294901760, %v5306_v50 }
 0x4c7   : > { %8090 = vmatprep.subr.mxu0 %v5211_v46  ;;  %v5253_v0 = vand.u32 4294901760, %v5252_v10  ;;  %v5299_v40 = vsub.f32 %v5181_v37, %v5211_v46  ;;  %v5261_v55 = vand.u32 4294901760, %v5260_v35  ;;  %v5308_v11 = vsub.f32 %v5306_v50, %v5307_v59 }
 0x4c8   : > { %8091 = vmatpush3.xpose.msra.mxu0 %v5211_v46 }
 0x4c9   : > { %8092 = vmatprep.subr.mxu0 %v11308_v13  ;;  %8094 = vmatprep.mubr.f32.mxu0 %v5253_v0  ;;  %v5262_v54 = vsub.f32 %v5260_v35, %v5261_v55  ;;  %v5300_v63 = vand.u32 4294901760, %v5299_v40  ;;  %v5309_v1 = vand.u32 4294901760, %v5308_v11 }
 0x4cb   : > { %v5301_v4 = vsub.f32 %v5299_v40, %v5300_v63  ;;  %v5263_v24 = vand.u32 4294901760, %v5262_v54 }
 0x4cc   : > { %8093 = vmatpush3.xpose.msra.mxu0 %v11308_v13 }
 0x4cd   : > { %8104 = vmatprep.subr.mxu0 %v5299_v40  ;;  %v5302_v42 = vand.u32 4294901760, %v5301_v4 }
 0x4cf   : > { %8095 = vmatmul.mubr.f32.vlgmr.msra.gmra.mxu0 %v5263_v24  ;;  %8097 = vmatprep.subr.mxu1 %v5302_v42 }
 0x4d0   : > { %8098 = vmatpush3.xpose.msra.mxu1 %v5302_v42  ;;  %8105 = vmatpush3.xpose.msra.mxu0 %v5299_v40 }
 0x4d1   : > { %8108 = vmatprep.mubr.f32.mxu0 %v5250_v56  ;;  %8099 = vmatprep.subr.mxu1 %v5309_v1 }
 0x4d2   : > { %8106 = vmatprep.subr.mxu0 %v5306_v50 }
 0x4d4   : > { %8100 = vmatpush3.xpose.msra.mxu1 %v5309_v1  ;;  %8107 = vmatpush3.xpose.msra.mxu0 %v5306_v50 }
 0x4d5   : > { %8111 = vmatprep.subr.mxu1 %v5211_v46  ;;  %8118 = vmatprep.subr.mxu0 %v5300_v63 }
 0x4d7   : > { %8102 = vmatmul.mubr.f32.vlgmr.msra.gmra.mxu1 %v11314_v29  ;;  %8109 = vmatmul.mubr.f32.vlgmr.msra.gmra.mxu0 %v5260_v35 }
 0x4d8   : > { %8112 = vmatpush3.xpose.msra.mxu1 %v5211_v46  ;;  %8115 = vmatprep.mubr.f32.mxu1 %v5251_v26 }
 0x4d9   : > { %8119 = vmatpush3.xpose.msra.mxu0 %v5300_v63  ;;  %8122 = vmatprep.mubr.f32.mxu0 %v11306_v20 }
 0x4da   : > { %8113 = vmatprep.subr.mxu1 %v11308_v13  ;;  %8120 = vmatprep.subr.mxu0 %v5307_v59 }
 0x4dc   : > { %8114 = vmatpush3.xpose.msra.mxu1 %v11308_v13 }
 0x4dd   : > { %8121 = vmatpush3.xpose.msra.mxu0 %v5307_v59  ;;  %8125 = vmatprep.subr.mxu1 %v5211_v46 }
 0x4de   : > { %8132 = vmatprep.subr.mxu0 %v11321_v36 }
 0x4df   : > { %8116 = vmatmul.mubr.f32.vlgmr.msra.gmra.mxu1 %v5261_v55 }
 0x4e0   : > { %8123 = vmatmul.mubr.f32.vlgmr.msra.gmra.mxu0 %v11314_v29  ;;  %8126 = vmatpush3.xpose.msra.mxu1 %v5211_v46 }
 0x4e1   : > { %8129 = vmatprep.mubr.f32.mxu1 %v11306_v20  ;;  %8133 = vmatpush3.msra.mxu0 %v11321_v36 }
 0x4e2   : > { %8127 = vmatprep.subr.mxu1 %v11308_v13  ;;  %8134 = vmatprep.subr.mxu0 %v11328_v30 }
 0x4e3   : > { %8135 = vmatpush3.msra.mxu0 %v11328_v30 }
 0x4e4   : > { %8146 = vmatprep.subr.mxu0 %v11325_v8  ;;  %8128 = vmatpush3.xpose.msra.mxu1 %v11308_v13 }
 0x4e5   : > { %8139 = vmatprep.subr.mxu1 %v5835_v48 }
 0x4e7   : > { %8130 = vmatmul.mubr.f32.vlgmr.msra.gmra.mxu1 %v11314_v29 }
 0x4e8   : > { %8140 = vmatpush3.msra.mxu1 %v5835_v48 }
 0x4e9   : > { %8141 = vmatprep.subr.mxu1 %v5842_v62 }
 0x4ea   : > { %8142 = vmatpush3.msra.mxu1 %v5842_v62 }
 0x4eb   : > { %8153 = vmatprep.subr.mxu1 %v11321_v36 }
 0x58f   : > { %v8096_v58 = vpop.f32.mrf.mxu0 }
 0x591   : > { %v5255_v22 = vpop.f32.mrf.mxu0 }
 0x597   : > { %v8103_v52 = vpop.f32.mrf.mxu1  ;;  %v8110_v43 = vpop.f32.mrf.mxu0 }
 0x598   : > { %v5353_v6 = vadd.f32 %v8103_v52, %v8096_v58 }
 0x599   : > { %v5346_v44 = vpop.f32.mrf.mxu1  ;;  %v5428_v60 = vpop.f32.mrf.mxu0 }
 0x59a   : > { %v5347_v27 = vadd.f32 %v5346_v44, %v5255_v22  ;;  %v5436_v47 = vadd.f32 %v8110_v43, %v5353_v6 }
 0x59c   : > { %v5429_v15 = vadd.f32 %v5428_v60, %v5347_v27 }
 0x59f   : > { %v8117_v45 = vpop.f32.mrf.mxu1 }
 0x5a0   : > { %v8124_v23 = vpop.f32.mrf.mxu0  ;;  %v5519_v17 = vadd.f32 %v8117_v45, %v5436_v47  ;;  %v6442_v45 = vld [vmem:[%s11453_s14] ss:$0 sm:$0xff] }
 0x5a1   : > { %v5510_v16 = vpop.f32.mrf.mxu1 }
 0x5a2   : > { %v5511_v39 = vadd.f32 %v5510_v16, %v5429_v15  ;;  %v5595_v28 = vpop.f32.mrf.mxu0  ;;  %v5602_v38 = vadd.f32 %v8124_v23, %v5519_v17  ;;  %v6218_v23 = vld [vmem:[%s589_s29 + $0x8] sm:$0xff] }
 0x5a4   : > { %v5596_v5 = vadd.f32 %v5595_v28, %v5511_v39  ;;  %v6443_v28 = vld [vmem:[%s11790_s30] ss:$0 sm:$0xff] }
 0x5a7   : > { %v8131_v9 = vpop.f32.mrf.mxu1 }
 0x5a8   : > { %v5681_v51 = vadd.f32 %v8131_v9, %v5602_v38  ;;  %v6217_v9 = vld [vmem:[%s589_s29] sm:$0xff]  ;;  %s6242_s29 = scalar_lea.sflag [#allocation4], %s8951_s4 }
 0x5a9   : > { %v5674_v61 = vpop.f32.mrf.mxu1 }
 0x5aa   : > { %v5675_v7 = vadd.f32 %v5674_v61, %v5596_v5  ;;  %v5685_v33 = vmul.f32 0.088388346, %v5681_v51 }
 0x5ac   : > { %v5684_v2 = vmul.f32 0.088388346, %v5675_v7  ;;  %v5690_v14 = vsel %vm5686_vm0, %v5685_v33, -inf }
 0x5ae   : > { %v5687_v57 = vsel %vm5686_vm0, %v5684_v2, -inf }
 0x5af   : > { %5688 = vmax.xlane.f32.xlu0 %v5687_v57 }
 0x5b3   : > { %5691 = vmax.xlane.f32.xlu0 %v5690_v14 }
 0x638   : > { %v5689_v20 = vpop.xlane.xlu0 %5688 }
 0x639   : > { %v5693_v41 = vsub.f32 %v5684_v2, %v5689_v20 }
 0x63b   : > { %v5695_v13 = vmul.f32 1.442695, %v5693_v41 }
 0x63c   : > { %v5692_v56 = vpop.xlane.xlu0 %5691 }
 0x63d   : > { %8309 = vpow2.f32 %v5695_v13  ;;  %v5694_v25 = vsub.f32 %v5685_v33, %v5692_v56 }
 0x63f   : > { %v5697_v31 = vmul.f32 1.442695, %v5694_v25 }
 0x641   : > { %8311 = vpow2.f32 %v5697_v31 }
 0x64a   : > { %v8310_v34 = vpop.eup %8309 }
 0x64b   : > { %v5699_v19 = vsel %vm5686_vm0, %v8310_v34, 0.0 }
 0x64c   : > { %5700 = vadd.xlane.f32.xlu1 %v5699_v19 }
 0x64e   : > { %v8312_v37 = vpop.eup %8311 }
 0x64f   : > { %v5702_v26 = vsel %vm5686_vm0, %v8312_v37, 0.0 }
 0x650   : > { %5703 = vadd.xlane.f32.xlu1 %v5702_v26 }
 0x6d5   : > { %v5701_v29 = vpop.xlane.xlu1 %5700 }
 0x6d6   : > { %8313 = vrcp.f32 %v5701_v29 }
 0x6d9   : > { %v5704_v50 = vpop.xlane.xlu1 %5703 }
 0x6da   : > { %8315 = vrcp.f32 %v5704_v50 }
 0x6e3   : > { %v8314_v46 = vpop.eup %8313 }
 0x6e4   : > { %v5706_v10 = vmul.f32 %v8314_v46, %v8310_v34 }
 0x6e6   : > { %v5710_v35 = vsel %vm5686_vm0, %v5706_v10, 0 }
 0x6e7   : > { %v8316_v0 = vpop.eup %8315  ;;  %v5782_v40 = vand.u32 4294901760, %v5710_v35 }
 0x6e8   : > { %v5708_v55 = vmul.f32 %v8316_v0, %v8312_v37 }
 0x6e9   : > { %8143 = vmatprep.mubr.f32.mxu1 %v5782_v40  ;;  %v5783_v59 = vsub.f32 %v5710_v35, %v5782_v40 }
 0x6ea   : > { %v5713_v54 = vsel %vm5686_vm0, %v5708_v55, 0 }
 0x6eb   : > { %v5792_v63 = vand.u32 4294901760, %v5713_v54  ;;  %v5784_v4 = vand.u32 4294901760, %v5783_v59 }
 0x6ed   : > { %v5793_v11 = vsub.f32 %v5713_v54, %v5792_v63  ;;  %8144 = vmatmul.mubr.f32.vlgmr.msra.gmra.mxu1 %v5792_v63  ;;  %v5785_v24 = vsub.f32 %v5783_v59, %v5784_v4 }
 0x6ee   : > { %8154 = vmatpush3.msra.mxu1 %v11321_v36  ;;  %8157 = vmatprep.mubr.f32.mxu1 %v5784_v4 }
 0x6ef   : > { %8155 = vmatprep.subr.mxu1 %v11328_v30  ;;  %v5786_v42 = vand.u32 4294901760, %v5785_v24  ;;  %v5794_v1 = vand.u32 4294901760, %v5793_v11 }
 0x6f0   : > { %8156 = vmatpush3.msra.mxu1 %v11328_v30 }
 0x6f1   : > { %8167 = vmatprep.subr.mxu1 %v11321_v36  ;;  %8136 = vmatprep.mubr.f32.mxu0 %v5786_v42  ;;  %v5795_v18 = vsub.f32 %v5793_v11, %v5794_v1 }
 0x6f2   : > { %8158 = vmatmul.mubr.f32.vlgmr.msra.gmra.mxu1 %v5794_v1 }
 0x6f3   : > { %8168 = vmatpush3.msra.mxu1 %v11321_v36  ;;  %8171 = vmatprep.mubr.f32.mxu1 %v5782_v40  ;;  %v5796_v53 = vand.u32 4294901760, %v5795_v18 }
 0x6f4   : > { %8169 = vmatprep.subr.mxu1 %v11328_v30 }
 0x6f5   : > { %8170 = vmatpush3.msra.mxu1 %v11328_v30  ;;  %8137 = vmatmul.mubr.f32.vlgmr.msra.gmra.mxu0 %v5796_v53 }
 0x6f6   : > { %8147 = vmatpush3.msra.mxu0 %v11325_v8  ;;  %8172 = vmatmul.mubr.f32.vlgmr.msra.gmra.mxu1 %v5792_v63 }
 0x6f7   : > { %8148 = vmatprep.subr.mxu0 %v11335_v49  ;;  %8150 = vmatprep.mubr.f32.mxu0 %v5783_v59 }
 0x6f8   : > { %8149 = vmatpush3.msra.mxu0 %v11335_v49 }
 0x6f9   : > { %8160 = vmatprep.subr.mxu0 %v11338_v21  ;;  %8151 = vmatmul.mubr.f32.vlgmr.msra.gmra.mxu0 %v5793_v11 }
 0x6fa   : > { %8161 = vmatpush3.msra.mxu0 %v11338_v21  ;;  %8164 = vmatprep.mubr.f32.mxu0 %v5782_v40 }
 0x6fb   : > { %8162 = vmatprep.subr.mxu0 %v11345_v32 }
 0x6fc   : > { %8163 = vmatpush3.msra.mxu0 %v11345_v32 }
 0x6fd   : > { %8165 = vmatmul.mubr.f32.vlgmr.msra.gmra.mxu0 %v5792_v63 }
 0x7ad   : > { %v8145_v36 = vpop.f32.mrf.mxu1 }
 0x7af   : > { %v5879_v30 = vpop.f32.mrf.mxu1 }
 0x7b2   : > { %v8159_v8 = vpop.f32.mrf.mxu1 }
 0x7b4   : > { %v6043_v62 = vpop.f32.mrf.mxu1 }
 0x7b5   : > { %v8138_v12 = vpop.f32.mrf.mxu0 }
 0x7b6   : > { %v5886_v3 = vadd.f32 %v8145_v36, %v8138_v12  ;;  %v8173_v43 = vpop.f32.mrf.mxu1 }
 0x7b7   : > { %v5788_v48 = vpop.f32.mrf.mxu0 }
 0x7b8   : > { %v5880_v58 = vadd.f32 %v5879_v30, %v5788_v48  ;;  %v6207_v15 = vpop.f32.mrf.mxu1 }
 0x7b9   : > { %v8152_v49 = vpop.f32.mrf.mxu0 }
 0x7ba   : > { %v5969_v52 = vadd.f32 %v8152_v49, %v5886_v3 }
 0x7bb   : > { %v5961_v22 = vpop.f32.mrf.mxu0 }
 0x7bc   : > { %v5962_v21 = vadd.f32 %v5961_v22, %v5880_v58  ;;  %v6052_v44 = vadd.f32 %v8159_v8, %v5969_v52 }
 0x7bd   : > { %v8166_v6 = vpop.f32.mrf.mxu0 }
 0x7be   : > { %v6135_v32 = vadd.f32 %v8166_v6, %v6052_v44  ;;  %v6044_v27 = vadd.f32 %v6043_v62, %v5962_v21 }
 0x7bf   : > { %v6128_v60 = vpop.f32.mrf.mxu0 }
 0x7c0   : > { %v6214_v16 = vadd.f32 %v8173_v43, %v6135_v32  ;;  %v6129_v47 = vadd.f32 %v6128_v60, %v6044_v27 }
 0x7c2   : > { %v6227_v17 = vmul.f32 %v6442_v45, %v6214_v16  ;;  %v6208_v39 = vadd.f32 %v6207_v15, %v6129_v47 }
 0x7c4   : > { %v6229_v38 = vadd.f32 %v6227_v17, %v6218_v23  ;;  %v6226_v5 = vmul.f32 %v6442_v45, %v6208_v39 }
 0x7c6   : > { %v6238_v61 = vadd.f32 %v6443_v28, %v6229_v38  ;;  %v6228_v51 = vadd.f32 %v6226_v5, %v6217_v9 }
 0x7c8   : > { %6240 = vst [vmem:[%s666_s25 + $0x8] sm:$0xff] %v6238_v61  ;;  %v6237_v7 = vadd.f32 %v6443_v28, %v6228_v51 }
 0x7ca   : > { %6239 = vst [vmem:[%s666_s25] sm:$0xff] %v6237_v7 }
 0x7cb   : > { %8542 = shalt.err (!%p8539_p7)
}
 0x7cc   : > { %s8543_s15 = scalar_lea.hbm %s11394_s8, 256  ;;  %s8547_s28 = scalar_lea.hbm %s11791_s6, 512 }
 0x7cd   : > { %p8544_p6 = scmp.ne.s32.totalorder %s11394_s8, %s8543_s15  ;;  %p8548_p10 = scmp.lt.s32.totalorder %s11394_s8, %s11791_s6 }
 0x7ce   : > { %p8549_p11 = scmp.lt.s32.totalorder %s8547_s28, %s8543_s15 }
 0x7cf   : > { %p8545_p0 = pnand %p8544_p6, %p11792_p9 }
 0x7d0   : > { %p8550_p13 = por %p8549_p11, %p8548_p10 }
 0x7d1   : > { %p8546_p8 = pneg %p8545_p0 }
 0x7d3   : > { %p8551_p5 = pnand %p8550_p13, %p8546_p8 }
 0x7d5   : > { %8554 = shalt.err (!%p8551_p5)
}
 0x7d6   : > { %s8629_s0 = smov 128   ;;  %s8630_s25 = smov 8  }
 0x7d7   : > { %8202 = dma.vmem_to_hbm [thread:$0]  (%p11792_p9), %s11396_s19, 256, %s11394_s8, %s6242_s29, %s8629_s0, %s8629_s0, %s8630_s25  }
 0x7d8 PF: > { %s11793_s17 = sld [smem:[#allocation27_spill]]  ;;  %s6270_s18 = sand.u32 1, %s8601_s21  }
 0x7d9   : > { %p11795_p4 = scmp.ge.s32.totalorder %s8613_s24, 2  ;;  %s6271_s16 = scalar_lea.sflag [#allocation4], %s6270_s18 }
 0x7de   : > { %p11794_p1 = scmp.ne.s32.totalorder %s11793_s17, 0 }
 0x7e0   : > { %p8231_p12 = pnand %p11795_p4, %p11794_p1 }
 0x7e2   : > { %p8232_p2 = pneg %p8231_p12 }
 0x7e4   : > { %8596 = dma.done.wait (%p8232_p2), %s6271_s16, 256  }
 0x7e5   : > { %8598 = vsyncadd (%p8232_p2), %s6271_s16, 4294967040  ;;  %s11796_s24 = sld [smem:[#allocation25_spill]]  ;;  %s11799_s21 = smov %s8605_s22 }
 0x7e6   : > { %s11797_s27 = sld [smem:[#allocation24_spill]] }
 0x7e7   : > { %s11798_s23 = sld [smem:[#allocation26_spill]] }
 0x7eb   : > { %p35_p3 = scmp.ge.s32.totalorder %s11796_s24, 4  }
 0x7ec   : > { %s11800_s22 = smov %s11797_s27 }
 0x7ed   :  { %37 = sbr.rel (!%p35_p3) target bundleno = 20 (0x14), region = 166 }
 0x7f2   :  { %6276 = vsyncpa [#allocation3], 1 }
 0x7f3   :  { %6278 = vsyncpa [#allocation3 + $0x1], 1 }
 0x7f4   :  { %6279 = vsyncpa [#allocation6], 1 }
 0x7f5   :  { %6281 = vsyncpa [#allocation6 + $0x1], 1 }
 0x7f6   :  { %6282 = vsyncpa [#allocation9], 1 }
 0x7f7   :  { %6283 = vsyncpa [#allocation12], 1 }
 0x7f8   :  { %6284 = vsyncpa [#allocation15], 1 }
 0x7f9   :  { %6285 = vsyncpa [#allocation4], 1 }
 0x7fa   :  { %6287 = vsyncpa [#allocation4 + $0x1], 1 }

</bundles_post_ra>
